<compile_context>
chip_gen: v5e
topology: v5e:2x2
jax: 0.10.0
libtpu: 0.0.40
codegen_flags: <defaults>
</compile_context>

<pallas_src>
import functools
import math

import jax
import jax.numpy as jnp
from jax import lax
from jax.experimental import pallas as pl
from jax.experimental.pallas import tpu as pltpu


# ----------------------------- Pallas kernel --------------------------------

def bigru_kernel(x_ref,
                 wih_cat_ref, bgi_cat_ref,
                 whh_f_r_ref, whh_f_z_ref, whh_f_n_ref,
                 whh_b_r_ref, whh_b_z_ref, whh_b_n_ref,
                 bhhn_f_ref, bhhn_b_ref,
                 wfc_f_ref, wfc_b_ref, bfc_ref,
                 out_ref, *, seq_len, hidden):
    T, H = seq_len, hidden
    _, B, E = x_ref.shape

    # ---- Hoisted input projection: one (T*B, E) @ (E, 6H) matmul for all t, both dirs.
    x_flat = x_ref[...].reshape(T * B, E)
    gi_all = (jnp.dot(x_flat, wih_cat_ref[...], preferred_element_type=jnp.float32)
              + bgi_cat_ref[...])                       # bias (b_ih [+ b_hh for r,z]) folded in
    gi_all = gi_all.reshape(T, B, 6 * H)
    # Per-gate / per-direction splits done ONCE outside the recurrence.
    gi_r_f = gi_all[:, :, 0 * H:1 * H]
    gi_z_f = gi_all[:, :, 1 * H:2 * H]
    gi_n_f = gi_all[:, :, 2 * H:3 * H]
    gi_r_b = gi_all[:, :, 3 * H:4 * H]
    gi_z_b = gi_all[:, :, 4 * H:5 * H]
    gi_n_b = gi_all[:, :, 5 * H:6 * H]

    # Loop-invariant weights loaded once; bias broadcasts hoisted out of the loop.
    whh_f_r = whh_f_r_ref[...]; whh_f_z = whh_f_z_ref[...]; whh_f_n = whh_f_n_ref[...]
    whh_b_r = whh_b_r_ref[...]; whh_b_z = whh_b_z_ref[...]; whh_b_n = whh_b_n_ref[...]
    bhhn_f = jnp.broadcast_to(bhhn_f_ref[...], (B, H))
    bhhn_b = jnp.broadcast_to(bhhn_b_ref[...], (B, H))

    h_f = jnp.zeros((B, H), jnp.float32)
    h_b = jnp.zeros((B, H), jnp.float32)
    h_f_steps = []
    h_b_steps = [None] * T

    # ---- Fused, fully-unrolled forward+backward recurrence (two independent chains).
    for s in range(T):
        tf = s              # forward time index
        tb = T - 1 - s      # backward time index (PyTorch reverse scan)

        # forward direction cell (gate order r, z, n; lane-aligned (B,H) dots)
        r_f = jax.nn.sigmoid(gi_r_f[tf] + jnp.dot(h_f, whh_f_r,
                                                  preferred_element_type=jnp.float32))
        z_f = jax.nn.sigmoid(gi_z_f[tf] + jnp.dot(h_f, whh_f_z,
                                                  preferred_element_type=jnp.float32))
        n_f = jnp.tanh(gi_n_f[tf] + r_f * (jnp.dot(h_f, whh_f_n,
                                                   preferred_element_type=jnp.float32) + bhhn_f))
        h_f = (1.0 - z_f) * n_f + z_f * h_f

        # backward direction cell (independent dependence chain -> interleaves)
        r_b = jax.nn.sigmoid(gi_r_b[tb] + jnp.dot(h_b, whh_b_r,
                                                  preferred_element_type=jnp.float32))
        z_b = jax.nn.sigmoid(gi_z_b[tb] + jnp.dot(h_b, whh_b_z,
                                                  preferred_element_type=jnp.float32))
        n_b = jnp.tanh(gi_n_b[tb] + r_b * (jnp.dot(h_b, whh_b_n,
                                                   preferred_element_type=jnp.float32) + bhhn_b))
        h_b = (1.0 - z_b) * n_b + z_b * h_b

        h_f_steps.append(h_f)        # forward output at time tf
        h_b_steps[tb] = h_b          # backward output belongs to time tb

    # ---- fc contraction pulled out of the loop: contraction dim = T*H per direction.
    hs_f = jnp.concatenate(h_f_steps, axis=1)            # (B, T*H), time-major blocks
    hs_b = jnp.concatenate(h_b_steps, axis=1)            # (B, T*H), time-major blocks
    logits = (jnp.dot(hs_f, wfc_f_ref[...], preferred_element_type=jnp.float32)
              + jnp.dot(hs_b, wfc_b_ref[...], preferred_element_type=jnp.float32)
              + bfc_ref[...])

    # softmax over classes (dim=1); exact reciprocal keeps sum-to-1 tight.
    m = jnp.max(logits, axis=-1, keepdims=True)
    e = jnp.exp(logits - m)
    denom = jnp.sum(e, axis=-1, keepdims=True)
    out_ref[...] = e * pl.reciprocal(denom, approx=False)


# ------------------------------ wrapper --------------------------------------

def bigru_forward(inputs, kparams, *, seq_len, hidden):
    batch = inputs.shape[0]
    b_pad = max(8, -(-batch // 8) * 8)                       # sublane-align batch
    emb = jnp.take(kparams["embedding"], inputs, axis=0)     # (B, T, E)
    x = jnp.transpose(emb, (1, 0, 2)).astype(jnp.float32)    # (T, B, E) time-major
    if b_pad != batch:
        x = jnp.pad(x, ((0, 0), (0, b_pad - batch), (0, 0)))
    num_classes = kparams["fc_b"].shape[-1]

    kernel = functools.partial(bigru_kernel, seq_len=seq_len, hidden=hidden)
    vmem = pl.BlockSpec(memory_space=pltpu.MemorySpace.VMEM)
    args = (x,
            kparams["wih_cat"], kparams["bgi_cat"],
            kparams["whh_f_r"], kparams["whh_f_z"], kparams["whh_f_n"],
            kparams["whh_b_r"], kparams["whh_b_z"], kparams["whh_b_n"],
            kparams["bhhn_f"], kparams["bhhn_b"],
            kparams["wfc_f"], kparams["wfc_b"], kparams["fc_b"])

    out = pl.pallas_call(
        kernel,
        out_shape=jax.ShapeDtypeStruct((b_pad, num_classes), jnp.float32),
        in_specs=[vmem] * len(args),
        out_specs=vmem,
    )(*args)
    return out[:batch]


# ------------------------- parameter construction ----------------------------

def init_raw_params(key, vocab_size, embed_dim, hidden, num_classes, max_len):
    """Deterministic PyTorch-shaped parameters."""
    ks = jax.random.split(key, 12)
    s = 1.0 / math.sqrt(hidden)

    def u(k, shape, scale):
        return jax.random.uniform(k, shape, jnp.float32, -scale, scale)

    raw = {
        "embedding": u(ks[0], (vocab_size, embed_dim), 0.1),
        # forward direction (gate order r, z, n)
        "W_ih_f": u(ks[1], (3 * hidden, embed_dim), s),
        "W_hh_f": u(ks[2], (3 * hidden, hidden), s),
        "b_ih_f": u(ks[3], (3 * hidden,), s),
        "b_hh_f": u(ks[4], (3 * hidden,), s),
        # reverse direction
        "W_ih_b": u(ks[5], (3 * hidden, embed_dim), s),
        "W_hh_b": u(ks[6], (3 * hidden, hidden), s),
        "b_ih_b": u(ks[7], (3 * hidden,), s),
        "b_hh_b": u(ks[8], (3 * hidden,), s),
        # fc: (num_classes, 2H * maxLength)
        "fc_W": u(ks[9], (num_classes, 2 * hidden * max_len),
                  1.0 / math.sqrt(2 * hidden * max_len)),
        "fc_b": u(ks[10], (num_classes,), 1.0 / math.sqrt(2 * hidden * max_len)),
    }
    return raw


def to_kernel_params(raw, hidden, num_classes, max_len):
    """Transpose / reshape PyTorch params into the layout the kernel expects."""
    H = hidden

    def gate(v, g):                       # gate block g of a (3H, ...) / (3H,) tensor
        return v[g * H:(g + 1) * H]

    # Concatenated input-projection weight: (E, 6H) = [r_f|z_f|n_f|r_b|z_b|n_b].
    wih_cat = jnp.concatenate([raw["W_ih_f"].T, raw["W_ih_b"].T], axis=1)

    # gi bias per direction: b_ih + b_hh for r,z ; b_ih only for n (b_hh_n stays in-loop).
    def gi_bias(b_ih, b_hh):
        return jnp.concatenate([gate(b_ih, 0) + gate(b_hh, 0),
                                gate(b_ih, 1) + gate(b_hh, 1),
                                gate(b_ih, 2)])
    bgi_cat = jnp.concatenate([gi_bias(raw["b_ih_f"], raw["b_hh_f"]),
                               gi_bias(raw["b_ih_b"], raw["b_hh_b"])]).reshape(1, -1)

    # fc weight: PyTorch flattens bigru_out (B, T, 2H) row-major, i.e. column index
    # t*2H + dir*H + h. The reshape below depends on exactly that ordering.
    fc_r = raw["fc_W"].reshape(num_classes, max_len, 2, hidden)        # (C, T, dir, H)
    wfc_f = jnp.transpose(fc_r[:, :, 0, :], (1, 2, 0)).reshape(max_len * hidden, num_classes)
    wfc_b = jnp.transpose(fc_r[:, :, 1, :], (1, 2, 0)).reshape(max_len * hidden, num_classes)

    return {
        "embedding": raw["embedding"],
        "wih_cat": wih_cat,                         # (E, 6H)
        "bgi_cat": bgi_cat,                         # (1, 6H)
        "whh_f_r": gate(raw["W_hh_f"], 0).T,        # (H, H) each, lane-aligned gates
        "whh_f_z": gate(raw["W_hh_f"], 1).T,
        "whh_f_n": gate(raw["W_hh_f"], 2).T,
        "whh_b_r": gate(raw["W_hh_b"], 0).T,
        "whh_b_z": gate(raw["W_hh_b"], 1).T,
        "whh_b_n": gate(raw["W_hh_b"], 2).T,
        "bhhn_f": gate(raw["b_hh_f"], 2).reshape(1, -1),   # (1, H)
        "bhhn_b": gate(raw["b_hh_b"], 2).reshape(1, -1),
        "wfc_f": wfc_f,                             # (T*H, C)
        "wfc_b": wfc_b,                             # (T*H, C)
        "fc_b": raw["fc_b"].reshape(1, -1),         # (1, C)
    }


# ---------------------------- pure-JAX reference -----------------------------

def reference_forward(inputs, raw, hidden, max_len):
    emb = raw["embedding"][inputs]                                # (B, T, E)
    B = emb.shape[0]

    def cell(x_t, h, W_ih, W_hh, b_ih, b_hh):
        gi = x_t @ W_ih.T + b_ih
        gh = h @ W_hh.T + b_hh
        r = jax.nn.sigmoid(gi[:, :hidden] + gh[:, :hidden])
        z = jax.nn.sigmoid(gi[:, hidden:2 * hidden] + gh[:, hidden:2 * hidden])
        n = jnp.tanh(gi[:, 2 * hidden:] + r * gh[:, 2 * hidden:])
        return (1.0 - z) * n + z * h

    h = jnp.zeros((B, hidden), jnp.float32)
    fwd = []
    for t in range(max_len):
        h = cell(emb[:, t], h, raw["W_ih_f"], raw["W_hh_f"], raw["b_ih_f"], raw["b_hh_f"])
        fwd.append(h)
    h = jnp.zeros((B, hidden), jnp.float32)
    bwd = [None] * max_len
    for t in range(max_len - 1, -1, -1):
        h = cell(emb[:, t], h, raw["W_ih_b"], raw["W_hh_b"], raw["b_ih_b"], raw["b_hh_b"])
        bwd[t] = h
    out = jnp.stack([jnp.concatenate([fwd[t], bwd[t]], axis=-1) for t in range(max_len)],
                    axis=1)                                       # (B, T, 2H)
    last = out.reshape(B, -1)                                     # (B, T*2H)
    logits = last @ raw["fc_W"].T + raw["fc_b"]
    return jax.nn.softmax(logits, axis=1)


# ---------------------------------- main --------------------------------------

if __name__ == "__main__":
    vocab_size, embed_dim, hidden, num_classes, max_len = 50, 16, 32, 4, 8
    batch = 2

    key = jax.random.PRNGKey(0)
    k_param, k_in = jax.random.split(key)
    raw = init_raw_params(k_param, vocab_size, embed_dim, hidden, num_classes, max_len)
    kparams = to_kernel_params(raw, hidden, num_classes, max_len)

    inputs = jax.random.randint(k_in, (batch, max_len), 0, vocab_size, dtype=jnp.int32)

    out = bigru_forward(inputs, kparams, seq_len=max_len, hidden=hidden)
    out = jax.block_until_ready(out)

    ref = jax.block_until_ready(reference_forward(inputs, raw, hidden, max_len))
    assert out.shape == (batch, num_classes)
    assert jnp.allclose(out, ref, rtol=1e-3, atol=1e-4), (out, ref)
    assert jnp.allclose(jnp.sum(out, axis=1), 1.0, atol=1e-5)

    print("KERNEL_OK")
</pallas_src>

<mosaic_0001>
module attributes {stable_mosaic.version = 11 : i64} {
  func.func @bigru_kernel(%arg0: memref<8x8x16xf32, #tpu.memory_space<vmem>>, %arg1: memref<16x192xf32, #tpu.memory_space<vmem>>, %arg2: memref<1x192xf32, #tpu.memory_space<vmem>>, %arg3: memref<32x32xf32, #tpu.memory_space<vmem>>, %arg4: memref<32x32xf32, #tpu.memory_space<vmem>>, %arg5: memref<32x32xf32, #tpu.memory_space<vmem>>, %arg6: memref<32x32xf32, #tpu.memory_space<vmem>>, %arg7: memref<32x32xf32, #tpu.memory_space<vmem>>, %arg8: memref<32x32xf32, #tpu.memory_space<vmem>>, %arg9: memref<1x32xf32, #tpu.memory_space<vmem>>, %arg10: memref<1x32xf32, #tpu.memory_space<vmem>>, %arg11: memref<256x4xf32, #tpu.memory_space<vmem>>, %arg12: memref<256x4xf32, #tpu.memory_space<vmem>>, %arg13: memref<1x4xf32, #tpu.memory_space<vmem>>, %arg14: memref<8x4xf32, #tpu.memory_space<vmem>>) attributes {dimension_semantics = [], scalar_prefetch = 0 : i64, scratch_operands = 0 : i64, tpu.core_type = #tpu.core_type<tc>} {
    %c0 = arith.constant 0 : index
    %c0_0 = arith.constant 0 : index
    %c0_1 = arith.constant 0 : index
    %0 = vector.load %arg0[%c0, %c0_0, %c0_1] : memref<8x8x16xf32, #tpu.memory_space<vmem>>, vector<8x8x16xf32>
    %1 = vector.shape_cast %0 : vector<8x8x16xf32> to vector<64x16xf32>
    %c0_2 = arith.constant 0 : index
    %c0_3 = arith.constant 0 : index
    %2 = vector.load %arg1[%c0_2, %c0_3] : memref<16x192xf32, #tpu.memory_space<vmem>>, vector<16x192xf32>
    %cst = arith.constant dense<0.000000e+00> : vector<64x192xf32>
    %3 = tpu.matmul %1, %2, %cst {dimension_numbers = #tpu.dot_dimension_numbers<[1], [0], [0], [1], [0, 0, 1, 1], [], []>} : vector<64x16xf32>, vector<16x192xf32>, vector<64x192xf32> -> vector<64x192xf32>
    %c0_4 = arith.constant 0 : index
    %c0_5 = arith.constant 0 : index
    %4 = vector.load %arg2[%c0_4, %c0_5] : memref<1x192xf32, #tpu.memory_space<vmem>>, vector<1x192xf32>
    %5 = vector.broadcast %4 : vector<1x192xf32> to vector<64x192xf32>
    %6 = arith.addf %3, %5 : vector<64x192xf32>
    %7 = vector.shape_cast %6 : vector<64x192xf32> to vector<8x8x192xf32>
    %8 = vector.extract_strided_slice %7 {offsets = [0, 0, 0], sizes = [8, 8, 32], strides = [1, 1, 1]} : vector<8x8x192xf32> to vector<8x8x32xf32>
    %9 = vector.extract_strided_slice %7 {offsets = [0, 0, 32], sizes = [8, 8, 32], strides = [1, 1, 1]} : vector<8x8x192xf32> to vector<8x8x32xf32>
    %10 = vector.extract_strided_slice %7 {offsets = [0, 0, 64], sizes = [8, 8, 32], strides = [1, 1, 1]} : vector<8x8x192xf32> to vector<8x8x32xf32>
    %11 = vector.extract_strided_slice %7 {offsets = [0, 0, 96], sizes = [8, 8, 32], strides = [1, 1, 1]} : vector<8x8x192xf32> to vector<8x8x32xf32>
    %12 = vector.extract_strided_slice %7 {offsets = [0, 0, 128], sizes = [8, 8, 32], strides = [1, 1, 1]} : vector<8x8x192xf32> to vector<8x8x32xf32>
    %13 = vector.extract_strided_slice %7 {offsets = [0, 0, 160], sizes = [8, 8, 32], strides = [1, 1, 1]} : vector<8x8x192xf32> to vector<8x8x32xf32>
    %c0_6 = arith.constant 0 : index
    %c0_7 = arith.constant 0 : index
    %14 = vector.load %arg3[%c0_6, %c0_7] : memref<32x32xf32, #tpu.memory_space<vmem>>, vector<32x32xf32>
    %c0_8 = arith.constant 0 : index
    %c0_9 = arith.constant 0 : index
    %15 = vector.load %arg4[%c0_8, %c0_9] : memref<32x32xf32, #tpu.memory_space<vmem>>, vector<32x32xf32>
    %c0_10 = arith.constant 0 : index
    %c0_11 = arith.constant 0 : index
    %16 = vector.load %arg5[%c0_10, %c0_11] : memref<32x32xf32, #tpu.memory_space<vmem>>, vector<32x32xf32>
    %c0_12 = arith.constant 0 : index
    %c0_13 = arith.constant 0 : index
    %17 = vector.load %arg6[%c0_12, %c0_13] : memref<32x32xf32, #tpu.memory_space<vmem>>, vector<32x32xf32>
    %c0_14 = arith.constant 0 : index
    %c0_15 = arith.constant 0 : index
    %18 = vector.load %arg7[%c0_14, %c0_15] : memref<32x32xf32, #tpu.memory_space<vmem>>, vector<32x32xf32>
    %c0_16 = arith.constant 0 : index
    %c0_17 = arith.constant 0 : index
    %19 = vector.load %arg8[%c0_16, %c0_17] : memref<32x32xf32, #tpu.memory_space<vmem>>, vector<32x32xf32>
    %c0_18 = arith.constant 0 : index
    %c0_19 = arith.constant 0 : index
    %20 = vector.load %arg9[%c0_18, %c0_19] : memref<1x32xf32, #tpu.memory_space<vmem>>, vector<1x32xf32>
    %21 = vector.shape_cast %20 : vector<1x32xf32> to vector<1x32xf32>
    %22 = vector.broadcast %21 : vector<1x32xf32> to vector<8x32xf32>
    %c0_20 = arith.constant 0 : index
    %c0_21 = arith.constant 0 : index
    %23 = vector.load %arg10[%c0_20, %c0_21] : memref<1x32xf32, #tpu.memory_space<vmem>>, vector<1x32xf32>
    %24 = vector.shape_cast %23 : vector<1x32xf32> to vector<1x32xf32>
    %25 = vector.broadcast %24 : vector<1x32xf32> to vector<8x32xf32>
    %cst_22 = arith.constant 0.000000e+00 : f32
    %26 = vector.broadcast %cst_22 : f32 to vector<8x32xf32>
    %cst_23 = arith.constant 0.000000e+00 : f32
    %27 = vector.broadcast %cst_23 : f32 to vector<8x32xf32>
    %28 = vector.extract_strided_slice %8 {offsets = [0, 0, 0], sizes = [1, 8, 32], strides = [1, 1, 1]} : vector<8x8x32xf32> to vector<1x8x32xf32>
    %29 = vector.shape_cast %28 : vector<1x8x32xf32> to vector<8x32xf32>
    %cst_24 = arith.constant dense<0.000000e+00> : vector<8x32xf32>
    %30 = tpu.matmul %26, %14, %cst_24 {dimension_numbers = #tpu.dot_dimension_numbers<[1], [0], [0], [1], [0, 0, 1, 1], [], []>} : vector<8x32xf32>, vector<32x32xf32>, vector<8x32xf32> -> vector<8x32xf32>
    %31 = arith.addf %29, %30 : vector<8x32xf32>
    %32 = arith.negf %31 : vector<8x32xf32>
    %33 = math.exp %32 : vector<8x32xf32>
    %cst_25 = arith.constant 1.000000e+00 : f32
    %34 = vector.broadcast %cst_25 : f32 to vector<8x32xf32>
    %35 = arith.addf %34, %33 : vector<8x32xf32>
    %36 = arith.divf %34, %35 : vector<8x32xf32>
    %37 = vector.extract_strided_slice %9 {offsets = [0, 0, 0], sizes = [1, 8, 32], strides = [1, 1, 1]} : vector<8x8x32xf32> to vector<1x8x32xf32>
    %38 = vector.shape_cast %37 : vector<1x8x32xf32> to vector<8x32xf32>
    %cst_26 = arith.constant dense<0.000000e+00> : vector<8x32xf32>
    %39 = tpu.matmul %26, %15, %cst_26 {dimension_numbers = #tpu.dot_dimension_numbers<[1], [0], [0], [1], [0, 0, 1, 1], [], []>} : vector<8x32xf32>, vector<32x32xf32>, vector<8x32xf32> -> vector<8x32xf32>
    %40 = arith.addf %38, %39 : vector<8x32xf32>
    %41 = arith.negf %40 : vector<8x32xf32>
    %42 = math.exp %41 : vector<8x32xf32>
    %cst_27 = arith.constant 1.000000e+00 : f32
    %43 = vector.broadcast %cst_27 : f32 to vector<8x32xf32>
    %44 = arith.addf %43, %42 : vector<8x32xf32>
    %45 = arith.divf %43, %44 : vector<8x32xf32>
    %46 = vector.extract_strided_slice %10 {offsets = [0, 0, 0], sizes = [1, 8, 32], strides = [1, 1, 1]} : vector<8x8x32xf32> to vector<1x8x32xf32>
    %47 = vector.shape_cast %46 : vector<1x8x32xf32> to vector<8x32xf32>
    %cst_28 = arith.constant dense<0.000000e+00> : vector<8x32xf32>
    %48 = tpu.matmul %26, %16, %cst_28 {dimension_numbers = #tpu.dot_dimension_numbers<[1], [0], [0], [1], [0, 0, 1, 1], [], []>} : vector<8x32xf32>, vector<32x32xf32>, vector<8x32xf32> -> vector<8x32xf32>
    %49 = arith.addf %48, %22 : vector<8x32xf32>
    %50 = arith.mulf %36, %49 : vector<8x32xf32>
    %51 = arith.addf %47, %50 : vector<8x32xf32>
    %52 = math.tanh %51 : vector<8x32xf32>
    %cst_29 = arith.constant 1.000000e+00 : f32
    %53 = vector.broadcast %cst_29 : f32 to vector<8x32xf32>
    %54 = arith.subf %53, %45 : vector<8x32xf32>
    %55 = arith.mulf %54, %52 : vector<8x32xf32>
    %56 = arith.mulf %45, %26 : vector<8x32xf32>
    %57 = arith.addf %55, %56 : vector<8x32xf32>
    %58 = vector.extract_strided_slice %11 {offsets = [7, 0, 0], sizes = [1, 8, 32], strides = [1, 1, 1]} : vector<8x8x32xf32> to vector<1x8x32xf32>
    %59 = vector.shape_cast %58 : vector<1x8x32xf32> to vector<8x32xf32>
    %cst_30 = arith.constant dense<0.000000e+00> : vector<8x32xf32>
    %60 = tpu.matmul %27, %17, %cst_30 {dimension_numbers = #tpu.dot_dimension_numbers<[1], [0], [0], [1], [0, 0, 1, 1], [], []>} : vector<8x32xf32>, vector<32x32xf32>, vector<8x32xf32> -> vector<8x32xf32>
    %61 = arith.addf %59, %60 : vector<8x32xf32>
    %62 = arith.negf %61 : vector<8x32xf32>
    %63 = math.exp %62 : vector<8x32xf32>
    %cst_31 = arith.constant 1.000000e+00 : f32
    %64 = vector.broadcast %cst_31 : f32 to vector<8x32xf32>
    %65 = arith.addf %64, %63 : vector<8x32xf32>
    %66 = arith.divf %64, %65 : vector<8x32xf32>
    %67 = vector.extract_strided_slice %12 {offsets = [7, 0, 0], sizes = [1, 8, 32], strides = [1, 1, 1]} : vector<8x8x32xf32> to vector<1x8x32xf32>
    %68 = vector.shape_cast %67 : vector<1x8x32xf32> to vector<8x32xf32>
    %cst_32 = arith.constant dense<0.000000e+00> : vector<8x32xf32>
    %69 = tpu.matmul %27, %18, %cst_32 {dimension_numbers = #tpu.dot_dimension_numbers<[1], [0], [0], [1], [0, 0, 1, 1], [], []>} : vector<8x32xf32>, vector<32x32xf32>, vector<8x32xf32> -> vector<8x32xf32>
    %70 = arith.addf %68, %69 : vector<8x32xf32>
    %71 = arith.negf %70 : vector<8x32xf32>
    %72 = math.exp %71 : vector<8x32xf32>
    %cst_33 = arith.constant 1.000000e+00 : f32
    %73 = vector.broadcast %cst_33 : f32 to vector<8x32xf32>
    %74 = arith.addf %73, %72 : vector<8x32xf32>
    %75 = arith.divf %73, %74 : vector<8x32xf32>
    %76 = vector.extract_strided_slice %13 {offsets = [7, 0, 0], sizes = [1, 8, 32], strides = [1, 1, 1]} : vector<8x8x32xf32> to vector<1x8x32xf32>
    %77 = vector.shape_cast %76 : vector<1x8x32xf32> to vector<8x32xf32>
    %cst_34 = arith.constant dense<0.000000e+00> : vector<8x32xf32>
    %78 = tpu.matmul %27, %19, %cst_34 {dimension_numbers = #tpu.dot_dimension_numbers<[1], [0], [0], [1], [0, 0, 1, 1], [], []>} : vector<8x32xf32>, vector<32x32xf32>, vector<8x32xf32> -> vector<8x32xf32>
    %79 = arith.addf %78, %25 : vector<8x32xf32>
    %80 = arith.mulf %66, %79 : vector<8x32xf32>
    %81 = arith.addf %77, %80 : vector<8x32xf32>
    %82 = math.tanh %81 : vector<8x32xf32>
    %cst_35 = arith.constant 1.000000e+00 : f32
    %83 = vector.broadcast %cst_35 : f32 to vector<8x32xf32>
    %84 = arith.subf %83, %75 : vector<8x32xf32>
    %85 = arith.mulf %84, %82 : vector<8x32xf32>
    %86 = arith.mulf %75, %27 : vector<8x32xf32>
    %87 = arith.addf %85, %86 : vector<8x32xf32>
    %88 = vector.extract_strided_slice %8 {offsets = [1, 0, 0], sizes = [1, 8, 32], strides = [1, 1, 1]} : vector<8x8x32xf32> to vector<1x8x32xf32>
    %89 = vector.shape_cast %88 : vector<1x8x32xf32> to vector<8x32xf32>
    %cst_36 = arith.constant dense<0.000000e+00> : vector<8x32xf32>
    %90 = tpu.matmul %57, %14, %cst_36 {dimension_numbers = #tpu.dot_dimension_numbers<[1], [0], [0], [1], [0, 0, 1, 1], [], []>} : vector<8x32xf32>, vector<32x32xf32>, vector<8x32xf32> -> vector<8x32xf32>
    %91 = arith.addf %89, %90 : vector<8x32xf32>
    %92 = arith.negf %91 : vector<8x32xf32>
    %93 = math.exp %92 : vector<8x32xf32>
    %cst_37 = arith.constant 1.000000e+00 : f32
    %94 = vector.broadcast %cst_37 : f32 to vector<8x32xf32>
    %95 = arith.addf %94, %93 : vector<8x32xf32>
    %96 = arith.divf %94, %95 : vector<8x32xf32>
    %97 = vector.extract_strided_slice %9 {offsets = [1, 0, 0], sizes = [1, 8, 32], strides = [1, 1, 1]} : vector<8x8x32xf32> to vector<1x8x32xf32>
    %98 = vector.shape_cast %97 : vector<1x8x32xf32> to vector<8x32xf32>
    %cst_38 = arith.constant dense<0.000000e+00> : vector<8x32xf32>
    %99 = tpu.matmul %57, %15, %cst_38 {dimension_numbers = #tpu.dot_dimension_numbers<[1], [0], [0], [1], [0, 0, 1, 1], [], []>} : vector<8x32xf32>, vector<32x32xf32>, vector<8x32xf32> -> vector<8x32xf32>
    %100 = arith.addf %98, %99 : vector<8x32xf32>
    %101 = arith.negf %100 : vector<8x32xf32>
    %102 = math.exp %101 : vector<8x32xf32>
    %cst_39 = arith.constant 1.000000e+00 : f32
    %103 = vector.broadcast %cst_39 : f32 to vector<8x32xf32>
    %104 = arith.addf %103, %102 : vector<8x32xf32>
    %105 = arith.divf %103, %104 : vector<8x32xf32>
    %106 = vector.extract_strided_slice %10 {offsets = [1, 0, 0], sizes = [1, 8, 32], strides = [1, 1, 1]} : vector<8x8x32xf32> to vector<1x8x32xf32>
    %107 = vector.shape_cast %106 : vector<1x8x32xf32> to vector<8x32xf32>
    %cst_40 = arith.constant dense<0.000000e+00> : vector<8x32xf32>
    %108 = tpu.matmul %57, %16, %cst_40 {dimension_numbers = #tpu.dot_dimension_numbers<[1], [0], [0], [1], [0, 0, 1, 1], [], []>} : vector<8x32xf32>, vector<32x32xf32>, vector<8x32xf32> -> vector<8x32xf32>
    %109 = arith.addf %108, %22 : vector<8x32xf32>
    %110 = arith.mulf %96, %109 : vector<8x32xf32>
    %111 = arith.addf %107, %110 : vector<8x32xf32>
    %112 = math.tanh %111 : vector<8x32xf32>
    %cst_41 = arith.constant 1.000000e+00 : f32
    %113 = vector.broadcast %cst_41 : f32 to vector<8x32xf32>
    %114 = arith.subf %113, %105 : vector<8x32xf32>
    %115 = arith.mulf %114, %112 : vector<8x32xf32>
    %116 = arith.mulf %105, %57 : vector<8x32xf32>
    %117 = arith.addf %115, %116 : vector<8x32xf32>
    %118 = vector.extract_strided_slice %11 {offsets = [6, 0, 0], sizes = [1, 8, 32], strides = [1, 1, 1]} : vector<8x8x32xf32> to vector<1x8x32xf32>
    %119 = vector.shape_cast %118 : vector<1x8x32xf32> to vector<8x32xf32>
    %cst_42 = arith.constant dense<0.000000e+00> : vector<8x32xf32>
    %120 = tpu.matmul %87, %17, %cst_42 {dimension_numbers = #tpu.dot_dimension_numbers<[1], [0], [0], [1], [0, 0, 1, 1], [], []>} : vector<8x32xf32>, vector<32x32xf32>, vector<8x32xf32> -> vector<8x32xf32>
    %121 = arith.addf %119, %120 : vector<8x32xf32>
    %122 = arith.negf %121 : vector<8x32xf32>
    %123 = math.exp %122 : vector<8x32xf32>
    %cst_43 = arith.constant 1.000000e+00 : f32
    %124 = vector.broadcast %cst_43 : f32 to vector<8x32xf32>
    %125 = arith.addf %124, %123 : vector<8x32xf32>
    %126 = arith.divf %124, %125 : vector<8x32xf32>
    %127 = vector.extract_strided_slice %12 {offsets = [6, 0, 0], sizes = [1, 8, 32], strides = [1, 1, 1]} : vector<8x8x32xf32> to vector<1x8x32xf32>
    %128 = vector.shape_cast %127 : vector<1x8x32xf32> to vector<8x32xf32>
    %cst_44 = arith.constant dense<0.000000e+00> : vector<8x32xf32>
    %129 = tpu.matmul %87, %18, %cst_44 {dimension_numbers = #tpu.dot_dimension_numbers<[1], [0], [0], [1], [0, 0, 1, 1], [], []>} : vector<8x32xf32>, vector<32x32xf32>, vector<8x32xf32> -> vector<8x32xf32>
    %130 = arith.addf %128, %129 : vector<8x32xf32>
    %131 = arith.negf %130 : vector<8x32xf32>
    %132 = math.exp %131 : vector<8x32xf32>
    %cst_45 = arith.constant 1.000000e+00 : f32
    %133 = vector.broadcast %cst_45 : f32 to vector<8x32xf32>
    %134 = arith.addf %133, %132 : vector<8x32xf32>
    %135 = arith.divf %133, %134 : vector<8x32xf32>
    %136 = vector.extract_strided_slice %13 {offsets = [6, 0, 0], sizes = [1, 8, 32], strides = [1, 1, 1]} : vector<8x8x32xf32> to vector<1x8x32xf32>
    %137 = vector.shape_cast %136 : vector<1x8x32xf32> to vector<8x32xf32>
    %cst_46 = arith.constant dense<0.000000e+00> : vector<8x32xf32>
    %138 = tpu.matmul %87, %19, %cst_46 {dimension_numbers = #tpu.dot_dimension_numbers<[1], [0], [0], [1], [0, 0, 1, 1], [], []>} : vector<8x32xf32>, vector<32x32xf32>, vector<8x32xf32> -> vector<8x32xf32>
    %139 = arith.addf %138, %25 : vector<8x32xf32>
    %140 = arith.mulf %126, %139 : vector<8x32xf32>
    %141 = arith.addf %137, %140 : vector<8x32xf32>
    %142 = math.tanh %141 : vector<8x32xf32>
    %cst_47 = arith.constant 1.000000e+00 : f32
    %143 = vector.broadcast %cst_47 : f32 to vector<8x32xf32>
    %144 = arith.subf %143, %135 : vector<8x32xf32>
    %145 = arith.mulf %144, %142 : vector<8x32xf32>
    %146 = arith.mulf %135, %87 : vector<8x32xf32>
    %147 = arith.addf %145, %146 : vector<8x32xf32>
    %148 = vector.extract_strided_slice %8 {offsets = [2, 0, 0], sizes = [1, 8, 32], strides = [1, 1, 1]} : vector<8x8x32xf32> to vector<1x8x32xf32>
    %149 = vector.shape_cast %148 : vector<1x8x32xf32> to vector<8x32xf32>
    %cst_48 = arith.constant dense<0.000000e+00> : vector<8x32xf32>
    %150 = tpu.matmul %117, %14, %cst_48 {dimension_numbers = #tpu.dot_dimension_numbers<[1], [0], [0], [1], [0, 0, 1, 1], [], []>} : vector<8x32xf32>, vector<32x32xf32>, vector<8x32xf32> -> vector<8x32xf32>
    %151 = arith.addf %149, %150 : vector<8x32xf32>
    %152 = arith.negf %151 : vector<8x32xf32>
    %153 = math.exp %152 : vector<8x32xf32>
    %cst_49 = arith.constant 1.000000e+00 : f32
    %154 = vector.broadcast %cst_49 : f32 to vector<8x32xf32>
    %155 = arith.addf %154, %153 : vector<8x32xf32>
    %156 = arith.divf %154, %155 : vector<8x32xf32>
    %157 = vector.extract_strided_slice %9 {offsets = [2, 0, 0], sizes = [1, 8, 32], strides = [1, 1, 1]} : vector<8x8x32xf32> to vector<1x8x32xf32>
    %158 = vector.shape_cast %157 : vector<1x8x32xf32> to vector<8x32xf32>
    %cst_50 = arith.constant dense<0.000000e+00> : vector<8x32xf32>
    %159 = tpu.matmul %117, %15, %cst_50 {dimension_numbers = #tpu.dot_dimension_numbers<[1], [0], [0], [1], [0, 0, 1, 1], [], []>} : vector<8x32xf32>, vector<32x32xf32>, vector<8x32xf32> -> vector<8x32xf32>
    %160 = arith.addf %158, %159 : vector<8x32xf32>
    %161 = arith.negf %160 : vector<8x32xf32>
    %162 = math.exp %161 : vector<8x32xf32>
    %cst_51 = arith.constant 1.000000e+00 : f32
    %163 = vector.broadcast %cst_51 : f32 to vector<8x32xf32>
    %164 = arith.addf %163, %162 : vector<8x32xf32>
    %165 = arith.divf %163, %164 : vector<8x32xf32>
    %166 = vector.extract_strided_slice %10 {offsets = [2, 0, 0], sizes = [1, 8, 32], strides = [1, 1, 1]} : vector<8x8x32xf32> to vector<1x8x32xf32>
    %167 = vector.shape_cast %166 : vector<1x8x32xf32> to vector<8x32xf32>
    %cst_52 = arith.constant dense<0.000000e+00> : vector<8x32xf32>
    %168 = tpu.matmul %117, %16, %cst_52 {dimension_numbers = #tpu.dot_dimension_numbers<[1], [0], [0], [1], [0, 0, 1, 1], [], []>} : vector<8x32xf32>, vector<32x32xf32>, vector<8x32xf32> -> vector<8x32xf32>
    %169 = arith.addf %168, %22 : vector<8x32xf32>
    %170 = arith.mulf %156, %169 : vector<8x32xf32>
    %171 = arith.addf %167, %170 : vector<8x32xf32>
    %172 = math.tanh %171 : vector<8x32xf32>
    %cst_53 = arith.constant 1.000000e+00 : f32
    %173 = vector.broadcast %cst_53 : f32 to vector<8x32xf32>
    %174 = arith.subf %173, %165 : vector<8x32xf32>
    %175 = arith.mulf %174, %172 : vector<8x32xf32>
    %176 = arith.mulf %165, %117 : vector<8x32xf32>
    %177 = arith.addf %175, %176 : vector<8x32xf32>
    %178 = vector.extract_strided_slice %11 {offsets = [5, 0, 0], sizes = [1, 8, 32], strides = [1, 1, 1]} : vector<8x8x32xf32> to vector<1x8x32xf32>
    %179 = vector.shape_cast %178 : vector<1x8x32xf32> to vector<8x32xf32>
    %cst_54 = arith.constant dense<0.000000e+00> : vector<8x32xf32>
    %180 = tpu.matmul %147, %17, %cst_54 {dimension_numbers = #tpu.dot_dimension_numbers<[1], [0], [0], [1], [0, 0, 1, 1], [], []>} : vector<8x32xf32>, vector<32x32xf32>, vector<8x32xf32> -> vector<8x32xf32>
    %181 = arith.addf %179, %180 : vector<8x32xf32>
    %182 = arith.negf %181 : vector<8x32xf32>
    %183 = math.exp %182 : vector<8x32xf32>
    %cst_55 = arith.constant 1.000000e+00 : f32
    %184 = vector.broadcast %cst_55 : f32 to vector<8x32xf32>
    %185 = arith.addf %184, %183 : vector<8x32xf32>
    %186 = arith.divf %184, %185 : vector<8x32xf32>
    %187 = vector.extract_strided_slice %12 {offsets = [5, 0, 0], sizes = [1, 8, 32], strides = [1, 1, 1]} : vector<8x8x32xf32> to vector<1x8x32xf32>
    %188 = vector.shape_cast %187 : vector<1x8x32xf32> to vector<8x32xf32>
    %cst_56 = arith.constant dense<0.000000e+00> : vector<8x32xf32>
    %189 = tpu.matmul %147, %18, %cst_56 {dimension_numbers = #tpu.dot_dimension_numbers<[1], [0], [0], [1], [0, 0, 1, 1], [], []>} : vector<8x32xf32>, vector<32x32xf32>, vector<8x32xf32> -> vector<8x32xf32>
    %190 = arith.addf %188, %189 : vector<8x32xf32>
    %191 = arith.negf %190 : vector<8x32xf32>
    %192 = math.exp %191 : vector<8x32xf32>
    %cst_57 = arith.constant 1.000000e+00 : f32
    %193 = vector.broadcast %cst_57 : f32 to vector<8x32xf32>
    %194 = arith.addf %193, %192 : vector<8x32xf32>
    %195 = arith.divf %193, %194 : vector<8x32xf32>
    %196 = vector.extract_strided_slice %13 {offsets = [5, 0, 0], sizes = [1, 8, 32], strides = [1, 1, 1]} : vector<8x8x32xf32> to vector<1x8x32xf32>
    %197 = vector.shape_cast %196 : vector<1x8x32xf32> to vector<8x32xf32>
    %cst_58 = arith.constant dense<0.000000e+00> : vector<8x32xf32>
    %198 = tpu.matmul %147, %19, %cst_58 {dimension_numbers = #tpu.dot_dimension_numbers<[1], [0], [0], [1], [0, 0, 1, 1], [], []>} : vector<8x32xf32>, vector<32x32xf32>, vector<8x32xf32> -> vector<8x32xf32>
    %199 = arith.addf %198, %25 : vector<8x32xf32>
    %200 = arith.mulf %186, %199 : vector<8x32xf32>
    %201 = arith.addf %197, %200 : vector<8x32xf32>
    %202 = math.tanh %201 : vector<8x32xf32>
    %cst_59 = arith.constant 1.000000e+00 : f32
    %203 = vector.broadcast %cst_59 : f32 to vector<8x32xf32>
    %204 = arith.subf %203, %195 : vector<8x32xf32>
    %205 = arith.mulf %204, %202 : vector<8x32xf32>
    %206 = arith.mulf %195, %147 : vector<8x32xf32>
    %207 = arith.addf %205, %206 : vector<8x32xf32>
    %208 = vector.extract_strided_slice %8 {offsets = [3, 0, 0], sizes = [1, 8, 32], strides = [1, 1, 1]} : vector<8x8x32xf32> to vector<1x8x32xf32>
    %209 = vector.shape_cast %208 : vector<1x8x32xf32> to vector<8x32xf32>
    %cst_60 = arith.constant dense<0.000000e+00> : vector<8x32xf32>
    %210 = tpu.matmul %177, %14, %cst_60 {dimension_numbers = #tpu.dot_dimension_numbers<[1], [0], [0], [1], [0, 0, 1, 1], [], []>} : vector<8x32xf32>, vector<32x32xf32>, vector<8x32xf32> -> vector<8x32xf32>
    %211 = arith.addf %209, %210 : vector<8x32xf32>
    %212 = arith.negf %211 : vector<8x32xf32>
    %213 = math.exp %212 : vector<8x32xf32>
    %cst_61 = arith.constant 1.000000e+00 : f32
    %214 = vector.broadcast %cst_61 : f32 to vector<8x32xf32>
    %215 = arith.addf %214, %213 : vector<8x32xf32>
    %216 = arith.divf %214, %215 : vector<8x32xf32>
    %217 = vector.extract_strided_slice %9 {offsets = [3, 0, 0], sizes = [1, 8, 32], strides = [1, 1, 1]} : vector<8x8x32xf32> to vector<1x8x32xf32>
    %218 = vector.shape_cast %217 : vector<1x8x32xf32> to vector<8x32xf32>
    %cst_62 = arith.constant dense<0.000000e+00> : vector<8x32xf32>
    %219 = tpu.matmul %177, %15, %cst_62 {dimension_numbers = #tpu.dot_dimension_numbers<[1], [0], [0], [1], [0, 0, 1, 1], [], []>} : vector<8x32xf32>, vector<32x32xf32>, vector<8x32xf32> -> vector<8x32xf32>
    %220 = arith.addf %218, %219 : vector<8x32xf32>
    %221 = arith.negf %220 : vector<8x32xf32>
    %222 = math.exp %221 : vector<8x32xf32>
    %cst_63 = arith.constant 1.000000e+00 : f32
    %223 = vector.broadcast %cst_63 : f32 to vector<8x32xf32>
    %224 = arith.addf %223, %222 : vector<8x32xf32>
    %225 = arith.divf %223, %224 : vector<8x32xf32>
    %226 = vector.extract_strided_slice %10 {offsets = [3, 0, 0], sizes = [1, 8, 32], strides = [1, 1, 1]} : vector<8x8x32xf32> to vector<1x8x32xf32>
    %227 = vector.shape_cast %226 : vector<1x8x32xf32> to vector<8x32xf32>
    %cst_64 = arith.constant dense<0.000000e+00> : vector<8x32xf32>
    %228 = tpu.matmul %177, %16, %cst_64 {dimension_numbers = #tpu.dot_dimension_numbers<[1], [0], [0], [1], [0, 0, 1, 1], [], []>} : vector<8x32xf32>, vector<32x32xf32>, vector<8x32xf32> -> vector<8x32xf32>
    %229 = arith.addf %228, %22 : vector<8x32xf32>
    %230 = arith.mulf %216, %229 : vector<8x32xf32>
    %231 = arith.addf %227, %230 : vector<8x32xf32>
    %232 = math.tanh %231 : vector<8x32xf32>
    %cst_65 = arith.constant 1.000000e+00 : f32
    %233 = vector.broadcast %cst_65 : f32 to vector<8x32xf32>
    %234 = arith.subf %233, %225 : vector<8x32xf32>
    %235 = arith.mulf %234, %232 : vector<8x32xf32>
    %236 = arith.mulf %225, %177 : vector<8x32xf32>
    %237 = arith.addf %235, %236 : vector<8x32xf32>
    %238 = vector.extract_strided_slice %11 {offsets = [4, 0, 0], sizes = [1, 8, 32], strides = [1, 1, 1]} : vector<8x8x32xf32> to vector<1x8x32xf32>
    %239 = vector.shape_cast %238 : vector<1x8x32xf32> to vector<8x32xf32>
    %cst_66 = arith.constant dense<0.000000e+00> : vector<8x32xf32>
    %240 = tpu.matmul %207, %17, %cst_66 {dimension_numbers = #tpu.dot_dimension_numbers<[1], [0], [0], [1], [0, 0, 1, 1], [], []>} : vector<8x32xf32>, vector<32x32xf32>, vector<8x32xf32> -> vector<8x32xf32>
    %241 = arith.addf %239, %240 : vector<8x32xf32>
    %242 = arith.negf %241 : vector<8x32xf32>
    %243 = math.exp %242 : vector<8x32xf32>
    %cst_67 = arith.constant 1.000000e+00 : f32
    %244 = vector.broadcast %cst_67 : f32 to vector<8x32xf32>
    %245 = arith.addf %244, %243 : vector<8x32xf32>
    %246 = arith.divf %244, %245 : vector<8x32xf32>
    %247 = vector.extract_strided_slice %12 {offsets = [4, 0, 0], sizes = [1, 8, 32], strides = [1, 1, 1]} : vector<8x8x32xf32> to vector<1x8x32xf32>
    %248 = vector.shape_cast %247 : vector<1x8x32xf32> to vector<8x32xf32>
    %cst_68 = arith.constant dense<0.000000e+00> : vector<8x32xf32>
    %249 = tpu.matmul %207, %18, %cst_68 {dimension_numbers = #tpu.dot_dimension_numbers<[1], [0], [0], [1], [0, 0, 1, 1], [], []>} : vector<8x32xf32>, vector<32x32xf32>, vector<8x32xf32> -> vector<8x32xf32>
    %250 = arith.addf %248, %249 : vector<8x32xf32>
    %251 = arith.negf %250 : vector<8x32xf32>
    %252 = math.exp %251 : vector<8x32xf32>
    %cst_69 = arith.constant 1.000000e+00 : f32
    %253 = vector.broadcast %cst_69 : f32 to vector<8x32xf32>
    %254 = arith.addf %253, %252 : vector<8x32xf32>
    %255 = arith.divf %253, %254 : vector<8x32xf32>
    %256 = vector.extract_strided_slice %13 {offsets = [4, 0, 0], sizes = [1, 8, 32], strides = [1, 1, 1]} : vector<8x8x32xf32> to vector<1x8x32xf32>
    %257 = vector.shape_cast %256 : vector<1x8x32xf32> to vector<8x32xf32>
    %cst_70 = arith.constant dense<0.000000e+00> : vector<8x32xf32>
    %258 = tpu.matmul %207, %19, %cst_70 {dimension_numbers = #tpu.dot_dimension_numbers<[1], [0], [0], [1], [0, 0, 1, 1], [], []>} : vector<8x32xf32>, vector<32x32xf32>, vector<8x32xf32> -> vector<8x32xf32>
    %259 = arith.addf %258, %25 : vector<8x32xf32>
    %260 = arith.mulf %246, %259 : vector<8x32xf32>
    %261 = arith.addf %257, %260 : vector<8x32xf32>
    %262 = math.tanh %261 : vector<8x32xf32>
    %cst_71 = arith.constant 1.000000e+00 : f32
    %263 = vector.broadcast %cst_71 : f32 to vector<8x32xf32>
    %264 = arith.subf %263, %255 : vector<8x32xf32>
    %265 = arith.mulf %264, %262 : vector<8x32xf32>
    %266 = arith.mulf %255, %207 : vector<8x32xf32>
    %267 = arith.addf %265, %266 : vector<8x32xf32>
    %268 = vector.extract_strided_slice %8 {offsets = [4, 0, 0], sizes = [1, 8, 32], strides = [1, 1, 1]} : vector<8x8x32xf32> to vector<1x8x32xf32>
    %269 = vector.shape_cast %268 : vector<1x8x32xf32> to vector<8x32xf32>
    %cst_72 = arith.constant dense<0.000000e+00> : vector<8x32xf32>
    %270 = tpu.matmul %237, %14, %cst_72 {dimension_numbers = #tpu.dot_dimension_numbers<[1], [0], [0], [1], [0, 0, 1, 1], [], []>} : vector<8x32xf32>, vector<32x32xf32>, vector<8x32xf32> -> vector<8x32xf32>
    %271 = arith.addf %269, %270 : vector<8x32xf32>
    %272 = arith.negf %271 : vector<8x32xf32>
    %273 = math.exp %272 : vector<8x32xf32>
    %cst_73 = arith.constant 1.000000e+00 : f32
    %274 = vector.broadcast %cst_73 : f32 to vector<8x32xf32>
    %275 = arith.addf %274, %273 : vector<8x32xf32>
    %276 = arith.divf %274, %275 : vector<8x32xf32>
    %277 = vector.extract_strided_slice %9 {offsets = [4, 0, 0], sizes = [1, 8, 32], strides = [1, 1, 1]} : vector<8x8x32xf32> to vector<1x8x32xf32>
    %278 = vector.shape_cast %277 : vector<1x8x32xf32> to vector<8x32xf32>
    %cst_74 = arith.constant dense<0.000000e+00> : vector<8x32xf32>
    %279 = tpu.matmul %237, %15, %cst_74 {dimension_numbers = #tpu.dot_dimension_numbers<[1], [0], [0], [1], [0, 0, 1, 1], [], []>} : vector<8x32xf32>, vector<32x32xf32>, vector<8x32xf32> -> vector<8x32xf32>
    %280 = arith.addf %278, %279 : vector<8x32xf32>
    %281 = arith.negf %280 : vector<8x32xf32>
    %282 = math.exp %281 : vector<8x32xf32>
    %cst_75 = arith.constant 1.000000e+00 : f32
    %283 = vector.broadcast %cst_75 : f32 to vector<8x32xf32>
    %284 = arith.addf %283, %282 : vector<8x32xf32>
    %285 = arith.divf %283, %284 : vector<8x32xf32>
    %286 = vector.extract_strided_slice %10 {offsets = [4, 0, 0], sizes = [1, 8, 32], strides = [1, 1, 1]} : vector<8x8x32xf32> to vector<1x8x32xf32>
    %287 = vector.shape_cast %286 : vector<1x8x32xf32> to vector<8x32xf32>
    %cst_76 = arith.constant dense<0.000000e+00> : vector<8x32xf32>
    %288 = tpu.matmul %237, %16, %cst_76 {dimension_numbers = #tpu.dot_dimension_numbers<[1], [0], [0], [1], [0, 0, 1, 1], [], []>} : vector<8x32xf32>, vector<32x32xf32>, vector<8x32xf32> -> vector<8x32xf32>
    %289 = arith.addf %288, %22 : vector<8x32xf32>
    %290 = arith.mulf %276, %289 : vector<8x32xf32>
    %291 = arith.addf %287, %290 : vector<8x32xf32>
    %292 = math.tanh %291 : vector<8x32xf32>
    %cst_77 = arith.constant 1.000000e+00 : f32
    %293 = vector.broadcast %cst_77 : f32 to vector<8x32xf32>
    %294 = arith.subf %293, %285 : vector<8x32xf32>
    %295 = arith.mulf %294, %292 : vector<8x32xf32>
    %296 = arith.mulf %285, %237 : vector<8x32xf32>
    %297 = arith.addf %295, %296 : vector<8x32xf32>
    %298 = vector.extract_strided_slice %11 {offsets = [3, 0, 0], sizes = [1, 8, 32], strides = [1, 1, 1]} : vector<8x8x32xf32> to vector<1x8x32xf32>
    %299 = vector.shape_cast %298 : vector<1x8x32xf32> to vector<8x32xf32>
    %cst_78 = arith.constant dense<0.000000e+00> : vector<8x32xf32>
    %300 = tpu.matmul %267, %17, %cst_78 {dimension_numbers = #tpu.dot_dimension_numbers<[1], [0], [0], [1], [0, 0, 1, 1], [], []>} : vector<8x32xf32>, vector<32x32xf32>, vector<8x32xf32> -> vector<8x32xf32>
    %301 = arith.addf %299, %300 : vector<8x32xf32>
    %302 = arith.negf %301 : vector<8x32xf32>
    %303 = math.exp %302 : vector<8x32xf32>
    %cst_79 = arith.constant 1.000000e+00 : f32
    %304 = vector.broadcast %cst_79 : f32 to vector<8x32xf32>
    %305 = arith.addf %304, %303 : vector<8x32xf32>
    %306 = arith.divf %304, %305 : vector<8x32xf32>
    %307 = vector.extract_strided_slice %12 {offsets = [3, 0, 0], sizes = [1, 8, 32], strides = [1, 1, 1]} : vector<8x8x32xf32> to vector<1x8x32xf32>
    %308 = vector.shape_cast %307 : vector<1x8x32xf32> to vector<8x32xf32>
    %cst_80 = arith.constant dense<0.000000e+00> : vector<8x32xf32>
    %309 = tpu.matmul %267, %18, %cst_80 {dimension_numbers = #tpu.dot_dimension_numbers<[1], [0], [0], [1], [0, 0, 1, 1], [], []>} : vector<8x32xf32>, vector<32x32xf32>, vector<8x32xf32> -> vector<8x32xf32>
    %310 = arith.addf %308, %309 : vector<8x32xf32>
    %311 = arith.negf %310 : vector<8x32xf32>
    %312 = math.exp %311 : vector<8x32xf32>
    %cst_81 = arith.constant 1.000000e+00 : f32
    %313 = vector.broadcast %cst_81 : f32 to vector<8x32xf32>
    %314 = arith.addf %313, %312 : vector<8x32xf32>
    %315 = arith.divf %313, %314 : vector<8x32xf32>
    %316 = vector.extract_strided_slice %13 {offsets = [3, 0, 0], sizes = [1, 8, 32], strides = [1, 1, 1]} : vector<8x8x32xf32> to vector<1x8x32xf32>
    %317 = vector.shape_cast %316 : vector<1x8x32xf32> to vector<8x32xf32>
    %cst_82 = arith.constant dense<0.000000e+00> : vector<8x32xf32>
    %318 = tpu.matmul %267, %19, %cst_82 {dimension_numbers = #tpu.dot_dimension_numbers<[1], [0], [0], [1], [0, 0, 1, 1], [], []>} : vector<8x32xf32>, vector<32x32xf32>, vector<8x32xf32> -> vector<8x32xf32>
    %319 = arith.addf %318, %25 : vector<8x32xf32>
    %320 = arith.mulf %306, %319 : vector<8x32xf32>
    %321 = arith.addf %317, %320 : vector<8x32xf32>
    %322 = math.tanh %321 : vector<8x32xf32>
    %cst_83 = arith.constant 1.000000e+00 : f32
    %323 = vector.broadcast %cst_83 : f32 to vector<8x32xf32>
    %324 = arith.subf %323, %315 : vector<8x32xf32>
    %325 = arith.mulf %324, %322 : vector<8x32xf32>
    %326 = arith.mulf %315, %267 : vector<8x32xf32>
    %327 = arith.addf %325, %326 : vector<8x32xf32>
    %328 = vector.extract_strided_slice %8 {offsets = [5, 0, 0], sizes = [1, 8, 32], strides = [1, 1, 1]} : vector<8x8x32xf32> to vector<1x8x32xf32>
    %329 = vector.shape_cast %328 : vector<1x8x32xf32> to vector<8x32xf32>
    %cst_84 = arith.constant dense<0.000000e+00> : vector<8x32xf32>
    %330 = tpu.matmul %297, %14, %cst_84 {dimension_numbers = #tpu.dot_dimension_numbers<[1], [0], [0], [1], [0, 0, 1, 1], [], []>} : vector<8x32xf32>, vector<32x32xf32>, vector<8x32xf32> -> vector<8x32xf32>
    %331 = arith.addf %329, %330 : vector<8x32xf32>
    %332 = arith.negf %331 : vector<8x32xf32>
    %333 = math.exp %332 : vector<8x32xf32>
    %cst_85 = arith.constant 1.000000e+00 : f32
    %334 = vector.broadcast %cst_85 : f32 to vector<8x32xf32>
    %335 = arith.addf %334, %333 : vector<8x32xf32>
    %336 = arith.divf %334, %335 : vector<8x32xf32>
    %337 = vector.extract_strided_slice %9 {offsets = [5, 0, 0], sizes = [1, 8, 32], strides = [1, 1, 1]} : vector<8x8x32xf32> to vector<1x8x32xf32>
    %338 = vector.shape_cast %337 : vector<1x8x32xf32> to vector<8x32xf32>
    %cst_86 = arith.constant dense<0.000000e+00> : vector<8x32xf32>
    %339 = tpu.matmul %297, %15, %cst_86 {dimension_numbers = #tpu.dot_dimension_numbers<[1], [0], [0], [1], [0, 0, 1, 1], [], []>} : vector<8x32xf32>, vector<32x32xf32>, vector<8x32xf32> -> vector<8x32xf32>
    %340 = arith.addf %338, %339 : vector<8x32xf32>
    %341 = arith.negf %340 : vector<8x32xf32>
    %342 = math.exp %341 : vector<8x32xf32>
    %cst_87 = arith.constant 1.000000e+00 : f32
    %343 = vector.broadcast %cst_87 : f32 to vector<8x32xf32>
    %344 = arith.addf %343, %342 : vector<8x32xf32>
    %345 = arith.divf %343, %344 : vector<8x32xf32>
    %346 = vector.extract_strided_slice %10 {offsets = [5, 0, 0], sizes = [1, 8, 32], strides = [1, 1, 1]} : vector<8x8x32xf32> to vector<1x8x32xf32>
    %347 = vector.shape_cast %346 : vector<1x8x32xf32> to vector<8x32xf32>
    %cst_88 = arith.constant dense<0.000000e+00> : vector<8x32xf32>
    %348 = tpu.matmul %297, %16, %cst_88 {dimension_numbers = #tpu.dot_dimension_numbers<[1], [0], [0], [1], [0, 0, 1, 1], [], []>} : vector<8x32xf32>, vector<32x32xf32>, vector<8x32xf32> -> vector<8x32xf32>
    %349 = arith.addf %348, %22 : vector<8x32xf32>
    %350 = arith.mulf %336, %349 : vector<8x32xf32>
    %351 = arith.addf %347, %350 : vector<8x32xf32>
    %352 = math.tanh %351 : vector<8x32xf32>
    %cst_89 = arith.constant 1.000000e+00 : f32
    %353 = vector.broadcast %cst_89 : f32 to vector<8x32xf32>
    %354 = arith.subf %353, %345 : vector<8x32xf32>
    %355 = arith.mulf %354, %352 : vector<8x32xf32>
    %356 = arith.mulf %345, %297 : vector<8x32xf32>
    %357 = arith.addf %355, %356 : vector<8x32xf32>
    %358 = vector.extract_strided_slice %11 {offsets = [2, 0, 0], sizes = [1, 8, 32], strides = [1, 1, 1]} : vector<8x8x32xf32> to vector<1x8x32xf32>
    %359 = vector.shape_cast %358 : vector<1x8x32xf32> to vector<8x32xf32>
    %cst_90 = arith.constant dense<0.000000e+00> : vector<8x32xf32>
    %360 = tpu.matmul %327, %17, %cst_90 {dimension_numbers = #tpu.dot_dimension_numbers<[1], [0], [0], [1], [0, 0, 1, 1], [], []>} : vector<8x32xf32>, vector<32x32xf32>, vector<8x32xf32> -> vector<8x32xf32>
    %361 = arith.addf %359, %360 : vector<8x32xf32>
    %362 = arith.negf %361 : vector<8x32xf32>
    %363 = math.exp %362 : vector<8x32xf32>
    %cst_91 = arith.constant 1.000000e+00 : f32
    %364 = vector.broadcast %cst_91 : f32 to vector<8x32xf32>
    %365 = arith.addf %364, %363 : vector<8x32xf32>
    %366 = arith.divf %364, %365 : vector<8x32xf32>
    %367 = vector.extract_strided_slice %12 {offsets = [2, 0, 0], sizes = [1, 8, 32], strides = [1, 1, 1]} : vector<8x8x32xf32> to vector<1x8x32xf32>
    %368 = vector.shape_cast %367 : vector<1x8x32xf32> to vector<8x32xf32>
    %cst_92 = arith.constant dense<0.000000e+00> : vector<8x32xf32>
    %369 = tpu.matmul %327, %18, %cst_92 {dimension_numbers = #tpu.dot_dimension_numbers<[1], [0], [0], [1], [0, 0, 1, 1], [], []>} : vector<8x32xf32>, vector<32x32xf32>, vector<8x32xf32> -> vector<8x32xf32>
    %370 = arith.addf %368, %369 : vector<8x32xf32>
    %371 = arith.negf %370 : vector<8x32xf32>
    %372 = math.exp %371 : vector<8x32xf32>
    %cst_93 = arith.constant 1.000000e+00 : f32
    %373 = vector.broadcast %cst_93 : f32 to vector<8x32xf32>
    %374 = arith.addf %373, %372 : vector<8x32xf32>
    %375 = arith.divf %373, %374 : vector<8x32xf32>
    %376 = vector.extract_strided_slice %13 {offsets = [2, 0, 0], sizes = [1, 8, 32], strides = [1, 1, 1]} : vector<8x8x32xf32> to vector<1x8x32xf32>
    %377 = vector.shape_cast %376 : vector<1x8x32xf32> to vector<8x32xf32>
    %cst_94 = arith.constant dense<0.000000e+00> : vector<8x32xf32>
    %378 = tpu.matmul %327, %19, %cst_94 {dimension_numbers = #tpu.dot_dimension_numbers<[1], [0], [0], [1], [0, 0, 1, 1], [], []>} : vector<8x32xf32>, vector<32x32xf32>, vector<8x32xf32> -> vector<8x32xf32>
    %379 = arith.addf %378, %25 : vector<8x32xf32>
    %380 = arith.mulf %366, %379 : vector<8x32xf32>
    %381 = arith.addf %377, %380 : vector<8x32xf32>
    %382 = math.tanh %381 : vector<8x32xf32>
    %cst_95 = arith.constant 1.000000e+00 : f32
    %383 = vector.broadcast %cst_95 : f32 to vector<8x32xf32>
    %384 = arith.subf %383, %375 : vector<8x32xf32>
    %385 = arith.mulf %384, %382 : vector<8x32xf32>
    %386 = arith.mulf %375, %327 : vector<8x32xf32>
    %387 = arith.addf %385, %386 : vector<8x32xf32>
    %388 = vector.extract_strided_slice %8 {offsets = [6, 0, 0], sizes = [1, 8, 32], strides = [1, 1, 1]} : vector<8x8x32xf32> to vector<1x8x32xf32>
    %389 = vector.shape_cast %388 : vector<1x8x32xf32> to vector<8x32xf32>
    %cst_96 = arith.constant dense<0.000000e+00> : vector<8x32xf32>
    %390 = tpu.matmul %357, %14, %cst_96 {dimension_numbers = #tpu.dot_dimension_numbers<[1], [0], [0], [1], [0, 0, 1, 1], [], []>} : vector<8x32xf32>, vector<32x32xf32>, vector<8x32xf32> -> vector<8x32xf32>
    %391 = arith.addf %389, %390 : vector<8x32xf32>
    %392 = arith.negf %391 : vector<8x32xf32>
    %393 = math.exp %392 : vector<8x32xf32>
    %cst_97 = arith.constant 1.000000e+00 : f32
    %394 = vector.broadcast %cst_97 : f32 to vector<8x32xf32>
    %395 = arith.addf %394, %393 : vector<8x32xf32>
    %396 = arith.divf %394, %395 : vector<8x32xf32>
    %397 = vector.extract_strided_slice %9 {offsets = [6, 0, 0], sizes = [1, 8, 32], strides = [1, 1, 1]} : vector<8x8x32xf32> to vector<1x8x32xf32>
    %398 = vector.shape_cast %397 : vector<1x8x32xf32> to vector<8x32xf32>
    %cst_98 = arith.constant dense<0.000000e+00> : vector<8x32xf32>
    %399 = tpu.matmul %357, %15, %cst_98 {dimension_numbers = #tpu.dot_dimension_numbers<[1], [0], [0], [1], [0, 0, 1, 1], [], []>} : vector<8x32xf32>, vector<32x32xf32>, vector<8x32xf32> -> vector<8x32xf32>
    %400 = arith.addf %398, %399 : vector<8x32xf32>
    %401 = arith.negf %400 : vector<8x32xf32>
    %402 = math.exp %401 : vector<8x32xf32>
    %cst_99 = arith.constant 1.000000e+00 : f32
    %403 = vector.broadcast %cst_99 : f32 to vector<8x32xf32>
    %404 = arith.addf %403, %402 : vector<8x32xf32>
    %405 = arith.divf %403, %404 : vector<8x32xf32>
    %406 = vector.extract_strided_slice %10 {offsets = [6, 0, 0], sizes = [1, 8, 32], strides = [1, 1, 1]} : vector<8x8x32xf32> to vector<1x8x32xf32>
    %407 = vector.shape_cast %406 : vector<1x8x32xf32> to vector<8x32xf32>
    %cst_100 = arith.constant dense<0.000000e+00> : vector<8x32xf32>
    %408 = tpu.matmul %357, %16, %cst_100 {dimension_numbers = #tpu.dot_dimension_numbers<[1], [0], [0], [1], [0, 0, 1, 1], [], []>} : vector<8x32xf32>, vector<32x32xf32>, vector<8x32xf32> -> vector<8x32xf32>
    %409 = arith.addf %408, %22 : vector<8x32xf32>
    %410 = arith.mulf %396, %409 : vector<8x32xf32>
    %411 = arith.addf %407, %410 : vector<8x32xf32>
    %412 = math.tanh %411 : vector<8x32xf32>
    %cst_101 = arith.constant 1.000000e+00 : f32
    %413 = vector.broadcast %cst_101 : f32 to vector<8x32xf32>
    %414 = arith.subf %413, %405 : vector<8x32xf32>
    %415 = arith.mulf %414, %412 : vector<8x32xf32>
    %416 = arith.mulf %405, %357 : vector<8x32xf32>
    %417 = arith.addf %415, %416 : vector<8x32xf32>
    %418 = vector.extract_strided_slice %11 {offsets = [1, 0, 0], sizes = [1, 8, 32], strides = [1, 1, 1]} : vector<8x8x32xf32> to vector<1x8x32xf32>
    %419 = vector.shape_cast %418 : vector<1x8x32xf32> to vector<8x32xf32>
    %cst_102 = arith.constant dense<0.000000e+00> : vector<8x32xf32>
    %420 = tpu.matmul %387, %17, %cst_102 {dimension_numbers = #tpu.dot_dimension_numbers<[1], [0], [0], [1], [0, 0, 1, 1], [], []>} : vector<8x32xf32>, vector<32x32xf32>, vector<8x32xf32> -> vector<8x32xf32>
    %421 = arith.addf %419, %420 : vector<8x32xf32>
    %422 = arith.negf %421 : vector<8x32xf32>
    %423 = math.exp %422 : vector<8x32xf32>
    %cst_103 = arith.constant 1.000000e+00 : f32
    %424 = vector.broadcast %cst_103 : f32 to vector<8x32xf32>
    %425 = arith.addf %424, %423 : vector<8x32xf32>
    %426 = arith.divf %424, %425 : vector<8x32xf32>
    %427 = vector.extract_strided_slice %12 {offsets = [1, 0, 0], sizes = [1, 8, 32], strides = [1, 1, 1]} : vector<8x8x32xf32> to vector<1x8x32xf32>
    %428 = vector.shape_cast %427 : vector<1x8x32xf32> to vector<8x32xf32>
    %cst_104 = arith.constant dense<0.000000e+00> : vector<8x32xf32>
    %429 = tpu.matmul %387, %18, %cst_104 {dimension_numbers = #tpu.dot_dimension_numbers<[1], [0], [0], [1], [0, 0, 1, 1], [], []>} : vector<8x32xf32>, vector<32x32xf32>, vector<8x32xf32> -> vector<8x32xf32>
    %430 = arith.addf %428, %429 : vector<8x32xf32>
    %431 = arith.negf %430 : vector<8x32xf32>
    %432 = math.exp %431 : vector<8x32xf32>
    %cst_105 = arith.constant 1.000000e+00 : f32
    %433 = vector.broadcast %cst_105 : f32 to vector<8x32xf32>
    %434 = arith.addf %433, %432 : vector<8x32xf32>
    %435 = arith.divf %433, %434 : vector<8x32xf32>
    %436 = vector.extract_strided_slice %13 {offsets = [1, 0, 0], sizes = [1, 8, 32], strides = [1, 1, 1]} : vector<8x8x32xf32> to vector<1x8x32xf32>
    %437 = vector.shape_cast %436 : vector<1x8x32xf32> to vector<8x32xf32>
    %cst_106 = arith.constant dense<0.000000e+00> : vector<8x32xf32>
    %438 = tpu.matmul %387, %19, %cst_106 {dimension_numbers = #tpu.dot_dimension_numbers<[1], [0], [0], [1], [0, 0, 1, 1], [], []>} : vector<8x32xf32>, vector<32x32xf32>, vector<8x32xf32> -> vector<8x32xf32>
    %439 = arith.addf %438, %25 : vector<8x32xf32>
    %440 = arith.mulf %426, %439 : vector<8x32xf32>
    %441 = arith.addf %437, %440 : vector<8x32xf32>
    %442 = math.tanh %441 : vector<8x32xf32>
    %cst_107 = arith.constant 1.000000e+00 : f32
    %443 = vector.broadcast %cst_107 : f32 to vector<8x32xf32>
    %444 = arith.subf %443, %435 : vector<8x32xf32>
    %445 = arith.mulf %444, %442 : vector<8x32xf32>
    %446 = arith.mulf %435, %387 : vector<8x32xf32>
    %447 = arith.addf %445, %446 : vector<8x32xf32>
    %448 = vector.extract_strided_slice %8 {offsets = [7, 0, 0], sizes = [1, 8, 32], strides = [1, 1, 1]} : vector<8x8x32xf32> to vector<1x8x32xf32>
    %449 = vector.shape_cast %448 : vector<1x8x32xf32> to vector<8x32xf32>
    %cst_108 = arith.constant dense<0.000000e+00> : vector<8x32xf32>
    %450 = tpu.matmul %417, %14, %cst_108 {dimension_numbers = #tpu.dot_dimension_numbers<[1], [0], [0], [1], [0, 0, 1, 1], [], []>} : vector<8x32xf32>, vector<32x32xf32>, vector<8x32xf32> -> vector<8x32xf32>
    %451 = arith.addf %449, %450 : vector<8x32xf32>
    %452 = arith.negf %451 : vector<8x32xf32>
    %453 = math.exp %452 : vector<8x32xf32>
    %cst_109 = arith.constant 1.000000e+00 : f32
    %454 = vector.broadcast %cst_109 : f32 to vector<8x32xf32>
    %455 = arith.addf %454, %453 : vector<8x32xf32>
    %456 = arith.divf %454, %455 : vector<8x32xf32>
    %457 = vector.extract_strided_slice %9 {offsets = [7, 0, 0], sizes = [1, 8, 32], strides = [1, 1, 1]} : vector<8x8x32xf32> to vector<1x8x32xf32>
    %458 = vector.shape_cast %457 : vector<1x8x32xf32> to vector<8x32xf32>
    %cst_110 = arith.constant dense<0.000000e+00> : vector<8x32xf32>
    %459 = tpu.matmul %417, %15, %cst_110 {dimension_numbers = #tpu.dot_dimension_numbers<[1], [0], [0], [1], [0, 0, 1, 1], [], []>} : vector<8x32xf32>, vector<32x32xf32>, vector<8x32xf32> -> vector<8x32xf32>
    %460 = arith.addf %458, %459 : vector<8x32xf32>
    %461 = arith.negf %460 : vector<8x32xf32>
    %462 = math.exp %461 : vector<8x32xf32>
    %cst_111 = arith.constant 1.000000e+00 : f32
    %463 = vector.broadcast %cst_111 : f32 to vector<8x32xf32>
    %464 = arith.addf %463, %462 : vector<8x32xf32>
    %465 = arith.divf %463, %464 : vector<8x32xf32>
    %466 = vector.extract_strided_slice %10 {offsets = [7, 0, 0], sizes = [1, 8, 32], strides = [1, 1, 1]} : vector<8x8x32xf32> to vector<1x8x32xf32>
    %467 = vector.shape_cast %466 : vector<1x8x32xf32> to vector<8x32xf32>
    %cst_112 = arith.constant dense<0.000000e+00> : vector<8x32xf32>
    %468 = tpu.matmul %417, %16, %cst_112 {dimension_numbers = #tpu.dot_dimension_numbers<[1], [0], [0], [1], [0, 0, 1, 1], [], []>} : vector<8x32xf32>, vector<32x32xf32>, vector<8x32xf32> -> vector<8x32xf32>
    %469 = arith.addf %468, %22 : vector<8x32xf32>
    %470 = arith.mulf %456, %469 : vector<8x32xf32>
    %471 = arith.addf %467, %470 : vector<8x32xf32>
    %472 = math.tanh %471 : vector<8x32xf32>
    %cst_113 = arith.constant 1.000000e+00 : f32
    %473 = vector.broadcast %cst_113 : f32 to vector<8x32xf32>
    %474 = arith.subf %473, %465 : vector<8x32xf32>
    %475 = arith.mulf %474, %472 : vector<8x32xf32>
    %476 = arith.mulf %465, %417 : vector<8x32xf32>
    %477 = arith.addf %475, %476 : vector<8x32xf32>
    %478 = vector.extract_strided_slice %11 {offsets = [0, 0, 0], sizes = [1, 8, 32], strides = [1, 1, 1]} : vector<8x8x32xf32> to vector<1x8x32xf32>
    %479 = vector.shape_cast %478 : vector<1x8x32xf32> to vector<8x32xf32>
    %cst_114 = arith.constant dense<0.000000e+00> : vector<8x32xf32>
    %480 = tpu.matmul %447, %17, %cst_114 {dimension_numbers = #tpu.dot_dimension_numbers<[1], [0], [0], [1], [0, 0, 1, 1], [], []>} : vector<8x32xf32>, vector<32x32xf32>, vector<8x32xf32> -> vector<8x32xf32>
    %481 = arith.addf %479, %480 : vector<8x32xf32>
    %482 = arith.negf %481 : vector<8x32xf32>
    %483 = math.exp %482 : vector<8x32xf32>
    %cst_115 = arith.constant 1.000000e+00 : f32
    %484 = vector.broadcast %cst_115 : f32 to vector<8x32xf32>
    %485 = arith.addf %484, %483 : vector<8x32xf32>
    %486 = arith.divf %484, %485 : vector<8x32xf32>
    %487 = vector.extract_strided_slice %12 {offsets = [0, 0, 0], sizes = [1, 8, 32], strides = [1, 1, 1]} : vector<8x8x32xf32> to vector<1x8x32xf32>
    %488 = vector.shape_cast %487 : vector<1x8x32xf32> to vector<8x32xf32>
    %cst_116 = arith.constant dense<0.000000e+00> : vector<8x32xf32>
    %489 = tpu.matmul %447, %18, %cst_116 {dimension_numbers = #tpu.dot_dimension_numbers<[1], [0], [0], [1], [0, 0, 1, 1], [], []>} : vector<8x32xf32>, vector<32x32xf32>, vector<8x32xf32> -> vector<8x32xf32>
    %490 = arith.addf %488, %489 : vector<8x32xf32>
    %491 = arith.negf %490 : vector<8x32xf32>
    %492 = math.exp %491 : vector<8x32xf32>
    %cst_117 = arith.constant 1.000000e+00 : f32
    %493 = vector.broadcast %cst_117 : f32 to vector<8x32xf32>
    %494 = arith.addf %493, %492 : vector<8x32xf32>
    %495 = arith.divf %493, %494 : vector<8x32xf32>
    %496 = vector.extract_strided_slice %13 {offsets = [0, 0, 0], sizes = [1, 8, 32], strides = [1, 1, 1]} : vector<8x8x32xf32> to vector<1x8x32xf32>
    %497 = vector.shape_cast %496 : vector<1x8x32xf32> to vector<8x32xf32>
    %cst_118 = arith.constant dense<0.000000e+00> : vector<8x32xf32>
    %498 = tpu.matmul %447, %19, %cst_118 {dimension_numbers = #tpu.dot_dimension_numbers<[1], [0], [0], [1], [0, 0, 1, 1], [], []>} : vector<8x32xf32>, vector<32x32xf32>, vector<8x32xf32> -> vector<8x32xf32>
    %499 = arith.addf %498, %25 : vector<8x32xf32>
    %500 = arith.mulf %486, %499 : vector<8x32xf32>
    %501 = arith.addf %497, %500 : vector<8x32xf32>
    %502 = math.tanh %501 : vector<8x32xf32>
    %cst_119 = arith.constant 1.000000e+00 : f32
    %503 = vector.broadcast %cst_119 : f32 to vector<8x32xf32>
    %504 = arith.subf %503, %495 : vector<8x32xf32>
    %505 = arith.mulf %504, %502 : vector<8x32xf32>
    %506 = arith.mulf %495, %447 : vector<8x32xf32>
    %507 = arith.addf %505, %506 : vector<8x32xf32>
    %508 = tpu.concatenate %57, %117, %177, %237, %297, %357, %417, %477 in 1 : vector<8x32xf32>, vector<8x32xf32>, vector<8x32xf32>, vector<8x32xf32>, vector<8x32xf32>, vector<8x32xf32>, vector<8x32xf32>, vector<8x32xf32> -> vector<8x256xf32>
    %509 = tpu.concatenate %507, %447, %387, %327, %267, %207, %147, %87 in 1 : vector<8x32xf32>, vector<8x32xf32>, vector<8x32xf32>, vector<8x32xf32>, vector<8x32xf32>, vector<8x32xf32>, vector<8x32xf32>, vector<8x32xf32> -> vector<8x256xf32>
    %c0_120 = arith.constant 0 : index
    %c0_121 = arith.constant 0 : index
    %510 = vector.load %arg11[%c0_120, %c0_121] : memref<256x4xf32, #tpu.memory_space<vmem>>, vector<256x4xf32>
    %cst_122 = arith.constant dense<0.000000e+00> : vector<8x4xf32>
    %511 = tpu.matmul %508, %510, %cst_122 {dimension_numbers = #tpu.dot_dimension_numbers<[1], [0], [0], [1], [0, 0, 1, 1], [], []>} : vector<8x256xf32>, vector<256x4xf32>, vector<8x4xf32> -> vector<8x4xf32>
    %c0_123 = arith.constant 0 : index
    %c0_124 = arith.constant 0 : index
    %512 = vector.load %arg12[%c0_123, %c0_124] : memref<256x4xf32, #tpu.memory_space<vmem>>, vector<256x4xf32>
    %cst_125 = arith.constant dense<0.000000e+00> : vector<8x4xf32>
    %513 = tpu.matmul %509, %512, %cst_125 {dimension_numbers = #tpu.dot_dimension_numbers<[1], [0], [0], [1], [0, 0, 1, 1], [], []>} : vector<8x256xf32>, vector<256x4xf32>, vector<8x4xf32> -> vector<8x4xf32>
    %514 = arith.addf %511, %513 : vector<8x4xf32>
    %c0_126 = arith.constant 0 : index
    %c0_127 = arith.constant 0 : index
    %515 = vector.load %arg13[%c0_126, %c0_127] : memref<1x4xf32, #tpu.memory_space<vmem>>, vector<1x4xf32>
    %516 = vector.broadcast %515 : vector<1x4xf32> to vector<8x4xf32>
    %517 = arith.addf %514, %516 : vector<8x4xf32>
    %cst_128 = arith.constant dense<0xFF800000> : vector<8xf32>
    %518 = vector.multi_reduction <maximumf>, %517, %cst_128 [1] : vector<8x4xf32> to vector<8xf32>
    %519 = vector.shape_cast %518 : vector<8xf32> to vector<8x1xf32>
    %520 = vector.broadcast %519 : vector<8x1xf32> to vector<8x4xf32>
    %521 = arith.subf %517, %520 : vector<8x4xf32>
    %522 = math.exp %521 : vector<8x4xf32>
    %cst_129 = arith.constant dense<0.000000e+00> : vector<8xf32>
    %523 = vector.multi_reduction <add>, %522, %cst_129 [1] : vector<8x4xf32> to vector<8xf32>
    %524 = vector.shape_cast %523 : vector<8xf32> to vector<8x1xf32>
    %525 = tpu.reciprocal %524 : vector<8x1xf32> -> vector<8x1xf32>
    %526 = vector.broadcast %525 : vector<8x1xf32> to vector<8x4xf32>
    %527 = arith.mulf %522, %526 : vector<8x4xf32>
    %c0_130 = arith.constant 0 : index
    %c0_131 = arith.constant 0 : index
    %528 = vector.load %arg14[%c0_130, %c0_131] : memref<8x4xf32, #tpu.memory_space<vmem>>, vector<8x4xf32>
    tpu.vector_store %arg14[%c0_130, %c0_131], %527 {strides = array<i32>} : memref<8x4xf32, #tpu.memory_space<vmem>>, vector<8x4xf32>,
    return
  }
}

</mosaic_0001>

<bundles_post_ra>
// kernel: tpu_custom_call.1
= control target key start
LH: loop header
LB: loop body
LE: loop exit
PB: predicated region body
PF: predicated region fallthrough
CT: control target
= control target key end

     0   :  { %vm65_vm0 = vcmask 130048   ;;  %v2739_v13 = vmov 0.0   ;;  %s2741_s25 = smov 32   ;;  %s2742_s26 = smov 64   ;;  %s3888_s3 = inlined_call_operand.vmem [shape: f32[32,32], index: 3, kind: input, shape index: {}]   ;;  %s3889_s4 = inlined_call_operand.vmem [shape: f32[32,32], index: 4, kind: input, shape index: {}]   ;;  %s3890_s1 = inlined_call_operand.vmem [shape: f32[16,192], index: 1, kind: input, shape index: {}]   ;;  %s3891_s6 = inlined_call_operand.vmem [shape: f32[32,32], index: 6, kind: input, shape index: {}]   ;;  %s3892_s0 = inlined_call_operand.vmem [shape: f32[8,8,16], index: 0, kind: input, shape index: {}]   ;;  %s3893_s5 = inlined_call_operand.vmem [shape: f32[32,32], index: 5, kind: input, shape index: {}]   ;;  %s3894_s8 = inlined_call_operand.vmem [shape: f32[32,32], index: 8, kind: input, shape index: {}]   ;;  %s3895_s10 = inlined_call_operand.vmem [shape: f32[1,32], index: 10, kind: input, shape index: {}]   ;;  %s3896_s9 = inlined_call_operand.vmem [shape: f32[1,32], index: 9, kind: input, shape index: {}]   ;;  %s3897_s2 = inlined_call_operand.vmem [shape: f32[1,192], index: 2, kind: input, shape index: {}]   ;;  %s3898_s7 = inlined_call_operand.vmem [shape: f32[32,32], index: 7, kind: input, shape index: {}]   ;;  %s3899_s11 = inlined_call_operand.vmem [shape: f32[256,4], index: 11, kind: input, shape index: {}]   ;;  %s3900_s12 = inlined_call_operand.vmem [shape: f32[256,4], index: 12, kind: input, shape index: {}]   ;;  %s3901_s13 = inlined_call_operand.vmem [shape: f32[1,4], index: 13, kind: input, shape index: {}]   ;;  %s3902_s14 = inlined_call_operand.vmem [shape: f32[8,4], index: 14, kind: output, shape index: {}]  }
   0x1   :  { %v2821_v0 = vld [vmem:[%s3888_s3 + $0x18] sm:$0xff]  ;;  %v2831_v2 = vld [vmem:[%s3888_s3 + $0x10] sm:$0xff]  ;;  %v2843_v4 = vld [vmem:[%s3888_s3 + $0x8] sm:$0xff] }
   0x2   :  { %v2826_v1 = vld [vmem:[%s3889_s4 + $0x18] sm:$0xff]  ;;  %220 = vmatpush.msra.mxu2 %v2821_v0  ;;  %v2838_v3 = vld [vmem:[%s3889_s4 + $0x10] sm:$0xff]  ;;  %v2848_v5 = vld [vmem:[%s3889_s4 + $0x8] sm:$0xff] }
   0x3   :  { %260 = vmatpush.msra.mxu3 %v2826_v1  ;;  %v57_v6 = vld [vmem:[%s3890_s1 + $0x10] sm:$0xff]  ;;  %v55_v7 = vld [vmem:[%s3890_s1] sm:$0xff]  ;;  %v2873_v10 = vld [vmem:[%s3891_s6 + $0x18] sm:$0xff] }
   0x4   :  { %221 = vmatpush.msra.mxu2 %v2831_v2  ;;  %v2861_v8 = vld [vmem:[%s3888_s3] sm:$0xff]  ;;  %104 = vmatpush.msra.mxu0 %v57_v6  ;;  %v2885_v12 = vld [vmem:[%s3893_s5 + $0x18] sm:$0xff]  ;;  %v2892_v14 = vld [vmem:[%s3891_s6 + $0x10] sm:$0xff] }
   0x5   :  { %261 = vmatpush.msra.mxu3 %v2838_v3  ;;  %v2866_v9 = vld [vmem:[%s3889_s4] sm:$0xff]  ;;  %v2900_v15 = vld [vmem:[%s3893_s5 + $0x10] sm:$0xff]  ;;  %v2905_v16 = vld [vmem:[%s3891_s6 + $0x8] sm:$0xff] }
   0x6   :  { %222 = vmatpush.msra.mxu2 %v2843_v4  ;;  %105 = vmatpush.msra.mxu0 %v55_v7  ;;  %v2878_v11 = vld [vmem:[%s3892_s0] sm:$0xff]  ;;  %v2912_v17 = vld [vmem:[%s3893_s5 + $0x8] sm:$0xff]  ;;  %v2929_v20 = vld [vmem:[%s3894_s8 + $0x18] sm:$0xff] }
   0x7   :  { %262 = vmatpush.msra.mxu3 %v2848_v5  ;;  %2426 = vmatmul.msk.f32.vlgmr.msra.gmra.mxu0 %vm65_vm0, %v2878_v11  ;;  %v2917_v18 = vld [vmem:[%s3891_s6] sm:$0xff]  ;;  %v2936_v21 = vld [vmem:[%s3892_s0 + $0x8] sm:$0xff]  ;;  %v2942_v22 = vld [vmem:[%s3894_s8 + $0x10] sm:$0xff] }
   0x8   :  { %223 = vmatpush.msra.mxu2 %v2861_v8  ;;  %v2924_v19 = vld [vmem:[%s3893_s5] sm:$0xff]  ;;  %v2950_v23 = vld [vmem:[%s3894_s8 + $0x8] sm:$0xff]  ;;  %v2965_v25 = vld [vmem:[%s3892_s0 + $0x10] sm:$0xff] }
   0x9   :  { %263 = vmatpush.msra.mxu3 %v2866_v9  ;;  %224 = vmatmul.f32.vlgmr.msra.gmra.mxu2 %v2739_v13  ;;  %v2958_v24 = vld [vmem:[%s3894_s8] sm:$0xff]  ;;  %v2976_v26 = vld [vmem:[%s3892_s0 + $0x18] sm:$0xff]  ;;  %v2995_v28 = vld [vmem:[%s3892_s0 + $0x28] sm:$0xff] }
   0xa   :  { %264 = vmatmul.f32.vlgmr.msra.gmra.mxu3 %v2739_v13  ;;  %304 = vmatpush.msrb.mxu2 %v2885_v12  ;;  %v2988_v27 = vld [vmem:[%s3892_s0 + $0x20] sm:$0xff]  ;;  %v3002_v29 = vld [vmem:[%s3892_s0 + $0x30] sm:$0xff]  ;;  %v3009_v30 = vld [vmem:[%s3892_s0 + $0x38] sm:$0xff] }
   0xb   :  { %339 = vmatpush.msrb.mxu3 %v2873_v10  ;;  %v3016_v31 = vld [vmem:[%s3897_s2] sm:$0x3]  ;;  %v58_v38 = vld [vmem:[%s3890_s1 + $0x18] sm:$0xff]  ;;  %v56_v39 = vld [vmem:[%s3890_s1 + $0x8] sm:$0xff]  ;;  %s2740_s2 = smov 96  }
   0xc   :  { %305 = vmatpush.msrb.mxu2 %v2900_v15  ;;  %v3019_v32 = vperm.slane %v3016_v31, 0  ;;  %145 = vmatpush.msra.mxu1 %v58_v38  ;;  %v3044_v47 = vld [vmem:[%s3895_s10] ss:$0 sm:$0xff]  ;;  %v3054_v49 = vld [vmem:[%s3898_s7 + $0x18] sm:$0xff]  ;;  %v3059_v50 = vld [vmem:[%s3898_s7 + $0x10] sm:$0xff] }
   0xd   :  { %340 = vmatpush.msrb.mxu3 %v2892_v14  ;;  %883 = vmatpush.msrb.mxu0 %v3054_v49  ;;  %v3078_v57 = vld [vmem:[%s3898_s7 + $0x8] sm:$0xff]  ;;  %v3083_v58 = vld [vmem:[%s3898_s7] sm:$0xff] }
   0xe   :  { %306 = vmatpush.msrb.mxu2 %v2912_v17  ;;  %146 = vmatpush.msra.mxu1 %v56_v39  ;;  %v3090_v59 = vld [vmem:[%s3896_s9] ss:$0 sm:$0xff] }
   0xf   :  { %341 = vmatpush.msrb.mxu3 %v2905_v16  ;;  %2427 = vmatmul.msk.f32.gmra.mxu0 %vm65_vm0, %v2936_v21 }
  0x10   :  { %307 = vmatpush.msrb.mxu2 %v2924_v19  ;;  %2434 = vmatmul.msk.f32.vlgmr.msra.gmra.mxu1 %vm65_vm0, %v2878_v11 }
  0x11   :  { %342 = vmatpush.msrb.mxu3 %v2917_v18  ;;  %308 = vmatmul.f32.vlgmr.msrb.gmra.mxu2 %v2739_v13 }
  0x12   :  { %343 = vmatmul.f32.vlgmr.msrb.gmra.mxu3 %v2739_v13  ;;  %923 = vmatpush.msrb.mxu1 %v2929_v20 }
  0x13   :  { %423 = vmatpush.msra.mxu3 %v2929_v20  ;;  %383 = vmatpush.msra.mxu2 %v3054_v49 }
  0x14   :  { %924 = vmatpush.msrb.mxu1 %v2942_v22  ;;  %884 = vmatpush.msrb.mxu0 %v3059_v50 }
  0x15   :  { %424 = vmatpush.msra.mxu3 %v2942_v22  ;;  %384 = vmatpush.msra.mxu2 %v3059_v50 }
  0x16   :  { %925 = vmatpush.msrb.mxu1 %v2950_v23  ;;  %885 = vmatpush.msrb.mxu0 %v3078_v57 }
  0x17   :  { %425 = vmatpush.msra.mxu3 %v2950_v23  ;;  %2428 = vmatmul.msk.f32.gmra.mxu0 %vm65_vm0, %v2965_v25 }
  0x18   :  { %926 = vmatpush.msrb.mxu1 %v2958_v24  ;;  %385 = vmatpush.msra.mxu2 %v3078_v57 }
  0x19   :  { %426 = vmatpush.msra.mxu3 %v2958_v24  ;;  %2435 = vmatmul.msk.f32.gmra.mxu1 %vm65_vm0, %v2936_v21 }
  0x1a   :  { %427 = vmatmul.f32.vlgmr.msra.gmra.mxu3 %v2739_v13  ;;  %1089 = vmatpush.msra.mxu1 %v2873_v10 }
  0x1b   :  { %507 = vmatpush.msrb.mxu3 %v2826_v1  ;;  %386 = vmatpush.msra.mxu2 %v3083_v58 }
  0x1c   :  { %1090 = vmatpush.msra.mxu1 %v2892_v14  ;;  %886 = vmatpush.msrb.mxu0 %v3083_v58 }
  0x1d   :  { %508 = vmatpush.msrb.mxu3 %v2838_v3  ;;  %387 = vmatmul.f32.vlgmr.msra.gmra.mxu2 %v2739_v13 }
  0x1e   :  { %1091 = vmatpush.msra.mxu1 %v2905_v16  ;;  %1051 = vmatpush.msra.mxu0 %v2885_v12 }
  0x1f   :  { %509 = vmatpush.msrb.mxu3 %v2848_v5  ;;  %2429 = vmatmul.msk.f32.gmra.mxu0 %vm65_vm0, %v2976_v26 }
  0x20   :  { %1092 = vmatpush.msra.mxu1 %v2917_v18  ;;  %467 = vmatpush.msrb.mxu2 %v2821_v0 }
  0x21   :  { %510 = vmatpush.msrb.mxu3 %v2866_v9  ;;  %2436 = vmatmul.msk.f32.gmra.mxu1 %vm65_vm0, %v2965_v25 }
  0x22   :  { %1052 = vmatpush.msra.mxu0 %v2900_v15  ;;  %468 = vmatpush.msrb.mxu2 %v2831_v2 }
  0x23   :  { %589 = vmatpush.msra.mxu3 %v2873_v10 }
  0x24   :  { %1053 = vmatpush.msra.mxu0 %v2912_v17  ;;  %469 = vmatpush.msrb.mxu2 %v2843_v4 }
  0x25   :  { %590 = vmatpush.msra.mxu3 %v2892_v14 }
  0x26   :  { %1054 = vmatpush.msra.mxu0 %v2924_v19  ;;  %470 = vmatpush.msrb.mxu2 %v2861_v8 }
  0x27   :  { %591 = vmatpush.msra.mxu3 %v2905_v16  ;;  %2430 = vmatmul.msk.f32.gmra.mxu0 %vm65_vm0, %v2988_v27 }
  0x28   :  { %551 = vmatpush.msra.mxu2 %v2885_v12 }
  0x29   :  { %592 = vmatpush.msra.mxu3 %v2917_v18  ;;  %2437 = vmatmul.msk.f32.gmra.mxu1 %vm65_vm0, %v2976_v26 }
  0x2a   :  { %552 = vmatpush.msra.mxu2 %v2900_v15 }
  0x2c   :  { %553 = vmatpush.msra.mxu2 %v2912_v17 }
  0x2e   :  { %554 = vmatpush.msra.mxu2 %v2924_v19 }
  0x2f   :  { %2431 = vmatmul.msk.f32.gmra.mxu0 %vm65_vm0, %v2995_v28 }
  0x31   :  { %2438 = vmatmul.msk.f32.gmra.mxu1 %vm65_vm0, %v2988_v27 }
  0x37   :  { %2432 = vmatmul.msk.f32.gmra.mxu0 %vm65_vm0, %v3002_v29 }
  0x39   :  { %2439 = vmatmul.msk.f32.gmra.mxu1 %vm65_vm0, %v2995_v28  ;;  %v62_v28 = vperm.slane %v3016_v31, 1 }
  0x3f   :  { %2433 = vmatmul.msk.f32.gmra.mxu0 %vm65_vm0, %v3009_v30 }
  0x41   :  { %2440 = vmatmul.msk.f32.gmra.mxu1 %vm65_vm0, %v3002_v29 }
  0x49   :  { %2441 = vmatmul.msk.f32.gmra.mxu1 %vm65_vm0, %v3009_v30 }
  0x84   :  { %v107_v33 = vpop.f32.mrf.mxu0 }
  0x85   :  { %v3022_v34 = vadd.f32 %v107_v33, %v3019_v32 }
  0x8c   :  { %v225_v35 = vpop.f32.mrf.mxu2  ;;  %v110_v41 = vpop.f32.mrf.mxu0 }
  0x8d   :  { %v265_v36 = vpop.f32.mrf.mxu3  ;;  %v228_v37 = vadd.f32 %v225_v35, %v3022_v34  ;;  %v3034_v42 = vadd.f32 %v110_v41, %v3019_v32 }
  0x8f   :  { %v2442_v40 = vmul.f32 -1.442695, %v228_v37 }
  0x91   :  { %2548 = vpow2.f32 %v2442_v40 }
  0x94   :  { %v113_v46 = vpop.f32.mrf.mxu0  ;;  %v309_v62 = vpop.f32.mrf.mxu2 }
  0x95   :  { %v344_v43 = vpop.f32.mrf.mxu3  ;;  %v3049_v48 = vadd.f32 %v113_v46, %v3019_v32  ;;  %v310_v11 = vadd.f32 %v3090_v59, %v309_v62 }
  0x96   :  { %348 = vrot.lane.b32.xlu0 %v344_v43, %s2740_s2 }
  0x97   :  { %v2549_v44 = vpop.eup %2548 }
  0x98   :  { %v232_v45 = vadd.f32 1.0, %v2549_v44 }
  0x9a   :  { %2550 = vrcp.f32 %v232_v45  ;;  %v244_v61 = vand.u32 2147483648, %v232_v45  ;;  %vm238_vm1 = vweird.f32 %v232_v45  ;;  %v242_v6 = vand.u32 2147483647, %v232_v45 }
  0x9c   :  { %v116_v54 = vpop.f32.mrf.mxu0  ;;  %v245_v21 = vor.u32 1.1754944e-38, %v244_v61  ;;  %vm243_vm4 = vcmp.eq.f32.partialorder %v242_v6, 8.507059e+37 }
  0x9d   :  { %v428_v51 = vpop.f32.mrf.mxu3  ;;  %v3073_v56 = vadd.f32 %v116_v54, %v3019_v32 }
  0x9e   :  { %v429_v52 = vadd.f32 %v3044_v47, %v428_v51 }
  0xa0   :  { %432 = vrot.lane.b32.xlu1 %v429_v52, %s2740_s2  ;;  %v2551_v53 = vpop.eup %2550 }
  0xa1   :  { %v234_v55 = vmul.f32 %v2551_v53, %v232_v45  ;;  %vm239_vm2 = vweird.f32 %v2551_v53  ;;  %v148_v45 = vpop.f32.mrf.mxu1 }
  0xa2   :  { %vm240_vm3 = vmor %vm238_vm1, %vm239_vm2  ;;  %v3135_v51 = vadd.f32 %v148_v45, %v62_v28  ;;  %vm204_vm1 = vcmask 261120  }
  0xa3   :  { %v235_v60 = vsub.f32 1.0, %v234_v55 }
  0xa4   :  { %v119_v25 = vpop.f32.mrf.mxu0 }
  0xa5   :  { %v236_v63 = vmul.f32 %v2551_v53, %v235_v60  ;;  %v3105_v13 = vadd.f32 %v119_v25, %v3019_v32 }
  0xa7   :  { %v237_v7 = vadd.f32 %v2551_v53, %v236_v63 }
  0xa8   :  { %269 = vrot.lane.b32.xlu1 %v265_v36, %s2741_s25 }
  0xa9   :  { %v241_v33 = vsel %vm240_vm3, %v2551_v53, %v237_v7  ;;  %v151_v29 = vpop.f32.mrf.mxu1 }
  0xaa   :  { %v246_v35 = vsel %vm243_vm4, %v245_v21, %v241_v33  ;;  %v3137_v53 = vadd.f32 %v151_v29, %v62_v28 }
  0xab   :  { %v312_v36 = vmul.f32 %v310_v11, %v246_v35 }
  0xac   :  { %v122_v26 = vpop.f32.mrf.mxu0 }
  0xad   :  { %314 = vrot.lane.b32.xlu0 %v312_v36, %s2742_s26  ;;  %v3117_v37 = vadd.f32 %v122_v26, %v3019_v32 }
  0xb1   :  { %v154_v62 = vpop.f32.mrf.mxu1 }
  0xb2   :  { %v3139_v63 = vadd.f32 %v154_v62, %v62_v28 }
  0xb4   :  { %v125_v38 = vpop.f32.mrf.mxu0 }
  0xb5   :  { %v3124_v39 = vadd.f32 %v125_v38, %v3019_v32 }
  0xb9   :  { %v157_v36 = vpop.f32.mrf.mxu1 }
  0xba   :  { %v3143_v26 = vadd.f32 %v157_v36, %v62_v28 }
  0xbc   :  { %v128_v27 = vpop.f32.mrf.mxu0 }
  0xbd   :  { %v3131_v40 = vadd.f32 %v128_v27, %v3019_v32 }
  0xc1   :  { %v160_v27 = vpop.f32.mrf.mxu1 }
 0x108   :  { %v349_v41 = vpop.permute.xlu0 %348 }
 0x109   :  { %v351_v43 = vadd.f32 %v349_v41, %v3131_v40  ;;  %v3146_v41 = vadd.f32 %v160_v27, %v62_v28 }
 0x10b   :  { %v2444_v44 = vmul.f32 -1.442695, %v351_v43  ;;  %v163_v43 = vpop.f32.mrf.mxu1 }
 0x10d   :  { %2552 = vpow2.f32 %v2444_v44  ;;  %v3148_v44 = vadd.f32 %v163_v43, %v62_v28 }
 0x112   :  { %v433_v21 = vpop.permute.xlu1 %432 }
 0x113   :  { %v2553_v46 = vpop.eup %2552  ;;  %v166_v45 = vpop.f32.mrf.mxu1 }
 0x114   :  { %v355_v52 = vadd.f32 1.0, %v2553_v46  ;;  %v3150_v46 = vadd.f32 %v166_v45, %v62_v28 }
 0x116   :  { %2554 = vrcp.f32 %v355_v52  ;;  %v367_v55 = vand.u32 2147483648, %v355_v52  ;;  %v365_v61 = vand.u32 2147483647, %v355_v52  ;;  %vm361_vm6 = vweird.f32 %v355_v52 }
 0x118   :  { %v368_v7 = vor.u32 1.1754944e-38, %v367_v55  ;;  %vm366_vm8 = vcmp.eq.f32.partialorder %v365_v61, 8.507059e+37 }
 0x11c   :  { %v2555_v30 = vpop.eup %2554 }
 0x11d   :  { %v357_v54 = vmul.f32 %v2555_v30, %v355_v52  ;;  %vm362_vm5 = vweird.f32 %v2555_v30  ;;  %v270_v52 = vpop.permute.xlu1 %269 }
 0x11e   :  { %vm363_vm7 = vmor %vm361_vm6, %vm362_vm5  ;;  %v272_v29 = vadd.f32 %v270_v52, %v3022_v34 }
 0x11f   :  { %v358_v32 = vsub.f32 1.0, %v357_v54  ;;  %v315_v6 = vpop.permute.xlu0 %314 }
 0x120   :  { %v317_v33 = vadd.f32 %v315_v6, %v3022_v34 }
 0x121   :  { %v359_v60 = vmul.f32 %v2555_v30, %v358_v32 }
 0x122   :  { %2556 = vtanh.f32 %v317_v33 }
 0x123   :  { %v360_v31 = vadd.f32 %v2555_v30, %v359_v60 }
 0x125   :  { %v364_v11 = vsel %vm363_vm7, %v2555_v30, %v360_v31  ;;  %v2443_v30 = vmul.f32 -1.442695, %v272_v29  ;;  %v169_v31 = vpop.f32.mrf.mxu1 }
 0x126   :  { %v369_v25 = vsel %vm366_vm8, %v368_v7, %v364_v11  ;;  %v170_v11 = vadd.f32 %v169_v31, %v62_v28  ;;  %v388_v28 = vpop.f32.mrf.mxu2 }
 0x127   :  { %v435_v35 = vmul.f32 %v433_v21, %v369_v25  ;;  %2558 = vpow2.f32 %v2443_v30 }
 0x128   :  { %v2557_v38 = vpop.eup %2556 }
 0x129   :  { %437 = vrot.lane.b32.xlu2 %v435_v35, %s2742_s26 }
 0x12d   :  { %v2559_v54 = vpop.eup %2558 }
 0x12e   :  { %v276_v32 = vadd.f32 1.0, %v2559_v54  ;;  %v391_v54 = vadd.f32 %v388_v28, %v170_v11 }
 0x130   :  { %2560 = vrcp.f32 %v276_v32  ;;  %v288_v7 = vand.u32 2147483648, %v276_v32  ;;  %vm282_vm10 = vweird.f32 %v276_v32  ;;  %v286_v21 = vand.u32 2147483647, %v276_v32 }
 0x131   :  { %321 = vrot.lane.b32.xlu2 %v2557_v38, %s2740_s2 }
 0x132   :  { %v289_v36 = vor.u32 1.1754944e-38, %v288_v7  ;;  %vm287_vm12 = vcmp.eq.f32.partialorder %v286_v21, 8.507059e+37 }
 0x136   :  { %v2561_v55 = vpop.eup %2560 }
 0x137   :  { %v278_v60 = vmul.f32 %v2561_v55, %v276_v32  ;;  %vm283_vm9 = vweird.f32 %v2561_v55  ;;  %v2445_v32 = vmul.f32 -1.442695, %v391_v54 }
 0x138   :  { %vm284_vm11 = vmor %vm282_vm10, %vm283_vm9 }
 0x139   :  { %v279_v61 = vsub.f32 1.0, %v278_v60 }
 0x13b   :  { %v280_v62 = vmul.f32 %v2561_v55, %v279_v61 }
 0x13d   :  { %v281_v6 = vadd.f32 %v2561_v55, %v280_v62 }
 0x13f   :  { %v285_v35 = vsel %vm284_vm11, %v2561_v55, %v281_v6 }
 0x140   :  { %v290_v38 = vsel %vm287_vm12, %v289_v36, %v285_v35 }
 0x141   :  { %v319_v27 = vsub.f32 1.0, %v290_v38  ;;  %v325_v52 = vmul.f32 0.0, %v290_v38 }
 0x183   :  { %v438_v25 = vpop.permute.xlu2 %437 }
 0x184   :  { %v440_v33 = vadd.f32 %v438_v25, %v170_v11 }
 0x186   :  { %2562 = vtanh.f32 %v440_v33 }
 0x187   :  { %2564 = vpow2.f32 %v2445_v32 }
 0x18b   :  { %v322_v43 = vpop.permute.xlu2 %321 }
 0x18c   :  { %v2563_v45 = vpop.eup %2562  ;;  %v324_v29 = vmul.f32 %v322_v43, %v319_v27 }
 0x18d   :  { %444 = vrot.lane.b32.xlu1 %v2563_v45, %s2740_s2  ;;  %v2565_v55 = vpop.eup %2564 }
 0x18e   :  { %v3154_v30 = vadd.f32 %v325_v52, %v324_v29  ;;  %v395_v60 = vadd.f32 1.0, %v2565_v55 }
 0x190   :  { %451 = vrot.lane.b32.xlu0 %v3154_v30, %s2740_s2  ;;  %2566 = vrcp.f32 %v395_v60  ;;  %vm401_vm13 = vweird.f32 %v395_v60  ;;  %v407_v7 = vand.u32 2147483648, %v395_v60  ;;  %v405_v25 = vand.u32 2147483647, %v395_v60 }
 0x192   :  { %v408_v33 = vor.u32 1.1754944e-38, %v407_v7  ;;  %vm406_vm0 = vcmp.eq.f32.partialorder %v405_v25, 8.507059e+37 }
 0x196   :  { %v2567_v61 = vpop.eup %2566 }
 0x197   :  { %v397_v62 = vmul.f32 %v2567_v61, %v395_v60  ;;  %vm402_vm14 = vweird.f32 %v2567_v61 }
 0x198   :  { %vm403_vm15 = vmor %vm401_vm13, %vm402_vm14 }
 0x199   :  { %v398_v31 = vsub.f32 1.0, %v397_v62 }
 0x19b   :  { %v399_v6 = vmul.f32 %v2567_v61, %v398_v31 }
 0x19d   :  { %v400_v21 = vadd.f32 %v2567_v61, %v399_v6 }
 0x19f   :  { %v404_v35 = vsel %vm403_vm15, %v2567_v61, %v400_v21 }
 0x1a0   :  { %v409_v36 = vsel %vm406_vm0, %v408_v33, %v404_v35 }
 0x1a1   :  { %v442_v27 = vsub.f32 1.0, %v409_v36  ;;  %v448_v45 = vmul.f32 0.0, %v409_v36 }
 0x1ff   :  { %v445_v11 = vpop.permute.xlu1 %444 }
 0x200   :  { %v447_v43 = vmul.f32 %v445_v11, %v442_v27 }
 0x202   :  { %v3158_v38 = vpop.permute.xlu0 %451  ;;  %v3170_v52 = vadd.f32 %v448_v45, %v447_v43 }
 0x203   :  { %2446 = vmatmul.msk.f32.vlgmr.msrb.gmra.mxu2 %vm204_vm1, %v3158_v38  ;;  %2448 = vmatmul.msk.f32.vlgmr.msrb.gmra.mxu3 %vm204_vm1, %v3158_v38 }
 0x204   :  { %673 = vmatpush.msrb.mxu3 %v2929_v20  ;;  %633 = vmatpush.msrb.mxu2 %v3054_v49 }
 0x206   :  { %674 = vmatpush.msrb.mxu3 %v2942_v22  ;;  %634 = vmatpush.msrb.mxu2 %v3059_v50 }
 0x208   :  { %675 = vmatpush.msrb.mxu3 %v2950_v23  ;;  %635 = vmatpush.msrb.mxu2 %v3078_v57 }
 0x20a   :  { %676 = vmatpush.msrb.mxu3 %v2958_v24  ;;  %636 = vmatpush.msrb.mxu2 %v3083_v58 }
 0x20b   :  { %2450 = vmatmul.msk.f32.vlgmr.msra.gmra.mxu2 %vm204_vm1, %v3158_v38  ;;  %2451 = vmatmul.msk.f32.vlgmr.msra.gmra.mxu3 %vm204_vm1, %v3170_v52 }
 0x20c   :  { %717 = vmatpush.msra.mxu2 %v2821_v0  ;;  %757 = vmatpush.msra.mxu3 %v2826_v1 }
 0x20e   :  { %718 = vmatpush.msra.mxu2 %v2831_v2  ;;  %758 = vmatpush.msra.mxu3 %v2838_v3 }
 0x210   :  { %719 = vmatpush.msra.mxu2 %v2843_v4  ;;  %759 = vmatpush.msra.mxu3 %v2848_v5 }
 0x212   :  { %720 = vmatpush.msra.mxu2 %v2861_v8  ;;  %760 = vmatpush.msra.mxu3 %v2866_v9 }
 0x213   :  { %2453 = vmatmul.msk.f32.vlgmr.msrb.gmra.mxu2 %vm204_vm1, %v3170_v52  ;;  %2455 = vmatmul.msk.f32.vlgmr.msrb.gmra.mxu3 %vm204_vm1, %v3170_v52 }
 0x214   :  { %801 = vmatpush.msrb.mxu2 %v2885_v12  ;;  %839 = vmatpush.msrb.mxu3 %v2873_v10 }
 0x216   :  { %802 = vmatpush.msrb.mxu2 %v2900_v15  ;;  %840 = vmatpush.msrb.mxu3 %v2892_v14 }
 0x218   :  { %803 = vmatpush.msrb.mxu2 %v2912_v17  ;;  %841 = vmatpush.msrb.mxu3 %v2905_v16 }
 0x21a   :  { %804 = vmatpush.msrb.mxu2 %v2924_v19  ;;  %842 = vmatpush.msrb.mxu3 %v2917_v18 }
 0x286   :  { %v472_v29 = vpop.f32.mrf.mxu2  ;;  %v512_v28 = vpop.f32.mrf.mxu3 }
 0x287   :  { %v475_v54 = vadd.f32 %v472_v29, %v3034_v42 }
 0x289   :  { %v2447_v32 = vmul.f32 -1.442695, %v475_v54 }
 0x28b   :  { %2568 = vpow2.f32 %v2447_v32 }
 0x28e   :  { %v594_v12 = vpop.f32.mrf.mxu3  ;;  %v556_v62 = vpop.f32.mrf.mxu2 }
 0x28f   :  { %598 = vrot.lane.b32.xlu2 %v594_v12, %s2740_s2  ;;  %v557_v21 = vadd.f32 %v3090_v59, %v556_v62 }
 0x291   :  { %v2569_v10 = vpop.eup %2568 }
 0x292   :  { %v479_v15 = vadd.f32 1.0, %v2569_v10 }
 0x294   :  { %2570 = vrcp.f32 %v479_v15  ;;  %v491_v55 = vand.u32 2147483648, %v479_v15  ;;  %v489_v61 = vand.u32 2147483647, %v479_v15  ;;  %vm485_vm3 = vweird.f32 %v479_v15 }
 0x296   :  { %v678_v14 = vpop.f32.mrf.mxu3  ;;  %v492_v6 = vor.u32 1.1754944e-38, %v491_v55  ;;  %vm490_vm5 = vcmp.eq.f32.partialorder %v489_v61, 8.507059e+37 }
 0x297   :  { %v679_v17 = vadd.f32 %v3044_v47, %v678_v14  ;;  %516 = vrot.lane.b32.xlu2 %v512_v28, %s2741_s25 }
 0x299   :  { %682 = vrot.lane.b32.xlu1 %v679_v17, %s2740_s2 }
 0x29a   :  { %v2571_v16 = vpop.eup %2570 }
 0x29b   :  { %v481_v18 = vmul.f32 %v2571_v16, %v479_v15  ;;  %vm486_vm2 = vweird.f32 %v2571_v16 }
 0x29c   :  { %vm487_vm4 = vmor %vm485_vm3, %vm486_vm2 }
 0x29d   :  { %v482_v19 = vsub.f32 1.0, %v481_v18 }
 0x29f   :  { %v483_v60 = vmul.f32 %v2571_v16, %v482_v19 }
 0x2a1   :  { %v484_v31 = vadd.f32 %v2571_v16, %v483_v60 }
 0x2a3   :  { %v488_v7 = vsel %vm487_vm4, %v2571_v16, %v484_v31 }
 0x2a4   :  { %v493_v25 = vsel %vm490_vm5, %v492_v6, %v488_v7 }
 0x2a5   :  { %v559_v33 = vmul.f32 %v557_v21, %v493_v25 }
 0x2a7   :  { %561 = vrot.lane.b32.xlu0 %v559_v33, %s2742_s26 }
 0x2e9   :  { %v599_v35 = vpop.permute.xlu2 %598 }
 0x2ea   :  { %v601_v36 = vadd.f32 %v599_v35, %v3124_v39 }
 0x2ec   :  { %v2452_v11 = vmul.f32 -1.442695, %v601_v36 }
 0x2ee   :  { %2572 = vpow2.f32 %v2452_v11 }
 0x2f1   :  { %v517_v61 = vpop.permute.xlu2 %516 }
 0x2f2   :  { %v519_v62 = vadd.f32 %v517_v61, %v3034_v42 }
 0x2f4   :  { %v2573_v27 = vpop.eup %2572  ;;  %v2449_v31 = vmul.f32 -1.442695, %v519_v62 }
 0x2f5   :  { %v605_v43 = vadd.f32 1.0, %v2573_v27 }
 0x2f7   :  { %2574 = vrcp.f32 %v605_v43  ;;  %v617_v12 = vand.u32 2147483648, %v605_v43  ;;  %vm611_vm7 = vweird.f32 %v605_v43  ;;  %v615_v10 = vand.u32 2147483647, %v605_v43 }
 0x2f9   :  { %v618_v14 = vor.u32 1.1754944e-38, %v617_v12  ;;  %vm616_vm9 = vcmp.eq.f32.partialorder %v615_v10, 8.507059e+37 }
 0x2fd   :  { %v2575_v45 = vpop.eup %2574 }
 0x2fe   :  { %v607_v29 = vmul.f32 %v2575_v45, %v605_v43  ;;  %vm612_vm6 = vweird.f32 %v2575_v45 }
 0x2ff   :  { %vm613_vm8 = vmor %vm611_vm7, %vm612_vm6 }
 0x300   :  { %v608_v28 = vsub.f32 1.0, %v607_v29 }
 0x302   :  { %v609_v54 = vmul.f32 %v2575_v45, %v608_v28 }
 0x304   :  { %v610_v32 = vadd.f32 %v2575_v45, %v609_v54 }
 0x306   :  { %v614_v15 = vsel %vm613_vm8, %v2575_v45, %v610_v32 }
 0x307   :  { %v619_v17 = vsel %vm616_vm9, %v618_v14, %v614_v15 }
 0x30b   :  { %v683_v16 = vpop.permute.xlu1 %682 }
 0x30c   :  { %v685_v18 = vmul.f32 %v683_v16, %v619_v17  ;;  %v638_v16 = vpop.f32.mrf.mxu2 }
 0x30e   :  { %687 = vrot.lane.b32.xlu0 %v685_v18, %s2742_s26  ;;  %v641_v18 = vadd.f32 %v638_v16, %v3150_v46 }
 0x319   :  { %v562_v19 = vpop.permute.xlu0 %561 }
 0x31a   :  { %v564_v55 = vadd.f32 %v562_v19, %v3034_v42  ;;  %v2454_v19 = vmul.f32 -1.442695, %v641_v18 }
 0x31c   :  { %2576 = vtanh.f32 %v564_v55 }
 0x31d   :  { %2578 = vpow2.f32 %v2449_v31 }
 0x322   :  { %v2577_v60 = vpop.eup %2576 }
 0x323   :  { %568 = vrot.lane.b32.xlu1 %v2577_v60, %s2740_s2  ;;  %v2579_v6 = vpop.eup %2578 }
 0x324   :  { %v523_v7 = vadd.f32 1.0, %v2579_v6 }
 0x326   :  { %2580 = vrcp.f32 %v523_v7  ;;  %v535_v45 = vand.u32 2147483648, %v523_v7  ;;  %vm529_vm11 = vweird.f32 %v523_v7  ;;  %v533_v29 = vand.u32 2147483647, %v523_v7 }
 0x328   :  { %v536_v54 = vor.u32 1.1754944e-38, %v535_v45  ;;  %vm534_vm13 = vcmp.eq.f32.partialorder %v533_v29, 8.507059e+37 }
 0x32c   :  { %v2581_v21 = vpop.eup %2580 }
 0x32d   :  { %v525_v25 = vmul.f32 %v2581_v21, %v523_v7  ;;  %vm530_vm10 = vweird.f32 %v2581_v21 }
 0x32e   :  { %vm531_vm12 = vmor %vm529_vm11, %vm530_vm10 }
 0x32f   :  { %v526_v36 = vsub.f32 1.0, %v525_v25 }
 0x331   :  { %v527_v11 = vmul.f32 %v2581_v21, %v526_v36 }
 0x333   :  { %v528_v43 = vadd.f32 %v2581_v21, %v527_v11 }
 0x335   :  { %v532_v28 = vsel %vm531_vm12, %v2581_v21, %v528_v43 }
 0x336   :  { %v537_v32 = vsel %vm534_vm13, %v536_v54, %v532_v28 }
 0x337   :  { %v566_v12 = vsub.f32 1.0, %v537_v32  ;;  %v572_v15 = vmul.f32 %v537_v32, %v3154_v30 }
 0x380   :  { %v688_v33 = vpop.permute.xlu0 %687 }
 0x381   :  { %v690_v35 = vadd.f32 %v688_v33, %v3150_v46 }
 0x383   :  { %2582 = vtanh.f32 %v690_v35 }
 0x384   :  { %2584 = vpow2.f32 %v2454_v19 }
 0x389   :  { %v2583_v27 = vpop.eup %2582 }
 0x38a   :  { %694 = vrot.lane.b32.xlu0 %v2583_v27, %s2740_s2  ;;  %v2585_v55 = vpop.eup %2584 }
 0x38b   :  { %v645_v60 = vadd.f32 1.0, %v2585_v55 }
 0x38d   :  { %2586 = vrcp.f32 %v645_v60  ;;  %v657_v30 = vand.u32 2147483648, %v645_v60  ;;  %vm651_vm15 = vweird.f32 %v645_v60  ;;  %v655_v21 = vand.u32 2147483647, %v645_v60 }
 0x38f   :  { %v658_v33 = vor.u32 1.1754944e-38, %v657_v30  ;;  %vm656_vm2 = vcmp.eq.f32.partialorder %v655_v21, 8.507059e+37 }
 0x393   :  { %v2587_v61 = vpop.eup %2586 }
 0x394   :  { %v647_v62 = vmul.f32 %v2587_v61, %v645_v60  ;;  %vm652_vm14 = vweird.f32 %v2587_v61 }
 0x395   :  { %v569_v10 = vpop.permute.xlu1 %568  ;;  %vm653_vm0 = vmor %vm651_vm15, %vm652_vm14 }
 0x396   :  { %v571_v14 = vmul.f32 %v569_v10, %v566_v12  ;;  %v648_v31 = vsub.f32 1.0, %v647_v62 }
 0x398   :  { %v3213_v17 = vadd.f32 %v572_v15, %v571_v14  ;;  %v649_v6 = vmul.f32 %v2587_v61, %v648_v31 }
 0x39a   :  { %701 = vrot.lane.b32.xlu2 %v3213_v17, %s2740_s2  ;;  %v650_v7 = vadd.f32 %v2587_v61, %v649_v6 }
 0x39c   :  { %v654_v46 = vsel %vm653_vm0, %v2587_v61, %v650_v7 }
 0x39d   :  { %v659_v35 = vsel %vm656_vm2, %v658_v33, %v654_v46 }
 0x39e   :  { %v692_v36 = vsub.f32 1.0, %v659_v35  ;;  %v698_v27 = vmul.f32 %v659_v35, %v3170_v52 }
 0x3f4   :  { %v702_v25 = vpop.permute.xlu2 %701 }
 0x3f5   :  { %2456 = vmatmul.msk.f32.vlgmr.msra.gmra.mxu2 %vm204_vm1, %v702_v25  ;;  %2458 = vmatmul.msk.f32.vlgmr.msra.gmra.mxu3 %vm204_vm1, %v702_v25 }
 0x3f6   :  { %967 = vmatpush.msra.mxu2 %v2821_v0  ;;  %1007 = vmatpush.msra.mxu3 %v2826_v1 }
 0x3f8   :  { %968 = vmatpush.msra.mxu2 %v2831_v2  ;;  %1008 = vmatpush.msra.mxu3 %v2838_v3 }
 0x3fa   :  { %969 = vmatpush.msra.mxu2 %v2843_v4  ;;  %1009 = vmatpush.msra.mxu3 %v2848_v5 }
 0x3fc   :  { %v695_v11 = vpop.permute.xlu0 %694  ;;  %970 = vmatpush.msra.mxu2 %v2861_v8  ;;  %1010 = vmatpush.msra.mxu3 %v2866_v9 }
 0x3fd   :  { %v697_v43 = vmul.f32 %v695_v11, %v692_v36  ;;  %2460 = vmatmul.msk.f32.vlgmr.msrb.gmra.mxu2 %vm204_vm1, %v702_v25 }
 0x3fe   :  { %1133 = vmatpush.msrb.mxu2 %v3054_v49 }
 0x3ff   :  { %v3231_v45 = vadd.f32 %v698_v27, %v697_v43 }
 0x400   :  { %1134 = vmatpush.msrb.mxu2 %v3059_v50 }
 0x401   :  { %2461 = vmatmul.msk.f32.vlgmr.msrb.gmra.mxu3 %vm204_vm1, %v3231_v45  ;;  %2463 = vmatmul.msk.f32.vlgmr.msrb.gmra.mxu0 %vm204_vm1, %v3231_v45 }
 0x402   :  { %2465 = vmatmul.msk.f32.vlgmr.msrb.gmra.mxu1 %vm204_vm1, %v3231_v45  ;;  %1173 = vmatpush.msrb.mxu3 %v2929_v20 }
 0x403   :  { %1135 = vmatpush.msrb.mxu2 %v3078_v57  ;;  %1217 = vmatpush.msrb.mxu0 %v2821_v0 }
 0x404   :  { %1174 = vmatpush.msrb.mxu3 %v2942_v22  ;;  %1257 = vmatpush.msrb.mxu1 %v2826_v1 }
 0x405   :  { %1136 = vmatpush.msrb.mxu2 %v3083_v58  ;;  %1218 = vmatpush.msrb.mxu0 %v2831_v2 }
 0x406   :  { %1175 = vmatpush.msrb.mxu3 %v2950_v23  ;;  %1258 = vmatpush.msrb.mxu1 %v2838_v3 }
 0x407   :  { %1219 = vmatpush.msrb.mxu0 %v2843_v4 }
 0x408   :  { %1176 = vmatpush.msrb.mxu3 %v2958_v24  ;;  %1259 = vmatpush.msrb.mxu1 %v2848_v5 }
 0x409   :  { %1220 = vmatpush.msrb.mxu0 %v2861_v8 }
 0x40a   :  { %1260 = vmatpush.msrb.mxu1 %v2866_v9 }
 0x478   :  { %v722_v0 = vpop.f32.mrf.mxu2  ;;  %v762_v22 = vpop.f32.mrf.mxu3 }
 0x479   :  { %v725_v1 = vadd.f32 %v722_v0, %v3049_v48 }
 0x47b   :  { %v2457_v20 = vmul.f32 -1.442695, %v725_v1 }
 0x47d   :  { %2588 = vpow2.f32 %v2457_v20 }
 0x47f   :  { %v928_v2 = vpop.f32.mrf.mxu1 }
 0x480   :  { %v929_v23 = vadd.f32 %v3044_v47, %v928_v2  ;;  %v806_v32 = vpop.f32.mrf.mxu2 }
 0x481   :  { %v807_v15 = vadd.f32 %v3090_v59, %v806_v32 }
 0x482   :  { %932 = vrot.lane.b32.xlu0 %v929_v23, %s2740_s2 }
 0x483   :  { %v2589_v3 = vpop.eup %2588 }
 0x484   :  { %v729_v4 = vadd.f32 1.0, %v2589_v3  ;;  %v844_v24 = vpop.f32.mrf.mxu3 }
 0x485   :  { %848 = vrot.lane.b32.xlu1 %v844_v24, %s2740_s2 }
 0x486   :  { %2590 = vrcp.f32 %v729_v4  ;;  %v741_v29 = vand.u32 2147483648, %v729_v4  ;;  %v739_v54 = vand.u32 2147483647, %v729_v4  ;;  %vm735_vm4 = vweird.f32 %v729_v4 }
 0x488   :  { %v742_v47 = vor.u32 1.1754944e-38, %v741_v29  ;;  %vm740_vm6 = vcmp.eq.f32.partialorder %v739_v54, 8.507059e+37 }
 0x48c   :  { %v2591_v5 = vpop.eup %2590 }
 0x48d   :  { %v731_v8 = vmul.f32 %v2591_v5, %v729_v4  ;;  %766 = vrot.lane.b32.xlu1 %v762_v22, %s2741_s25  ;;  %vm736_vm3 = vweird.f32 %v2591_v5 }
 0x48e   :  { %vm737_vm5 = vmor %vm735_vm4, %vm736_vm3 }
 0x48f   :  { %v732_v9 = vsub.f32 1.0, %v731_v8 }
 0x491   :  { %v733_v28 = vmul.f32 %v2591_v5, %v732_v9 }
 0x493   :  { %v734_v12 = vadd.f32 %v2591_v5, %v733_v28 }
 0x495   :  { %v738_v10 = vsel %vm737_vm5, %v2591_v5, %v734_v12 }
 0x496   :  { %v743_v14 = vsel %vm740_vm6, %v742_v47, %v738_v10 }
 0x497   :  { %v809_v16 = vmul.f32 %v807_v15, %v743_v14 }
 0x499   :  { %811 = vrot.lane.b32.xlu2 %v809_v16, %s2742_s26 }
 0x4f3   :  { %v812_v18 = vpop.permute.xlu2 %811 }
 0x4f4   :  { %v814_v19 = vadd.f32 %v812_v18, %v3049_v48  ;;  %v933_v27 = vpop.permute.xlu0 %932 }
 0x4f6   :  { %2592 = vtanh.f32 %v814_v19 }
 0x4f7   :  { %v849_v55 = vpop.permute.xlu1 %848 }
 0x4f8   :  { %v851_v60 = vadd.f32 %v849_v55, %v3117_v37  ;;  %v888_v55 = vpop.f32.mrf.mxu0 }
 0x4fa   :  { %v2462_v61 = vmul.f32 -1.442695, %v851_v60  ;;  %v891_v60 = vadd.f32 %v888_v55, %v3148_v44 }
 0x4fc   :  { %v2593_v62 = vpop.eup %2592  ;;  %2594 = vpow2.f32 %v2462_v61  ;;  %v2464_v61 = vmul.f32 -1.442695, %v891_v60 }
 0x4fd   :  { %818 = vrot.lane.b32.xlu0 %v2593_v62, %s2740_s2 }
 0x4ff   :  { %v767_v1 = vpop.permute.xlu1 %766 }
 0x500   :  { %v769_v20 = vadd.f32 %v767_v1, %v3049_v48 }
 0x502   :  { %v2595_v31 = vpop.eup %2594  ;;  %v2459_v22 = vmul.f32 -1.442695, %v769_v20  ;;  %v3282_v20 = vld [vmem:[%s3894_s8 + $0x18] sm:$0xff] }
 0x503   :  { %v855_v6 = vadd.f32 1.0, %v2595_v31 }
 0x505   :  { %2596 = vrcp.f32 %v855_v6  ;;  %v867_v25 = vand.u32 2147483648, %v855_v6  ;;  %v865_v33 = vand.u32 2147483647, %v855_v6  ;;  %vm861_vm8 = vweird.f32 %v855_v6 }
 0x506   :  { %2598 = vpow2.f32 %v2459_v22  ;;  %v3288_v22 = vld [vmem:[%s3894_s8 + $0x10] sm:$0xff] }
 0x507   :  { %v868_v36 = vor.u32 1.1754944e-38, %v867_v25  ;;  %vm866_vm10 = vcmp.eq.f32.partialorder %v865_v33, 8.507059e+37 }
 0x50b   :  { %v2597_v7 = vpop.eup %2596 }
 0x50c   :  { %v857_v30 = vmul.f32 %v2597_v7, %v855_v6  ;;  %vm862_vm7 = vweird.f32 %v2597_v7  ;;  %v2599_v2 = vpop.eup %2598 }
 0x50d   :  { %vm863_vm9 = vmor %vm861_vm8, %vm862_vm7  ;;  %v773_v23 = vadd.f32 1.0, %v2599_v2  ;;  %v3294_v2 = vld [vmem:[%s3894_s8 + $0x8] sm:$0xff] }
 0x50e   :  { %v858_v21 = vsub.f32 1.0, %v857_v30 }
 0x50f   :  { %2600 = vrcp.f32 %v773_v23  ;;  %v785_v9 = vand.u32 2147483648, %v773_v23  ;;  %vm779_vm12 = vweird.f32 %v773_v23  ;;  %v783_v29 = vand.u32 2147483647, %v773_v23 }
 0x510   :  { %v859_v46 = vmul.f32 %v2597_v7, %v858_v21 }
 0x511   :  { %v786_v54 = vor.u32 1.1754944e-38, %v785_v9  ;;  %vm784_vm14 = vcmp.eq.f32.partialorder %v783_v29, 8.507059e+37  ;;  %v3341_v9 = vld [vmem:[%s3891_s6 + $0x8] sm:$0xff]  ;;  %v3358_v29 = vld [vmem:[%s3891_s6] sm:$0xff] }
 0x512   :  { %v860_v35 = vadd.f32 %v2597_v7, %v859_v46 }
 0x514   :  { %v864_v11 = vsel %vm863_vm9, %v2597_v7, %v860_v35 }
 0x515   :  { %v869_v43 = vsel %vm866_vm10, %v868_v36, %v864_v11  ;;  %v2601_v3 = vpop.eup %2600 }
 0x516   :  { %v935_v0 = vmul.f32 %v933_v27, %v869_v43  ;;  %v775_v4 = vmul.f32 %v2601_v3, %v773_v23  ;;  %vm780_vm11 = vweird.f32 %v2601_v3  ;;  %v3300_v23 = vld [vmem:[%s3894_s8] sm:$0xff] }
 0x517   :  { %vm781_vm13 = vmor %vm779_vm12, %vm780_vm11 }
 0x518   :  { %937 = vrot.lane.b32.xlu2 %v935_v0, %s2742_s26  ;;  %v776_v24 = vsub.f32 1.0, %v775_v4  ;;  %v3309_v4 = vld [vmem:[%s3893_s5 + $0x18] sm:$0xff] }
 0x51a   :  { %v777_v5 = vmul.f32 %v2601_v3, %v776_v24  ;;  %v3315_v24 = vld [vmem:[%s3891_s6 + $0x18] sm:$0xff] }
 0x51c   :  { %v778_v8 = vadd.f32 %v2601_v3, %v777_v5  ;;  %v3322_v5 = vld [vmem:[%s3893_s5 + $0x10] sm:$0xff] }
 0x51e   :  { %v782_v28 = vsel %vm781_vm13, %v2601_v3, %v778_v8  ;;  %v3328_v8 = vld [vmem:[%s3891_s6 + $0x10] sm:$0xff] }
 0x51f   :  { %v787_v32 = vsel %vm784_vm14, %v786_v54, %v782_v28  ;;  %v3371_v28 = vld [vmem:[%s3889_s4 + $0x18] sm:$0xff]  ;;  %v3377_v54 = vld [vmem:[%s3888_s3 + $0x10] sm:$0xff] }
 0x520   :  { %v816_v12 = vsub.f32 1.0, %v787_v32  ;;  %v822_v15 = vmul.f32 %v787_v32, %v3213_v17  ;;  %v3389_v32 = vld [vmem:[%s3888_s3 + $0x8] sm:$0xff] }
 0x56f   :  { %v819_v47 = vpop.permute.xlu0 %818 }
 0x570   :  { %v821_v10 = vmul.f32 %v819_v47, %v816_v12  ;;  %v3395_v12 = vld [vmem:[%s3889_s4 + $0x8] sm:$0xff]  ;;  %v3401_v47 = vld [vmem:[%s3888_s3] sm:$0xff] }
 0x572   :  { %v3267_v14 = vadd.f32 %v822_v15, %v821_v10  ;;  %v938_v16 = vpop.permute.xlu2 %937  ;;  %v3407_v10 = vld [vmem:[%s3889_s4] sm:$0xff] }
 0x573   :  { %v940_v18 = vadd.f32 %v938_v16, %v3148_v44 }
 0x574   :  { %951 = vrot.lane.b32.xlu1 %v3267_v14, %s2740_s2 }
 0x575   :  { %2602 = vtanh.f32 %v940_v18 }
 0x576   :  { %2604 = vpow2.f32 %v2464_v61  ;;  %v3416_v61 = vld [vmem:[%s3895_s10] ss:$0 sm:$0xff] }
 0x57b   :  { %v2603_v19 = vpop.eup %2602 }
 0x57c   :  { %944 = vrot.lane.b32.xlu2 %v2603_v19, %s2740_s2  ;;  %v2605_v62 = vpop.eup %2604 }
 0x57d   :  { %v895_v31 = vadd.f32 1.0, %v2605_v62 }
 0x57f   :  { %2606 = vrcp.f32 %v895_v31  ;;  %v907_v46 = vand.u32 2147483648, %v895_v31  ;;  %vm901_vm0 = vweird.f32 %v895_v31  ;;  %v905_v33 = vand.u32 2147483647, %v895_v31 }
 0x581   :  { %v908_v36 = vor.u32 1.1754944e-38, %v907_v46  ;;  %vm906_vm3 = vcmp.eq.f32.partialorder %v905_v33, 8.507059e+37 }
 0x585   :  { %v2607_v6 = vpop.eup %2606 }
 0x586   :  { %v897_v7 = vmul.f32 %v2607_v6, %v895_v31  ;;  %vm902_vm15 = vweird.f32 %v2607_v6 }
 0x587   :  { %vm903_vm2 = vmor %vm901_vm0, %vm902_vm15 }
 0x588   :  { %v898_v30 = vsub.f32 1.0, %v897_v7 }
 0x58a   :  { %v899_v21 = vmul.f32 %v2607_v6, %v898_v30 }
 0x58c   :  { %v900_v25 = vadd.f32 %v2607_v6, %v899_v21 }
 0x58e   :  { %v904_v35 = vsel %vm903_vm2, %v2607_v6, %v900_v25 }
 0x58f   :  { %v909_v11 = vsel %vm906_vm3, %v908_v36, %v904_v35 }
 0x590   :  { %v942_v44 = vsub.f32 1.0, %v909_v11  ;;  %v948_v43 = vmul.f32 %v909_v11, %v3231_v45 }
 0x5d6   :  { %v945_v27 = vpop.permute.xlu2 %944 }
 0x5d7   :  { %v947_v0 = vmul.f32 %v945_v27, %v942_v44 }
 0x5d9   :  { %v3275_v1 = vadd.f32 %v948_v43, %v947_v0 }
 0x5db   :  { %2471 = vmatmul.msk.f32.vlgmr.msra.gmra.mxu1 %vm204_vm1, %v3275_v1 }
 0x5dc   :  { %1423 = vmatpush.msra.mxu1 %v3282_v20 }
 0x5de   :  { %1424 = vmatpush.msra.mxu1 %v3288_v22 }
 0x5e0   :  { %1425 = vmatpush.msra.mxu1 %v3294_v2 }
 0x5e2   :  { %1426 = vmatpush.msra.mxu1 %v3300_v23 }
 0x5e6   :  { %v952_v3 = vpop.permute.xlu1 %951 }
 0x5e7   :  { %2466 = vmatmul.msk.f32.vlgmr.msra.gmra.mxu2 %vm204_vm1, %v952_v3  ;;  %2468 = vmatmul.msk.f32.vlgmr.msra.gmra.mxu3 %vm204_vm1, %v952_v3 }
 0x5e8   :  { %2470 = vmatmul.msk.f32.vlgmr.msra.gmra.mxu0 %vm204_vm1, %v952_v3  ;;  %1301 = vmatpush.msra.mxu2 %v3309_v4 }
 0x5e9   :  { %1339 = vmatpush.msra.mxu3 %v3315_v24  ;;  %1383 = vmatpush.msra.mxu0 %v3054_v49  ;;  %v3335_v49 = vld [vmem:[%s3893_s5 + $0x8] sm:$0xff] }
 0x5ea   :  { %1302 = vmatpush.msra.mxu2 %v3322_v5 }
 0x5eb   :  { %1340 = vmatpush.msra.mxu3 %v3328_v8  ;;  %1384 = vmatpush.msra.mxu0 %v3059_v50  ;;  %v3348_v50 = vld [vmem:[%s3893_s5] sm:$0xff] }
 0x5ec   :  { %1303 = vmatpush.msra.mxu2 %v3335_v49 }
 0x5ed   :  { %1341 = vmatpush.msra.mxu3 %v3341_v9  ;;  %1385 = vmatpush.msra.mxu0 %v3078_v57  ;;  %v3365_v57 = vld [vmem:[%s3888_s3 + $0x18] sm:$0xff] }
 0x5ee   :  { %1304 = vmatpush.msra.mxu2 %v3348_v50 }
 0x5ef   :  { %2473 = vmatmul.msk.f32.vlgmr.msrb.gmra.mxu2 %vm204_vm1, %v3275_v1  ;;  %2475 = vmatmul.msk.f32.vlgmr.msrb.gmra.mxu3 %vm204_vm1, %v3275_v1 }
 0x5f0   :  { %1342 = vmatpush.msra.mxu3 %v3358_v29  ;;  %1386 = vmatpush.msra.mxu0 %v3083_v58  ;;  %v3383_v58 = vld [vmem:[%s3889_s4 + $0x10] sm:$0xff] }
 0x5f1   :  { %1467 = vmatpush.msrb.mxu2 %v3365_v57 }
 0x5f2   :  { %1507 = vmatpush.msrb.mxu3 %v3371_v28 }
 0x5f3   :  { %1468 = vmatpush.msrb.mxu2 %v3377_v54 }
 0x5f4   :  { %1508 = vmatpush.msrb.mxu3 %v3383_v58 }
 0x5f5   :  { %1469 = vmatpush.msrb.mxu2 %v3389_v32 }
 0x5f6   :  { %1509 = vmatpush.msrb.mxu3 %v3395_v12 }
 0x5f7   :  { %1470 = vmatpush.msrb.mxu2 %v3401_v47 }
 0x5f8   :  { %1510 = vmatpush.msrb.mxu3 %v3407_v10 }
 0x658   :  { %v1094_v15 = vpop.f32.mrf.mxu1 }
 0x659   :  { %1098 = vrot.lane.b32.xlu0 %v1094_v15, %s2740_s2 }
 0x665   :  { %v1056_v35 = vpop.f32.mrf.mxu0 }
 0x666   :  { %v1057_v44 = vadd.f32 %v3090_v59, %v1056_v35 }
 0x66a   :  { %v972_v16 = vpop.f32.mrf.mxu2  ;;  %v1012_v18 = vpop.f32.mrf.mxu3 }
 0x66b   :  { %v975_v19 = vadd.f32 %v972_v16, %v3073_v56  ;;  %1016 = vrot.lane.b32.xlu0 %v1012_v18, %s2741_s25 }
 0x66d   :  { %v2467_v55 = vmul.f32 -1.442695, %v975_v19 }
 0x66f   :  { %2608 = vpow2.f32 %v2467_v55 }
 0x672   :  { %v1178_v60 = vpop.f32.mrf.mxu3 }
 0x673   :  { %v1179_v62 = vadd.f32 %v3416_v61, %v1178_v60 }
 0x675   :  { %v2609_v31 = vpop.eup %2608  ;;  %1182 = vrot.lane.b32.xlu1 %v1179_v62, %s2740_s2 }
 0x676   :  { %v979_v6 = vadd.f32 1.0, %v2609_v31 }
 0x678   :  { %2610 = vrcp.f32 %v979_v6  ;;  %v991_v25 = vand.u32 2147483648, %v979_v6  ;;  %v989_v33 = vand.u32 2147483647, %v979_v6  ;;  %vm985_vm5 = vweird.f32 %v979_v6 }
 0x67a   :  { %v992_v11 = vor.u32 1.1754944e-38, %v991_v25  ;;  %vm990_vm7 = vcmp.eq.f32.partialorder %v989_v33, 8.507059e+37 }
 0x67e   :  { %v2611_v7 = vpop.eup %2610 }
 0x67f   :  { %v981_v30 = vmul.f32 %v2611_v7, %v979_v6  ;;  %vm986_vm4 = vweird.f32 %v2611_v7 }
 0x680   :  { %vm987_vm6 = vmor %vm985_vm5, %vm986_vm4 }
 0x681   :  { %v982_v21 = vsub.f32 1.0, %v981_v30 }
 0x683   :  { %v983_v46 = vmul.f32 %v2611_v7, %v982_v21 }
 0x685   :  { %v984_v36 = vadd.f32 %v2611_v7, %v983_v46 }
 0x687   :  { %v988_v27 = vsel %vm987_vm6, %v2611_v7, %v984_v36 }
 0x688   :  { %v993_v43 = vsel %vm990_vm7, %v992_v11, %v988_v27 }
 0x689   :  { %v1059_v0 = vmul.f32 %v1057_v44, %v993_v43 }
 0x68b   :  { %1061 = vrot.lane.b32.xlu2 %v1059_v0, %s2742_s26 }
 0x6cb   :  { %v1099_v3 = vpop.permute.xlu0 %1098 }
 0x6cc   :  { %v1101_v15 = vadd.f32 %v1099_v3, %v3105_v13 }
 0x6ce   :  { %v2472_v16 = vmul.f32 -1.442695, %v1101_v15 }
 0x6d0   :  { %2612 = vpow2.f32 %v2472_v16 }
 0x6d6   :  { %v2613_v18 = vpop.eup %2612 }
 0x6d7   :  { %v1105_v19 = vadd.f32 1.0, %v2613_v18 }
 0x6d9   :  { %2614 = vrcp.f32 %v1105_v19  ;;  %v1117_v31 = vand.u32 2147483648, %v1105_v19  ;;  %v1115_v59 = vand.u32 2147483647, %v1105_v19  ;;  %vm1111_vm9 = vweird.f32 %v1105_v19 }
 0x6db   :  { %v1118_v25 = vor.u32 1.1754944e-38, %v1117_v31  ;;  %vm1116_vm11 = vcmp.eq.f32.partialorder %v1115_v59, 8.507059e+37 }
 0x6dd   :  { %v1017_v44 = vpop.permute.xlu0 %1016 }
 0x6de   :  { %v1019_v27 = vadd.f32 %v1017_v44, %v3073_v56 }
 0x6df   :  { %v2615_v55 = vpop.eup %2614 }
 0x6e0   :  { %v1107_v60 = vmul.f32 %v2615_v55, %v1105_v19  ;;  %vm1112_vm8 = vweird.f32 %v2615_v55  ;;  %v2469_v43 = vmul.f32 -1.442695, %v1019_v27 }
 0x6e1   :  { %vm1113_vm10 = vmor %vm1111_vm9, %vm1112_vm8 }
 0x6e2   :  { %v1108_v62 = vsub.f32 1.0, %v1107_v60 }
 0x6e4   :  { %v1109_v6 = vmul.f32 %v2615_v55, %v1108_v62 }
 0x6e5   :  { %v1062_v7 = vpop.permute.xlu2 %1061 }
 0x6e6   :  { %v1064_v30 = vadd.f32 %v1062_v7, %v3073_v56  ;;  %v1110_v21 = vadd.f32 %v2615_v55, %v1109_v6 }
 0x6e7   :  { %v1183_v35 = vpop.permute.xlu1 %1182 }
 0x6e8   :  { %2616 = vtanh.f32 %v1064_v30  ;;  %v1114_v46 = vsel %vm1113_vm10, %v2615_v55, %v1110_v21 }
 0x6e9   :  { %v1119_v33 = vsel %vm1116_vm11, %v1118_v25, %v1114_v46  ;;  %2618 = vpow2.f32 %v2469_v43 }
 0x6ea   :  { %v1185_v36 = vmul.f32 %v1183_v35, %v1119_v33 }
 0x6ec   :  { %1187 = vrot.lane.b32.xlu1 %v1185_v36, %s2742_s26 }
 0x6ee   :  { %v2617_v11 = vpop.eup %2616 }
 0x6ef   :  { %1068 = vrot.lane.b32.xlu2 %v2617_v11, %s2740_s2  ;;  %v2619_v0 = vpop.eup %2618  ;;  %v1138_v11 = vpop.f32.mrf.mxu2 }
 0x6f0   :  { %v1023_v3 = vadd.f32 1.0, %v2619_v0  ;;  %v1141_v44 = vadd.f32 %v1138_v11, %v3146_v41 }
 0x6f2   :  { %2620 = vrcp.f32 %v1023_v3  ;;  %v1035_v60 = vand.u32 2147483648, %v1023_v3  ;;  %vm1029_vm13 = vweird.f32 %v1023_v3  ;;  %v1033_v62 = vand.u32 2147483647, %v1023_v3 }
 0x6f3   :  { %v2474_v27 = vmul.f32 -1.442695, %v1141_v44 }
 0x6f4   :  { %v1036_v6 = vor.u32 1.1754944e-38, %v1035_v60  ;;  %vm1034_vm15 = vcmp.eq.f32.partialorder %v1033_v62, 8.507059e+37  ;;  %v3467_v60 = vld [vmem:[%s3898_s7] sm:$0xff] }
 0x6f8   :  { %v2621_v15 = vpop.eup %2620 }
 0x6f9   :  { %v1025_v16 = vmul.f32 %v2621_v15, %v1023_v3  ;;  %vm1030_vm12 = vweird.f32 %v2621_v15 }
 0x6fa   :  { %vm1031_vm14 = vmor %vm1029_vm13, %vm1030_vm12 }
 0x6fb   :  { %v1026_v18 = vsub.f32 1.0, %v1025_v16 }
 0x6fd   :  { %v1027_v19 = vmul.f32 %v2621_v15, %v1026_v18  ;;  %v3451_v18 = vld [vmem:[%s3898_s7 + $0x10] sm:$0xff] }
 0x6ff   :  { %v1028_v55 = vadd.f32 %v2621_v15, %v1027_v19 }
 0x701   :  { %v1032_v31 = vsel %vm1031_vm14, %v2621_v15, %v1028_v55  ;;  %v3459_v55 = vld [vmem:[%s3898_s7 + $0x8] sm:$0xff] }
 0x702   :  { %v1037_v59 = vsel %vm1034_vm15, %v1036_v6, %v1032_v31 }
 0x703   :  { %v1066_v7 = vsub.f32 1.0, %v1037_v59  ;;  %v1072_v21 = vmul.f32 %v1037_v59, %v3267_v14 }
 0x749   :  { %v1069_v30 = vpop.permute.xlu2 %1068 }
 0x74a   :  { %v1071_v25 = vmul.f32 %v1069_v30, %v1066_v7 }
 0x74c   :  { %v3428_v46 = vadd.f32 %v1072_v21, %v1071_v25 }
 0x74e   :  { %1201 = vrot.lane.b32.xlu1 %v3428_v46, %s2740_s2 }
 0x75e   :  { %v1188_v33 = vpop.permute.xlu1 %1187 }
 0x75f   :  { %v1190_v35 = vadd.f32 %v1188_v33, %v3146_v41  ;;  %v3443_v41 = vld [vmem:[%s3898_s7 + $0x18] sm:$0xff] }
 0x761   :  { %2622 = vtanh.f32 %v1190_v35 }
 0x762   :  { %2624 = vpow2.f32 %v2474_v27 }
 0x767   :  { %v2623_v36 = vpop.eup %2622 }
 0x768   :  { %1194 = vrot.lane.b32.xlu0 %v2623_v36, %s2740_s2  ;;  %v2625_v43 = vpop.eup %2624 }
 0x769   :  { %v1145_v0 = vadd.f32 1.0, %v2625_v43 }
 0x76b   :  { %2626 = vrcp.f32 %v1145_v0  ;;  %v1157_v6 = vand.u32 2147483648, %v1145_v0  ;;  %vm1151_vm2 = vweird.f32 %v1145_v0  ;;  %v1155_v59 = vand.u32 2147483647, %v1145_v0 }
 0x76d   :  { %v1158_v30 = vor.u32 1.1754944e-38, %v1157_v6  ;;  %vm1156_vm4 = vcmp.eq.f32.partialorder %v1155_v59, 8.507059e+37 }
 0x771   :  { %v2627_v3 = vpop.eup %2626 }
 0x772   :  { %v1147_v16 = vmul.f32 %v2627_v3, %v1145_v0  ;;  %vm1152_vm0 = vweird.f32 %v2627_v3 }
 0x773   :  { %vm1153_vm3 = vmor %vm1151_vm2, %vm1152_vm0 }
 0x774   :  { %v1148_v19 = vsub.f32 1.0, %v1147_v16 }
 0x776   :  { %v1149_v62 = vmul.f32 %v2627_v3, %v1148_v19 }
 0x778   :  { %v1150_v31 = vadd.f32 %v2627_v3, %v1149_v62 }
 0x77a   :  { %v1154_v7 = vsel %vm1153_vm3, %v2627_v3, %v1150_v31 }
 0x77b   :  { %v1159_v21 = vsel %vm1156_vm4, %v1158_v30, %v1154_v7 }
 0x77c   :  { %v1192_v25 = vsub.f32 1.0, %v1159_v21  ;;  %v1198_v36 = vmul.f32 %v1159_v21, %v3275_v1 }
 0x7c0   :  { %v1202_v15 = vpop.permute.xlu1 %1201 }
 0x7c1   :  { %2476 = vmatmul.msk.f32.vlgmr.msrb.gmra.mxu0 %vm204_vm1, %v1202_v15  ;;  %2478 = vmatmul.msk.f32.vlgmr.msrb.gmra.mxu1 %vm204_vm1, %v1202_v15 }
 0x7c2   :  { %2480 = vmatmul.msk.f32.vlgmr.msra.gmra.mxu2 %vm204_vm1, %v1202_v15  ;;  %1551 = vmatpush.msrb.mxu0 %v3309_v4 }
 0x7c3   :  { %1589 = vmatpush.msrb.mxu1 %v3315_v24  ;;  %1633 = vmatpush.msra.mxu2 %v3443_v41 }
 0x7c4   :  { %1552 = vmatpush.msrb.mxu0 %v3322_v5 }
 0x7c5   :  { %1590 = vmatpush.msrb.mxu1 %v3328_v8  ;;  %1634 = vmatpush.msra.mxu2 %v3451_v18 }
 0x7c6   :  { %1553 = vmatpush.msrb.mxu0 %v3335_v49 }
 0x7c7   :  { %1591 = vmatpush.msrb.mxu1 %v3341_v9  ;;  %1635 = vmatpush.msra.mxu2 %v3459_v55 }
 0x7c8   :  { %1554 = vmatpush.msrb.mxu0 %v3348_v50 }
 0x7c9   :  { %1592 = vmatpush.msrb.mxu1 %v3358_v29  ;;  %1636 = vmatpush.msra.mxu2 %v3467_v60 }
 0x7da   :  { %v1195_v33 = vpop.permute.xlu0 %1194 }
 0x7db   :  { %v1197_v35 = vmul.f32 %v1195_v33, %v1192_v25  ;;  %v3495_v33 = vld [vmem:[%s3896_s9] ss:$0 sm:$0xff] }
 0x7dd   :  { %v3471_v11 = vadd.f32 %v1198_v36, %v1197_v35 }
 0x7df   :  { %2481 = vmatmul.msk.f32.vlgmr.msra.gmra.mxu3 %vm204_vm1, %v3471_v11  ;;  %2483 = vmatmul.msk.f32.vlgmr.msra.gmra.mxu0 %vm204_vm1, %v3471_v11 }
 0x7e0   :  { %2485 = vmatmul.msk.f32.vlgmr.msra.gmra.mxu1 %vm204_vm1, %v3471_v11  ;;  %1673 = vmatpush.msra.mxu3 %v3282_v20 }
 0x7e1   :  { %1717 = vmatpush.msra.mxu0 %v3365_v57  ;;  %1757 = vmatpush.msra.mxu1 %v3371_v28 }
 0x7e2   :  { %1674 = vmatpush.msra.mxu3 %v3288_v22 }
 0x7e3   :  { %1718 = vmatpush.msra.mxu0 %v3377_v54  ;;  %1758 = vmatpush.msra.mxu1 %v3383_v58 }
 0x7e4   :  { %1675 = vmatpush.msra.mxu3 %v3294_v2 }
 0x7e5   :  { %1719 = vmatpush.msra.mxu0 %v3389_v32  ;;  %1759 = vmatpush.msra.mxu1 %v3395_v12 }
 0x7e6   :  { %1676 = vmatpush.msra.mxu3 %v3300_v23 }
 0x7e7   :  { %1720 = vmatpush.msra.mxu0 %v3401_v47  ;;  %1760 = vmatpush.msra.mxu1 %v3407_v10 }
 0x83e   :  { %v1222_v44 = vpop.f32.mrf.mxu0  ;;  %v1262_v19 = vpop.f32.mrf.mxu1 }
 0x83f   :  { %v1225_v27 = vadd.f32 %v1222_v44, %v3105_v13 }
 0x841   :  { %v2477_v43 = vmul.f32 -1.442695, %v1225_v27 }
 0x843   :  { %2628 = vpow2.f32 %v2477_v43 }
 0x845   :  { %v1306_v7 = vpop.f32.mrf.mxu2 }
 0x846   :  { %v1307_v35 = vadd.f32 %v3495_v33, %v1306_v7 }
 0x849   :  { %v2629_v0 = vpop.eup %2628 }
 0x84a   :  { %v1229_v3 = vadd.f32 1.0, %v2629_v0 }
 0x84c   :  { %2630 = vrcp.f32 %v1229_v3  ;;  %v1241_v31 = vand.u32 2147483648, %v1229_v3  ;;  %v1239_v59 = vand.u32 2147483647, %v1229_v3  ;;  %vm1235_vm6 = vweird.f32 %v1229_v3 }
 0x84e   :  { %v1242_v21 = vor.u32 1.1754944e-38, %v1241_v31  ;;  %vm1240_vm8 = vcmp.eq.f32.partialorder %v1239_v59, 8.507059e+37 }
 0x852   :  { %v2631_v15 = vpop.eup %2630 }
 0x853   :  { %v1231_v16 = vmul.f32 %v2631_v15, %v1229_v3  ;;  %vm1236_vm5 = vweird.f32 %v2631_v15 }
 0x854   :  { %vm1237_vm7 = vmor %vm1235_vm6, %vm1236_vm5 }
 0x855   :  { %v1232_v62 = vsub.f32 1.0, %v1231_v16 }
 0x857   :  { %v1233_v6 = vmul.f32 %v2631_v15, %v1232_v62 }
 0x859   :  { %v1234_v30 = vadd.f32 %v2631_v15, %v1233_v6 }
 0x85b   :  { %v1238_v25 = vsel %vm1237_vm7, %v2631_v15, %v1234_v30 }
 0x85c   :  { %v1243_v36 = vsel %vm1240_vm8, %v1242_v21, %v1238_v25 }
 0x85d   :  { %v1309_v44 = vmul.f32 %v1307_v35, %v1243_v36  ;;  %v1428_v27 = vpop.f32.mrf.mxu1 }
 0x85e   :  { %v1429_v43 = vadd.f32 %v3416_v61, %v1428_v27 }
 0x85f   :  { %1311 = vrot.lane.b32.xlu0 %v1309_v44, %s2742_s26 }
 0x860   :  { %1432 = vrot.lane.b32.xlu1 %v1429_v43, %s2740_s2 }
 0x862   :  { %v1344_v0 = vpop.f32.mrf.mxu3 }
 0x863   :  { %1348 = vrot.lane.b32.xlu2 %v1344_v0, %s2740_s2 }
 0x86b   :  { %1266 = vrot.lane.b32.xlu2 %v1262_v19, %s2741_s25 }
 0x8bd   :  { %v1349_v3 = vpop.permute.xlu2 %1348 }
 0x8be   :  { %v1351_v15 = vadd.f32 %v1349_v3, %v3073_v56 }
 0x8c0   :  { %v2482_v16 = vmul.f32 -1.442695, %v1351_v15 }
 0x8c2   :  { %2632 = vpow2.f32 %v2482_v16 }
 0x8c5   :  { %v1267_v15 = vpop.permute.xlu2 %1266 }
 0x8c6   :  { %v1269_v16 = vadd.f32 %v1267_v15, %v3105_v13 }
 0x8c8   :  { %v2633_v62 = vpop.eup %2632 }
 0x8c9   :  { %v1355_v31 = vadd.f32 1.0, %v2633_v62  ;;  %v2479_v62 = vmul.f32 -1.442695, %v1269_v16 }
 0x8cb   :  { %2634 = vrcp.f32 %v1355_v31  ;;  %v1367_v25 = vand.u32 2147483648, %v1355_v31  ;;  %v1365_v36 = vand.u32 2147483647, %v1355_v31  ;;  %vm1361_vm10 = vweird.f32 %v1355_v31 }
 0x8cd   :  { %v1368_v56 = vor.u32 1.1754944e-38, %v1367_v25  ;;  %vm1366_vm12 = vcmp.eq.f32.partialorder %v1365_v36, 8.507059e+37 }
 0x8d1   :  { %v2635_v6 = vpop.eup %2634  ;;  %v1312_v59 = vpop.permute.xlu0 %1311 }
 0x8d2   :  { %v1357_v7 = vmul.f32 %v2635_v6, %v1355_v31  ;;  %v1314_v30 = vadd.f32 %v1312_v59, %v3105_v13  ;;  %vm1362_vm9 = vweird.f32 %v2635_v6  ;;  %v1433_v43 = vpop.permute.xlu1 %1432 }
 0x8d3   :  { %vm1363_vm11 = vmor %vm1361_vm10, %vm1362_vm9 }
 0x8d4   :  { %v1358_v21 = vsub.f32 1.0, %v1357_v7  ;;  %2636 = vtanh.f32 %v1314_v30 }
 0x8d5   :  { %2638 = vpow2.f32 %v2479_v62 }
 0x8d6   :  { %v1359_v35 = vmul.f32 %v2635_v6, %v1358_v21 }
 0x8d8   :  { %v1360_v19 = vadd.f32 %v2635_v6, %v1359_v35 }
 0x8da   :  { %v2637_v44 = vpop.eup %2636  ;;  %v1364_v27 = vsel %vm1363_vm11, %v2635_v6, %v1360_v19 }
 0x8db   :  { %v1369_v0 = vsel %vm1366_vm12, %v1368_v56, %v1364_v27  ;;  %1318 = vrot.lane.b32.xlu1 %v2637_v44, %s2740_s2  ;;  %v2639_v59 = vpop.eup %2638 }
 0x8dc   :  { %v1435_v3 = vmul.f32 %v1433_v43, %v1369_v0  ;;  %v1273_v7 = vadd.f32 1.0, %v2639_v59  ;;  %v1388_v59 = vpop.f32.mrf.mxu0 }
 0x8de   :  { %1437 = vrot.lane.b32.xlu0 %v1435_v3, %s2742_s26  ;;  %2640 = vrcp.f32 %v1273_v7  ;;  %v1285_v35 = vand.u32 2147483648, %v1273_v7  ;;  %vm1279_vm14 = vweird.f32 %v1273_v7  ;;  %v1283_v36 = vand.u32 2147483647, %v1273_v7 }
 0x8e0   :  { %v1286_v56 = vor.u32 1.1754944e-38, %v1285_v35  ;;  %vm1284_vm0 = vcmp.eq.f32.partialorder %v1283_v36, 8.507059e+37 }
 0x8e4   :  { %v2641_v31 = vpop.eup %2640 }
 0x8e5   :  { %v1275_v30 = vmul.f32 %v2641_v31, %v1273_v7  ;;  %vm1280_vm13 = vweird.f32 %v2641_v31  ;;  %v1391_v7 = vadd.f32 %v1388_v59, %v3143_v26 }
 0x8e6   :  { %vm1281_vm15 = vmor %vm1279_vm14, %vm1280_vm13 }
 0x8e7   :  { %v1276_v21 = vsub.f32 1.0, %v1275_v30 }
 0x8e9   :  { %v1277_v6 = vmul.f32 %v2641_v31, %v1276_v21 }
 0x8eb   :  { %v1278_v25 = vadd.f32 %v2641_v31, %v1277_v6 }
 0x8ed   :  { %v1282_v19 = vsel %vm1281_vm15, %v2641_v31, %v1278_v25  ;;  %v2484_v31 = vmul.f32 -1.442695, %v1391_v7 }
 0x8ee   :  { %v1287_v44 = vsel %vm1284_vm0, %v1286_v56, %v1282_v19 }
 0x8ef   :  { %v1316_v13 = vsub.f32 1.0, %v1287_v44  ;;  %v1322_v0 = vmul.f32 %v1287_v44, %v3428_v46 }
 0x94d   :  { %v1319_v27 = vpop.permute.xlu1 %1318 }
 0x94e   :  { %v1321_v43 = vmul.f32 %v1319_v27, %v1316_v13 }
 0x950   :  { %v3509_v3 = vadd.f32 %v1322_v0, %v1321_v43  ;;  %v1438_v15 = vpop.permute.xlu0 %1437 }
 0x951   :  { %v1440_v16 = vadd.f32 %v1438_v15, %v3143_v26 }
 0x952   :  { %1451 = vrot.lane.b32.xlu2 %v3509_v3, %s2740_s2 }
 0x953   :  { %2642 = vtanh.f32 %v1440_v16 }
 0x954   :  { %2644 = vpow2.f32 %v2484_v31 }
 0x959   :  { %v2643_v62 = vpop.eup %2642 }
 0x95a   :  { %1444 = vrot.lane.b32.xlu0 %v2643_v62, %s2740_s2  ;;  %v2645_v30 = vpop.eup %2644 }
 0x95b   :  { %v1395_v21 = vadd.f32 1.0, %v2645_v30 }
 0x95d   :  { %2646 = vrcp.f32 %v1395_v21  ;;  %v1407_v56 = vand.u32 2147483648, %v1395_v21  ;;  %vm1401_vm3 = vweird.f32 %v1395_v21  ;;  %v1405_v44 = vand.u32 2147483647, %v1395_v21 }
 0x95f   :  { %v1408_v27 = vor.u32 1.1754944e-38, %v1407_v56  ;;  %vm1406_vm5 = vcmp.eq.f32.partialorder %v1405_v44, 8.507059e+37 }
 0x963   :  { %v2647_v26 = vpop.eup %2646 }
 0x964   :  { %v1397_v25 = vmul.f32 %v2647_v26, %v1395_v21  ;;  %vm1402_vm2 = vweird.f32 %v2647_v26 }
 0x965   :  { %vm1403_vm4 = vmor %vm1401_vm3, %vm1402_vm2 }
 0x966   :  { %v1398_v35 = vsub.f32 1.0, %v1397_v25 }
 0x968   :  { %v1399_v36 = vmul.f32 %v2647_v26, %v1398_v35 }
 0x96a   :  { %v1400_v19 = vadd.f32 %v2647_v26, %v1399_v36 }
 0x96c   :  { %v1404_v13 = vsel %vm1403_vm4, %v2647_v26, %v1400_v19 }
 0x96d   :  { %v1409_v43 = vsel %vm1406_vm5, %v1408_v27, %v1404_v13 }
 0x96e   :  { %v1442_v0 = vsub.f32 1.0, %v1409_v43  ;;  %v1448_v16 = vmul.f32 %v1409_v43, %v3471_v11 }
 0x9ac   :  { %v3516_v6 = vpop.permute.xlu2 %1451 }
 0x9ad   :  { %2486 = vmatmul.msk.f32.vlgmr.msrb.gmra.mxu2 %vm204_vm1, %v3516_v6  ;;  %2488 = vmatmul.msk.f32.vlgmr.msrb.gmra.mxu3 %vm204_vm1, %v3516_v6 }
 0x9ae   :  { %2490 = vmatmul.msk.f32.vlgmr.msrb.gmra.mxu0 %vm204_vm1, %v3516_v6  ;;  %1801 = vmatpush.msrb.mxu2 %v3309_v4 }
 0x9af   :  { %1839 = vmatpush.msrb.mxu3 %v3315_v24  ;;  %1883 = vmatpush.msrb.mxu0 %v3443_v41 }
 0x9b0   :  { %1802 = vmatpush.msrb.mxu2 %v3322_v5 }
 0x9b1   :  { %1840 = vmatpush.msrb.mxu3 %v3328_v8  ;;  %1884 = vmatpush.msrb.mxu0 %v3451_v18 }
 0x9b2   :  { %1803 = vmatpush.msrb.mxu2 %v3335_v49 }
 0x9b3   :  { %1841 = vmatpush.msrb.mxu3 %v3341_v9  ;;  %1885 = vmatpush.msrb.mxu0 %v3459_v55 }
 0x9b4   :  { %1804 = vmatpush.msrb.mxu2 %v3348_v50 }
 0x9b5   :  { %1842 = vmatpush.msrb.mxu3 %v3358_v29  ;;  %1886 = vmatpush.msrb.mxu0 %v3467_v60 }
 0x9cc   :  { %v1445_v15 = vpop.permute.xlu0 %1444 }
 0x9cd   :  { %v1447_v62 = vmul.f32 %v1445_v15, %v1442_v0 }
 0x9cf   :  { %v3537_v59 = vadd.f32 %v1448_v16, %v1447_v62 }
 0x9d1   :  { %2491 = vmatmul.msk.f32.vlgmr.msrb.gmra.mxu1 %vm204_vm1, %v3537_v59  ;;  %2493 = vmatmul.msk.f32.vlgmr.msra.gmra.mxu2 %vm204_vm1, %v3537_v59 }
 0x9d2   :  { %2495 = vmatmul.msk.f32.vlgmr.msra.gmra.mxu3 %vm204_vm1, %v3537_v59  ;;  %1923 = vmatpush.msrb.mxu1 %v3282_v20 }
 0x9d3   :  { %1967 = vmatpush.msra.mxu2 %v3365_v57  ;;  %2007 = vmatpush.msra.mxu3 %v3371_v28 }
 0x9d4   :  { %1924 = vmatpush.msrb.mxu1 %v3288_v22 }
 0x9d5   :  { %1968 = vmatpush.msra.mxu2 %v3377_v54  ;;  %2008 = vmatpush.msra.mxu3 %v3383_v58 }
 0x9d6   :  { %1925 = vmatpush.msrb.mxu1 %v3294_v2 }
 0x9d7   :  { %1969 = vmatpush.msra.mxu2 %v3389_v32  ;;  %2009 = vmatpush.msra.mxu3 %v3395_v12 }
 0x9d8   :  { %1926 = vmatpush.msrb.mxu1 %v3300_v23 }
 0x9d9   :  { %1970 = vmatpush.msra.mxu2 %v3401_v47  ;;  %2010 = vmatpush.msra.mxu3 %v3407_v10 }
 0xa2b   :  { %v1556_v25 = vpop.f32.mrf.mxu0 }
 0xa2c   :  { %v1557_v10 = vadd.f32 %v3495_v33, %v1556_v25 }
 0xa30   :  { %v1472_v57 = vpop.f32.mrf.mxu2  ;;  %v1512_v36 = vpop.f32.mrf.mxu3 }
 0xa31   :  { %v1475_v28 = vadd.f32 %v1472_v57, %v3117_v37 }
 0xa33   :  { %v2487_v7 = vmul.f32 -1.442695, %v1475_v28 }
 0xa35   :  { %2648 = vpow2.f32 %v2487_v7 }
 0xa3b   :  { %v2649_v54 = vpop.eup %2648 }
 0xa3c   :  { %v1479_v31 = vadd.f32 1.0, %v2649_v54 }
 0xa3e   :  { %2650 = vrcp.f32 %v1479_v31  ;;  %v1491_v32 = vand.u32 2147483648, %v1479_v31  ;;  %v1489_v12 = vand.u32 2147483647, %v1479_v31  ;;  %vm1485_vm7 = vweird.f32 %v1479_v31 }
 0xa40   :  { %v1492_v47 = vor.u32 1.1754944e-38, %v1491_v32  ;;  %vm1490_vm9 = vcmp.eq.f32.partialorder %v1489_v12, 8.507059e+37 }
 0xa44   :  { %v2651_v58 = vpop.eup %2650 }
 0xa45   :  { %v1481_v30 = vmul.f32 %v2651_v58, %v1479_v31  ;;  %vm1486_vm6 = vweird.f32 %v2651_v58 }
 0xa46   :  { %vm1487_vm8 = vmor %vm1485_vm7, %vm1486_vm6 }
 0xa47   :  { %v1482_v21 = vsub.f32 1.0, %v1481_v30 }
 0xa49   :  { %v1483_v26 = vmul.f32 %v2651_v58, %v1482_v21 }
 0xa4b   :  { %v1484_v35 = vadd.f32 %v2651_v58, %v1483_v26 }
 0xa4d   :  { %v1488_v19 = vsel %vm1487_vm8, %v2651_v58, %v1484_v35 }
 0xa4e   :  { %v1594_v56 = vpop.f32.mrf.mxu1  ;;  %v1493_v44 = vsel %vm1490_vm9, %v1492_v47, %v1488_v19 }
 0xa4f   :  { %1598 = vrot.lane.b32.xlu1 %v1594_v56, %s2740_s2  ;;  %v1559_v13 = vmul.f32 %v1557_v10, %v1493_v44 }
 0xa51   :  { %1561 = vrot.lane.b32.xlu0 %v1559_v13, %s2742_s26 }
 0xa55   :  { %v1678_v27 = vpop.f32.mrf.mxu3 }
 0xa56   :  { %v1679_v43 = vadd.f32 %v3416_v61, %v1678_v27 }
 0xa57   :  { %1516 = vrot.lane.b32.xlu1 %v1512_v36, %s2741_s25 }
 0xa58   :  { %1682 = vrot.lane.b32.xlu2 %v1679_v43, %s2740_s2 }
 0xab2   :  { %v1683_v35 = vpop.permute.xlu2 %1682 }
 0xac1   :  { %v1599_v0 = vpop.permute.xlu1 %1598 }
 0xac2   :  { %v1601_v15 = vadd.f32 %v1599_v0, %v3049_v48 }
 0xac3   :  { %v1562_v16 = vpop.permute.xlu0 %1561 }
 0xac4   :  { %v2492_v62 = vmul.f32 -1.442695, %v1601_v15  ;;  %v1564_v57 = vadd.f32 %v1562_v16, %v3117_v37 }
 0xac6   :  { %2652 = vpow2.f32 %v2492_v62 }
 0xac7   :  { %2654 = vtanh.f32 %v1564_v57 }
 0xac9   :  { %v1517_v36 = vpop.permute.xlu1 %1516 }
 0xaca   :  { %v1519_v19 = vadd.f32 %v1517_v36, %v3117_v37 }
 0xacc   :  { %v2653_v28 = vpop.eup %2652  ;;  %v2489_v56 = vmul.f32 -1.442695, %v1519_v19 }
 0xacd   :  { %v2655_v7 = vpop.eup %2654  ;;  %v1605_v54 = vadd.f32 1.0, %v2653_v28 }
 0xace   :  { %1568 = vrot.lane.b32.xlu0 %v2655_v7, %s2740_s2 }
 0xacf   :  { %2656 = vrcp.f32 %v1605_v54  ;;  %v1617_v21 = vand.u32 2147483648, %v1605_v54  ;;  %v1615_v26 = vand.u32 2147483647, %v1605_v54  ;;  %vm1611_vm11 = vweird.f32 %v1605_v54 }
 0xad0   :  { %2658 = vpow2.f32 %v2489_v56 }
 0xad1   :  { %v1618_v12 = vor.u32 1.1754944e-38, %v1617_v21  ;;  %vm1616_vm13 = vcmp.eq.f32.partialorder %v1615_v26, 8.507059e+37 }
 0xad5   :  { %v2657_v31 = vpop.eup %2656 }
 0xad6   :  { %v1607_v58 = vmul.f32 %v2657_v31, %v1605_v54  ;;  %vm1612_vm10 = vweird.f32 %v2657_v31  ;;  %v2659_v44 = vpop.eup %2658 }
 0xad7   :  { %vm1613_vm12 = vmor %vm1611_vm11, %vm1612_vm10  ;;  %v1523_v13 = vadd.f32 1.0, %v2659_v44 }
 0xad8   :  { %v1608_v30 = vsub.f32 1.0, %v1607_v58 }
 0xad9   :  { %2660 = vrcp.f32 %v1523_v13  ;;  %v1535_v62 = vand.u32 2147483648, %v1523_v13  ;;  %vm1529_vm15 = vweird.f32 %v1523_v13  ;;  %v1533_v57 = vand.u32 2147483647, %v1523_v13 }
 0xada   :  { %v1609_v32 = vmul.f32 %v2657_v31, %v1608_v30 }
 0xadb   :  { %v1536_v7 = vor.u32 1.1754944e-38, %v1535_v62  ;;  %vm1534_vm2 = vcmp.eq.f32.partialorder %v1533_v57, 8.507059e+37 }
 0xadc   :  { %v1610_v48 = vadd.f32 %v2657_v31, %v1609_v32 }
 0xade   :  { %v1614_v25 = vsel %vm1613_vm12, %v2657_v31, %v1610_v48 }
 0xadf   :  { %v1619_v47 = vsel %vm1616_vm13, %v1618_v12, %v1614_v25  ;;  %v2661_v27 = vpop.eup %2660  ;;  %v1638_v12 = vpop.f32.mrf.mxu2 }
 0xae0   :  { %v1685_v10 = vmul.f32 %v1683_v35, %v1619_v47  ;;  %v1525_v43 = vmul.f32 %v2661_v27, %v1523_v13  ;;  %vm1530_vm14 = vweird.f32 %v2661_v27  ;;  %v1641_v25 = vadd.f32 %v1638_v12, %v3139_v63 }
 0xae1   :  { %vm1531_vm0 = vmor %vm1529_vm15, %vm1530_vm14 }
 0xae2   :  { %1687 = vrot.lane.b32.xlu2 %v1685_v10, %s2742_s26  ;;  %v1526_v0 = vsub.f32 1.0, %v1525_v43  ;;  %v2494_v35 = vmul.f32 -1.442695, %v1641_v25 }
 0xae4   :  { %v1527_v15 = vmul.f32 %v2661_v27, %v1526_v0 }
 0xae6   :  { %v1528_v16 = vadd.f32 %v2661_v27, %v1527_v15 }
 0xae8   :  { %v1532_v28 = vsel %vm1531_vm0, %v2661_v27, %v1528_v16 }
 0xae9   :  { %v1537_v37 = vsel %vm1534_vm2, %v1536_v7, %v1532_v28 }
 0xaea   :  { %v1566_v58 = vsub.f32 1.0, %v1537_v37  ;;  %v1572_v21 = vmul.f32 %v1537_v37, %v3509_v3 }
 0xb3c   :  { %v1688_v54 = vpop.permute.xlu2 %1687 }
 0xb3d   :  { %v1690_v31 = vadd.f32 %v1688_v54, %v3139_v63 }
 0xb3f   :  { %2662 = vtanh.f32 %v1690_v31 }
 0xb40   :  { %v1569_v30 = vpop.permute.xlu0 %1568  ;;  %2664 = vpow2.f32 %v2494_v35 }
 0xb41   :  { %v1571_v32 = vmul.f32 %v1569_v30, %v1566_v58 }
 0xb43   :  { %v3571_v26 = vadd.f32 %v1572_v21, %v1571_v32 }
 0xb45   :  { %v2663_v48 = vpop.eup %2662  ;;  %1701 = vrot.lane.b32.xlu2 %v3571_v26, %s2740_s2 }
 0xb46   :  { %1694 = vrot.lane.b32.xlu1 %v2663_v48, %s2740_s2  ;;  %v2665_v47 = vpop.eup %2664 }
 0xb47   :  { %v1645_v10 = vadd.f32 1.0, %v2665_v47 }
 0xb49   :  { %2666 = vrcp.f32 %v1645_v10  ;;  %vm1651_vm4 = vweird.f32 %v1645_v10 }
 0xb4f   :  { %v2667_v36 = vpop.eup %2666 }
 0xb50   :  { %v1647_v3 = vmul.f32 %v2667_v36, %v1645_v10  ;;  %vm1652_vm3 = vweird.f32 %v2667_v36 }
 0xb51   :  { %vm1653_vm5 = vmor %vm1651_vm4, %vm1652_vm3 }
 0xb52   :  { %v1648_v63 = vsub.f32 1.0, %v1647_v3 }
 0xb9f   :  { %v1702_v19 = vpop.permute.xlu2 %1701 }
 0xba0   :  { %2496 = vmatmul.msk.f32.vlgmr.msra.gmra.mxu0 %vm204_vm1, %v1702_v19  ;;  %2498 = vmatmul.msk.f32.vlgmr.msra.gmra.mxu1 %vm204_vm1, %v1702_v19 }
 0xba1   :  { %2500 = vmatmul.msk.f32.vlgmr.msrb.gmra.mxu2 %vm204_vm1, %v1702_v19  ;;  %2051 = vmatpush.msra.mxu0 %v3309_v4  ;;  %v1649_v4 = vmul.f32 %v2667_v36, %v1648_v63 }
 0xba2   :  { %2089 = vmatpush.msra.mxu1 %v3315_v24  ;;  %2133 = vmatpush.msrb.mxu2 %v3443_v41 }
 0xba3   :  { %2052 = vmatpush.msra.mxu0 %v3322_v5  ;;  %v1650_v24 = vadd.f32 %v2667_v36, %v1649_v4  ;;  %v1657_v5 = vand.u32 2147483648, %v1645_v10 }
 0xba4   :  { %2090 = vmatpush.msra.mxu1 %v3328_v8  ;;  %2134 = vmatpush.msrb.mxu2 %v3451_v18  ;;  %v1655_v8 = vand.u32 2147483647, %v1645_v10 }
 0xba5   :  { %2053 = vmatpush.msra.mxu0 %v3335_v49  ;;  %v1654_v41 = vsel %vm1653_vm5, %v2667_v36, %v1650_v24  ;;  %v1658_v18 = vor.u32 1.1754944e-38, %v1657_v5 }
 0xba6   :  { %2091 = vmatpush.msra.mxu1 %v3341_v9  ;;  %2135 = vmatpush.msrb.mxu2 %v3459_v55  ;;  %vm1656_vm6 = vcmp.eq.f32.partialorder %v1655_v8, 8.507059e+37 }
 0xba7   :  { %2054 = vmatpush.msra.mxu0 %v3348_v50  ;;  %v1659_v49 = vsel %vm1656_vm6, %v1658_v18, %v1654_v41 }
 0xba8   :  { %2092 = vmatpush.msra.mxu1 %v3358_v29  ;;  %2136 = vmatpush.msrb.mxu2 %v3467_v60  ;;  %v1692_v9 = vsub.f32 1.0, %v1659_v49  ;;  %v1698_v50 = vmul.f32 %v1659_v49, %v3537_v59 }
 0xbb8   :  { %v1695_v56 = vpop.permute.xlu1 %1694 }
 0xbb9   :  { %v1697_v55 = vmul.f32 %v1695_v56, %v1692_v9 }
 0xbbb   :  { %v3593_v44 = vadd.f32 %v1698_v50, %v1697_v55 }
 0xbbd   :  { %2501 = vmatmul.msk.f32.vlgmr.msrb.gmra.mxu3 %vm204_vm1, %v3593_v44  ;;  %2503 = vmatmul.msk.f32.vlgmr.msrb.gmra.mxu0 %vm204_vm1, %v3593_v44 }
 0xbbe   :  { %2505 = vmatmul.msk.f32.vlgmr.msrb.gmra.mxu1 %vm204_vm1, %v3593_v44  ;;  %2173 = vmatpush.msrb.mxu3 %v3282_v20 }
 0xbc0   :  { %2174 = vmatpush.msrb.mxu3 %v3288_v22 }
 0xbc2   :  { %2175 = vmatpush.msrb.mxu3 %v3294_v2 }
 0xbc4   :  { %2176 = vmatpush.msrb.mxu3 %v3300_v23 }
 0xc1d   :  { %v1722_v29 = vpop.f32.mrf.mxu0  ;;  %v1762_v16 = vpop.f32.mrf.mxu1 }
 0xc1e   :  { %v1725_v60 = vadd.f32 %v1722_v29, %v3124_v39 }
 0xc20   :  { %v2497_v13 = vmul.f32 -1.442695, %v1725_v60 }
 0xc22   :  { %2668 = vpow2.f32 %v2497_v13 }
 0xc24   :  { %v1806_v28 = vpop.f32.mrf.mxu2 }
 0xc25   :  { %v1807_v54 = vadd.f32 %v3495_v33, %v1806_v28 }
 0xc28   :  { %v2669_v27 = vpop.eup %2668 }
 0xc29   :  { %v1729_v43 = vadd.f32 1.0, %v2669_v27 }
 0xc2b   :  { %2670 = vrcp.f32 %v1729_v43  ;;  %v1741_v57 = vand.u32 2147483648, %v1729_v43  ;;  %v1739_v22 = vand.u32 2147483647, %v1729_v43  ;;  %vm1735_vm8 = vweird.f32 %v1729_v43 }
 0xc2d   :  { %v1742_v23 = vor.u32 1.1754944e-38, %v1741_v57  ;;  %vm1740_vm10 = vcmp.eq.f32.partialorder %v1739_v22, 8.507059e+37 }
 0xc31   :  { %v2671_v0 = vpop.eup %2670 }
 0xc32   :  { %v1731_v15 = vmul.f32 %v2671_v0, %v1729_v43  ;;  %vm1736_vm7 = vweird.f32 %v2671_v0 }
 0xc33   :  { %vm1737_vm9 = vmor %vm1735_vm8, %vm1736_vm7 }
 0xc34   :  { %v1732_v62 = vsub.f32 1.0, %v1731_v15 }
 0xc36   :  { %v1733_v20 = vmul.f32 %v2671_v0, %v1732_v62 }
 0xc38   :  { %v1734_v2 = vadd.f32 %v2671_v0, %v1733_v20 }
 0xc3a   :  { %v1738_v7 = vsel %vm1737_vm9, %v2671_v0, %v1734_v2 }
 0xc3b   :  { %v1743_v37 = vsel %vm1740_vm10, %v1742_v23, %v1738_v7  ;;  %v1928_v31 = vpop.f32.mrf.mxu1 }
 0xc3c   :  { %v1809_v58 = vmul.f32 %v1807_v54, %v1743_v37  ;;  %v1929_v30 = vadd.f32 %v3416_v61, %v1928_v31  ;;  %v1888_v31 = vpop.f32.mrf.mxu0 }
 0xc3e   :  { %1932 = vrot.lane.b32.xlu2 %v1929_v30, %s2740_s2  ;;  %1811 = vrot.lane.b32.xlu1 %v1809_v58, %s2742_s26  ;;  %v1891_v30 = vadd.f32 %v1888_v31, %v3137_v53 }
 0xc40   :  { %v1844_v21 = vpop.f32.mrf.mxu3 }
 0xc41   :  { %1848 = vrot.lane.b32.xlu0 %v1844_v21, %s2740_s2  ;;  %v2504_v21 = vmul.f32 -1.442695, %v1891_v30 }
 0xc49   :  { %1766 = vrot.lane.b32.xlu0 %v1762_v16, %s2741_s25 }
 0xc98   :  { %v1933_v41 = vpop.permute.xlu2 %1932 }
 0xcb0   :  { %v1812_v32 = vpop.permute.xlu1 %1811 }
 0xcb1   :  { %v1814_v48 = vadd.f32 %v1812_v32, %v3124_v39 }
 0xcb3   :  { %2672 = vtanh.f32 %v1814_v48  ;;  %v1849_v12 = vpop.permute.xlu0 %1848 }
 0xcb4   :  { %v1851_v25 = vadd.f32 %v1849_v12, %v3034_v42 }
 0xcb6   :  { %v2502_v35 = vmul.f32 -1.442695, %v1851_v25 }
 0xcb8   :  { %2674 = vpow2.f32 %v2502_v35 }
 0xcb9   :  { %v2673_v47 = vpop.eup %2672 }
 0xcba   :  { %1818 = vrot.lane.b32.xlu2 %v2673_v47, %s2740_s2 }
 0xcbb   :  { %v1767_v9 = vpop.permute.xlu0 %1766 }
 0xcbc   :  { %v1769_v56 = vadd.f32 %v1767_v9, %v3124_v39 }
 0xcbe   :  { %v2675_v61 = vpop.eup %2674  ;;  %v2499_v55 = vmul.f32 -1.442695, %v1769_v56 }
 0xcbf   :  { %v1855_v10 = vadd.f32 1.0, %v2675_v61 }
 0xcc1   :  { %2676 = vrcp.f32 %v1855_v10  ;;  %v1867_v63 = vand.u32 2147483648, %v1855_v10  ;;  %v1865_v24 = vand.u32 2147483647, %v1855_v10  ;;  %vm1861_vm12 = vweird.f32 %v1855_v10 }
 0xcc2   :  { %2678 = vpow2.f32 %v2499_v55 }
 0xcc3   :  { %v1868_v8 = vor.u32 1.1754944e-38, %v1867_v63  ;;  %vm1866_vm14 = vcmp.eq.f32.partialorder %v1865_v24, 8.507059e+37 }
 0xcc7   :  { %v2677_v36 = vpop.eup %2676 }
 0xcc8   :  { %v1857_v19 = vmul.f32 %v2677_v36, %v1855_v10  ;;  %vm1862_vm11 = vweird.f32 %v2677_v36  ;;  %v2679_v50 = vpop.eup %2678 }
 0xcc9   :  { %vm1863_vm13 = vmor %vm1861_vm12, %vm1862_vm11  ;;  %v1773_v29 = vadd.f32 1.0, %v2679_v50 }
 0xcca   :  { %v1858_v3 = vsub.f32 1.0, %v1857_v19 }
 0xccb   :  { %2680 = vrcp.f32 %v1773_v29  ;;  %v1785_v15 = vand.u32 2147483648, %v1773_v29  ;;  %vm1779_vm0 = vweird.f32 %v1773_v29  ;;  %v1783_v16 = vand.u32 2147483647, %v1773_v29 }
 0xccc   :  { %v1859_v4 = vmul.f32 %v2677_v36, %v1858_v3 }
 0xccd   :  { %v1786_v57 = vor.u32 1.1754944e-38, %v1785_v15  ;;  %vm1784_vm3 = vcmp.eq.f32.partialorder %v1783_v16, 8.507059e+37 }
 0xcce   :  { %v1860_v5 = vadd.f32 %v2677_v36, %v1859_v4 }
 0xcd0   :  { %v1864_v42 = vsel %vm1863_vm13, %v2677_v36, %v1860_v5 }
 0xcd1   :  { %v1869_v18 = vsel %vm1866_vm14, %v1868_v8, %v1864_v42  ;;  %v2681_v60 = vpop.eup %2680 }
 0xcd2   :  { %v1935_v49 = vmul.f32 %v1933_v41, %v1869_v18  ;;  %v1775_v13 = vmul.f32 %v2681_v60, %v1773_v29  ;;  %vm1780_vm15 = vweird.f32 %v2681_v60 }
 0xcd3   :  { %vm1781_vm2 = vmor %vm1779_vm0, %vm1780_vm15 }
 0xcd4   :  { %1937 = vrot.lane.b32.xlu1 %v1935_v49, %s2742_s26  ;;  %v1776_v27 = vsub.f32 1.0, %v1775_v13 }
 0xcd6   :  { %v1777_v43 = vmul.f32 %v2681_v60, %v1776_v27 }
 0xcd8   :  { %v1778_v0 = vadd.f32 %v2681_v60, %v1777_v43 }
 0xcda   :  { %v1782_v62 = vsel %vm1781_vm2, %v2681_v60, %v1778_v0 }
 0xcdb   :  { %v1787_v20 = vsel %vm1784_vm3, %v1786_v57, %v1782_v62 }
 0xcdc   :  { %v1816_v39 = vsub.f32 1.0, %v1787_v20  ;;  %v1822_v2 = vmul.f32 %v1787_v20, %v3571_v26 }
 0xd14   :  { %v1819_v22 = vpop.permute.xlu2 %1818 }
 0xd15   :  { %v1821_v28 = vmul.f32 %v1819_v22, %v1816_v39 }
 0xd17   :  { %v3618_v23 = vadd.f32 %v1822_v2, %v1821_v28  ;;  %v2738_v28 = vld [vmem:[%s3895_s10] ss:$0 sm:$0xff] }
 0xd19   :  { %1951 = vrot.lane.b32.xlu0 %v3618_v23, %s2740_s2 }
 0xd46   :  { %v1938_v7 = vpop.permute.xlu1 %1937 }
 0xd47   :  { %v1940_v54 = vadd.f32 %v1938_v7, %v3137_v53 }
 0xd49   :  { %2682 = vtanh.f32 %v1940_v54 }
 0xd4a   :  { %2684 = vpow2.f32 %v2504_v21 }
 0xd4f   :  { %v2683_v37 = vpop.eup %2682 }
 0xd50   :  { %1944 = vrot.lane.b32.xlu1 %v2683_v37, %s2740_s2  ;;  %v2685_v32 = vpop.eup %2684 }
 0xd51   :  { %v1895_v48 = vadd.f32 1.0, %v2685_v32 }
 0xd53   :  { %2686 = vrcp.f32 %v1895_v48  ;;  %v1907_v10 = vand.u32 2147483648, %v1895_v48  ;;  %vm1901_vm5 = vweird.f32 %v1895_v48  ;;  %v1905_v36 = vand.u32 2147483647, %v1895_v48 }
 0xd55   :  { %v1908_v3 = vor.u32 1.1754944e-38, %v1907_v10  ;;  %vm1906_vm7 = vcmp.eq.f32.partialorder %v1905_v36, 8.507059e+37 }
 0xd59   :  { %v2687_v12 = vpop.eup %2686 }
 0xd5a   :  { %v1897_v25 = vmul.f32 %v2687_v12, %v1895_v48  ;;  %vm1902_vm4 = vweird.f32 %v2687_v12 }
 0xd5b   :  { %vm1903_vm6 = vmor %vm1901_vm5, %vm1902_vm4 }
 0xd5c   :  { %v1898_v35 = vsub.f32 1.0, %v1897_v25 }
 0xd5e   :  { %v1899_v47 = vmul.f32 %v2687_v12, %v1898_v35 }
 0xd60   :  { %v1900_v61 = vadd.f32 %v2687_v12, %v1899_v47 }
 0xd62   :  { %v1904_v19 = vsel %vm1903_vm6, %v2687_v12, %v1900_v61 }
 0xd63   :  { %v1909_v53 = vsel %vm1906_vm7, %v1908_v3, %v1904_v19 }
 0xd64   :  { %v1942_v63 = vsub.f32 1.0, %v1909_v53  ;;  %v1948_v24 = vmul.f32 %v1909_v53, %v3593_v44  ;;  %v2520_v53 = vpack.i.bf16 %v3618_v23, %v3267_v14 }
 0xd8b   :  { %v1952_v58 = vpop.permute.xlu0 %1951 }
 0xd8c   :  { %2506 = vmatmul.msk.f32.vlgmr.msra.gmra.mxu2 %vm204_vm1, %v1952_v58  ;;  %2508 = vmatmul.msk.f32.vlgmr.msra.gmra.mxu3 %vm204_vm1, %v1952_v58 }
 0xd8d   :  { %2510 = vmatmul.msk.f32.vlgmr.msra.gmra.mxu0 %vm204_vm1, %v1952_v58 }
 0xdc2   :  { %v1945_v4 = vpop.permute.xlu1 %1944 }
 0xdc3   :  { %v1947_v5 = vmul.f32 %v1945_v4, %v1942_v63  ;;  %v2530_v63 = vpack.i.bf16 %v3231_v45, %v3593_v44 }
 0xdc5   :  { %v3629_v8 = vadd.f32 %v1948_v24, %v1947_v5 }
 0xdc7   :  { %2511 = vmatmul.msk.f32.vlgmr.msra.gmra.mxu1 %vm204_vm1, %v3629_v8  ;;  %2513 = vmatmul.msk.f32.vlgmr.msrb.gmra.mxu2 %vm204_vm1, %v3629_v8 }
 0xdc8   :  { %2515 = vmatmul.msk.f32.vlgmr.msrb.gmra.mxu3 %vm204_vm1, %v3629_v8 }
 0xe0a   :  { %v2056_v27 = vpop.f32.mrf.mxu0 }
 0xe0b   :  { %v2057_v15 = vadd.f32 %v3495_v33, %v2056_v27 }
 0xe0f   :  { %v1972_v42 = vpop.f32.mrf.mxu2  ;;  %v2012_v20 = vpop.f32.mrf.mxu3 }
 0xe10   :  { %v1975_v41 = vadd.f32 %v1972_v42, %v3131_v40 }
 0xe12   :  { %v2507_v18 = vmul.f32 -1.442695, %v1975_v41 }
 0xe14   :  { %2688 = vpow2.f32 %v2507_v18 }
 0xe1a   :  { %v2689_v49 = vpop.eup %2688 }
 0xe1b   :  { %v1979_v9 = vadd.f32 1.0, %v2689_v49 }
 0xe1d   :  { %2690 = vrcp.f32 %v1979_v9  ;;  %v1991_v29 = vand.u32 2147483648, %v1979_v9  ;;  %v1989_v13 = vand.u32 2147483647, %v1979_v9  ;;  %vm1985_vm9 = vweird.f32 %v1979_v9 }
 0xe1f   :  { %v1992_v0 = vor.u32 1.1754944e-38, %v1991_v29  ;;  %vm1990_vm11 = vcmp.eq.f32.partialorder %v1989_v13, 8.507059e+37 }
 0xe23   :  { %v2691_v56 = vpop.eup %2690 }
 0xe24   :  { %v1981_v55 = vmul.f32 %v2691_v56, %v1979_v9  ;;  %vm1986_vm8 = vweird.f32 %v2691_v56 }
 0xe25   :  { %vm1987_vm10 = vmor %vm1985_vm9, %vm1986_vm8  ;;  %vm2216_vm8 = vcmask 523264   ;;  %vm2218_vm9 = vcmask 785408  }
 0xe26   :  { %v1982_v50 = vsub.f32 1.0, %v1981_v55 }
 0xe28   :  { %v1983_v60 = vmul.f32 %v2691_v56, %v1982_v50 }
 0xe2a   :  { %v1984_v43 = vadd.f32 %v2691_v56, %v1983_v60 }
 0xe2c   :  { %v1988_v16 = vsel %vm1987_vm10, %v2691_v56, %v1984_v43 }
 0xe2d   :  { %v1993_v62 = vsel %vm1990_vm11, %v1992_v0, %v1988_v16  ;;  %v2278_v16 = vld [vmem:[%s3899_s11 + $0xf8] sm:$0xff] }
 0xe2e   :  { %v2059_v57 = vmul.f32 %v2057_v15, %v1993_v62  ;;  %v2262_v15 = vld [vmem:[%s3899_s11 + $0x78] sm:$0xff]  ;;  %v2261_v62 = vld [vmem:[%s3899_s11 + $0x70] sm:$0xff]  ;;  %2371 = vmatpush.msra.mxu3 %v2278_v16 }
 0xe2f   :  { %2351 = vmatpush.msra.mxu2 %v2262_v15  ;;  %v2285_v15 = vld [vmem:[%s3900_s12 + $0x30] sm:$0xff] }
 0xe30   :  { %2061 = vrot.lane.b32.xlu1 %v2059_v57, %s2742_s26  ;;  %v2276_v57 = vld [vmem:[%s3899_s11 + $0xe8] sm:$0xff]  ;;  %v2301_v16 = vld [vmem:[%s3900_s12 + $0xb0] sm:$0xff] }
 0xe31   :  { %2352 = vmatpush.msra.mxu2 %v2261_v62  ;;  %v2247_v62 = vld [vmem:[%s3899_s11] sm:$0xff] }
 0xe44   :  { %v2094_v39 = vpop.f32.mrf.mxu1 }
 0xe45   :  { %2098 = vrot.lane.b32.xlu2 %v2094_v39, %s2740_s2  ;;  %v2259_v39 = vld [vmem:[%s3899_s11 + $0x60] sm:$0xff] }
 0xe4b   :  { %v2178_v22 = vpop.f32.mrf.mxu3 }
 0xe4c   :  { %v2179_v2 = vadd.f32 %v2738_v28, %v2178_v22  ;;  %v2275_v22 = vld [vmem:[%s3899_s11 + $0xe0] sm:$0xff]  ;;  %v2294_v28 = vld [vmem:[%s3900_s12 + $0x78] sm:$0xff] }
 0xe4d   :  { %2016 = vrot.lane.b32.xlu2 %v2012_v20, %s2741_s25  ;;  %v2540_v20 = vpack.i.bf16 %v3170_v52, %v3537_v59  ;;  %v2293_v52 = vld [vmem:[%s3900_s12 + $0x70] sm:$0xff]  ;;  %v2258_v59 = vld [vmem:[%s3899_s11 + $0x58] sm:$0xff]  ;;  %2311 = vmatpush.msrb.mxu0 %v2294_v28 }
 0xe4e   :  { %2182 = vrot.lane.b32.xlu0 %v2179_v2, %s2740_s2  ;;  %v2310_v2 = vld [vmem:[%s3900_s12 + $0xf8] sm:$0xff] }
 0xe4f   :  { %2331 = vmatpush.msrb.mxu1 %v2310_v2  ;;  %2312 = vmatpush.msrb.mxu0 %v2293_v52  ;;  %v2298_v28 = vld [vmem:[%s3900_s12 + $0x98] sm:$0xff]  ;;  %v2281_v2 = vld [vmem:[%s3900_s12 + $0x10] sm:$0xff] }
 0xe50   :  { %v2297_v52 = vld [vmem:[%s3900_s12 + $0x90] sm:$0xff] }
 0xe9f   :  { %v2099_v33 = vpop.permute.xlu2 %2098 }
 0xea0   :  { %v2101_v7 = vadd.f32 %v2099_v33, %v3022_v34  ;;  %v2274_v33 = vld [vmem:[%s3899_s11 + $0xd8] sm:$0xff] }
 0xea2   :  { %v2512_v54 = vmul.f32 -1.442695, %v2101_v7  ;;  %v2062_v37 = vpop.permute.xlu1 %2061  ;;  %v2309_v7 = vld [vmem:[%s3900_s12 + $0xf0] sm:$0xff] }
 0xea3   :  { %v2064_v31 = vadd.f32 %v2062_v37, %v3131_v40  ;;  %v2257_v37 = vld [vmem:[%s3899_s11 + $0x50] sm:$0xff]  ;;  %2332 = vmatpush.msrb.mxu1 %v2309_v7  ;;  %v2296_v7 = vld [vmem:[%s3900_s12 + $0x88] sm:$0xff] }
 0xea4   :  { %2692 = vpow2.f32 %v2512_v54  ;;  %v2292_v54 = vld [vmem:[%s3900_s12 + $0x68] sm:$0xff] }
 0xea5   :  { %2694 = vtanh.f32 %v2064_v31  ;;  %v2273_v31 = vld [vmem:[%s3899_s11 + $0xd0] sm:$0xff]  ;;  %2313 = vmatpush.msrb.mxu0 %v2292_v54  ;;  %v2279_v54 = vld [vmem:[%s3900_s12] sm:$0xff] }
 0xea7   :  { %v2017_v4 = vpop.permute.xlu2 %2016 }
 0xea8   :  { %v2019_v24 = vadd.f32 %v2017_v4, %v3131_v40  ;;  %v2269_v4 = vld [vmem:[%s3899_s11 + $0xb0] sm:$0xff] }
 0xeaa   :  { %v2693_v58 = vpop.eup %2692  ;;  %v2509_v5 = vmul.f32 -1.442695, %v2019_v24  ;;  %v2304_v24 = vld [vmem:[%s3900_s12 + $0xc8] sm:$0xff] }
 0xeab   :  { %v2695_v30 = vpop.eup %2694  ;;  %v2105_v21 = vadd.f32 1.0, %v2693_v58  ;;  %v2308_v58 = vld [vmem:[%s3900_s12 + $0xe8] sm:$0xff] }
 0xeac   :  { %2068 = vrot.lane.b32.xlu1 %v2695_v30, %s2740_s2  ;;  %v2291_v30 = vld [vmem:[%s3900_s12 + $0x60] sm:$0xff]  ;;  %2333 = vmatpush.msrb.mxu1 %v2308_v58 }
 0xead   :  { %2696 = vrcp.f32 %v2105_v21  ;;  %v2117_v47 = vand.u32 2147483648, %v2105_v21  ;;  %vm2111_vm13 = vweird.f32 %v2105_v21  ;;  %v2115_v34 = vand.u32 2147483647, %v2105_v21  ;;  %2314 = vmatpush.msrb.mxu0 %v2291_v30 }
 0xeae   :  { %2698 = vpow2.f32 %v2509_v5  ;;  %v2287_v5 = vld [vmem:[%s3900_s12 + $0x40] sm:$0xff] }
 0xeaf   :  { %v2118_v10 = vor.u32 1.1754944e-38, %v2117_v47  ;;  %vm2116_vm15 = vcmp.eq.f32.partialorder %v2115_v34, 8.507059e+37  ;;  %v2306_v47 = vld [vmem:[%s3900_s12 + $0xd8] sm:$0xff]  ;;  %v2289_v34 = vld [vmem:[%s3900_s12 + $0x50] sm:$0xff] }
 0xeb3   :  { %v2697_v32 = vpop.eup %2696 }
 0xeb4   :  { %v2107_v48 = vmul.f32 %v2697_v32, %v2105_v21  ;;  %vm2112_vm12 = vweird.f32 %v2697_v32  ;;  %v2699_v42 = vpop.eup %2698  ;;  %v2256_v21 = vld [vmem:[%s3899_s11 + $0x48] sm:$0xff] }
 0xeb5   :  { %vm2113_vm14 = vmor %vm2111_vm13, %vm2112_vm12  ;;  %v2023_v41 = vadd.f32 1.0, %v2699_v42  ;;  %v2252_v42 = vld [vmem:[%s3899_s11 + $0x28] sm:$0xff] }
 0xeb6   :  { %v2108_v12 = vsub.f32 1.0, %v2107_v48  ;;  %v2307_v48 = vld [vmem:[%s3900_s12 + $0xe0] sm:$0xff] }
 0xeb7   :  { %2700 = vrcp.f32 %v2023_v41  ;;  %v2035_v55 = vand.u32 2147483648, %v2023_v41  ;;  %vm2029_vm2 = vweird.f32 %v2023_v41  ;;  %v2033_v50 = vand.u32 2147483647, %v2023_v41  ;;  %2334 = vmatpush.msrb.mxu1 %v2307_v48 }
 0xeb8   :  { %v2109_v25 = vmul.f32 %v2697_v32, %v2108_v12  ;;  %v2290_v12 = vld [vmem:[%s3900_s12 + $0x58] sm:$0xff] }
 0xeb9   :  { %v2036_v44 = vor.u32 1.1754944e-38, %v2035_v55  ;;  %vm2034_vm4 = vcmp.eq.f32.partialorder %v2033_v50, 8.507059e+37  ;;  %2315 = vmatpush.msrb.mxu0 %v2290_v12  ;;  %2335 = vmatpush.msrb.mxu1 %v2306_v47  ;;  %v2249_v50 = vld [vmem:[%s3899_s11 + $0x10] sm:$0xff] }
 0xeba   :  { %v2110_v35 = vadd.f32 %v2697_v32, %v2109_v25  ;;  %v2255_v25 = vld [vmem:[%s3899_s11 + $0x40] sm:$0xff] }
 0xebb   :  { %2316 = vmatpush.msrb.mxu0 %v2289_v34  ;;  %v2215_v34 = vsel %vm204_vm1, %v3158_v38, %v3213_v17 }
 0xebc   :  { %v2114_v61 = vsel %vm2113_vm14, %v2697_v32, %v2110_v35  ;;  %v2272_v32 = vld [vmem:[%s3899_s11 + $0xc8] sm:$0xff]  ;;  %v2271_v35 = vld [vmem:[%s3899_s11 + $0xc0] sm:$0xff] }
 0xebd   :  { %v2119_v36 = vsel %vm2116_vm15, %v2118_v10, %v2114_v61  ;;  %v2701_v18 = vpop.eup %2700  ;;  %v2254_v10 = vld [vmem:[%s3899_s11 + $0x38] sm:$0xff] }
 0xebe   :  { %v2025_v49 = vmul.f32 %v2701_v18, %v2023_v41  ;;  %vm2030_vm0 = vweird.f32 %v2701_v18  ;;  %v2268_v41 = vld [vmem:[%s3899_s11 + $0xa8] sm:$0xff] }
 0xebf   :  { %vm2031_vm3 = vmor %vm2029_vm2, %vm2030_vm0 }
 0xec0   :  { %v2183_v19 = vpop.permute.xlu0 %2182  ;;  %v2026_v9 = vsub.f32 1.0, %v2025_v49  ;;  %v2251_v49 = vld [vmem:[%s3899_s11 + $0x20] sm:$0xff] }
 0xec1   :  { %v2185_v3 = vmul.f32 %v2183_v19, %v2119_v36  ;;  %v2270_v36 = vld [vmem:[%s3899_s11 + $0xb8] sm:$0xff] }
 0xec2   :  { %v2027_v56 = vmul.f32 %v2701_v18, %v2026_v9  ;;  %v2267_v9 = vld [vmem:[%s3899_s11 + $0xa0] sm:$0xff] }
 0xec3   :  { %2187 = vrot.lane.b32.xlu0 %v2185_v3, %s2742_s26  ;;  %v2305_v3 = vld [vmem:[%s3900_s12 + $0xd0] sm:$0xff] }
 0xec4   :  { %v2028_v14 = vadd.f32 %v2701_v18, %v2027_v56  ;;  %2336 = vmatpush.msrb.mxu1 %v2305_v3  ;;  %v2250_v56 = vld [vmem:[%s3899_s11 + $0x18] sm:$0xff] }
 0xec6   :  { %v2032_v45 = vsel %vm2031_vm3, %v2701_v18, %v2028_v14  ;;  %v2303_v18 = vld [vmem:[%s3900_s12 + $0xc0] sm:$0xff]  ;;  %2337 = vmatpush.msrb.mxu1 %v2304_v24  ;;  %v2266_v14 = vld [vmem:[%s3899_s11 + $0x98] sm:$0xff] }
 0xec7   :  { %v2037_v29 = vsel %vm2034_vm4, %v2036_v44, %v2032_v45  ;;  %v2265_v45 = vld [vmem:[%s3899_s11 + $0x90] sm:$0xff]  ;;  %v2525_v44 = vpack.i.bf16 %v3275_v1, %v3629_v8  ;;  %v2248_v1 = vld [vmem:[%s3899_s11 + $0x8] sm:$0xff] }
 0xec8   :  { %v2066_v40 = vsub.f32 1.0, %v2037_v29  ;;  %v2072_v13 = vmul.f32 %v2037_v29, %v3618_v23  ;;  %v2260_v23 = vld [vmem:[%s3899_s11 + $0x68] sm:$0xff]  ;;  %2338 = vmatpush.msrb.mxu1 %v2303_v18  ;;  %v2138_v29 = vpop.f32.mrf.mxu2 }
 0xec9   :  { %2353 = vmatpush.msra.mxu2 %v2260_v23  ;;  %v2284_v23 = vld [vmem:[%s3900_s12 + $0x28] sm:$0xff] }
 0xecb   :  { %2521 = vrot.lane.b32.xlu0 %v2520_v53, %s2741_s25  ;;  %2354 = vmatpush.msra.mxu2 %v2259_v39  ;;  %v2288_v53 = vld [vmem:[%s3900_s12 + $0x48] sm:$0xff]  ;;  %v2299_v39 = vld [vmem:[%s3900_s12 + $0xa0] sm:$0xff] }
 0xecc   :  { %2317 = vmatpush.msrb.mxu0 %v2288_v53 }
 0xecd   :  { %2355 = vmatpush.msra.mxu2 %v2258_v59 }
 0xece   :  { %2318 = vmatpush.msrb.mxu0 %v2287_v5 }
 0xecf   :  { %2356 = vmatpush.msra.mxu2 %v2257_v37  ;;  %v2295_v37 = vld [vmem:[%s3900_s12 + $0x80] sm:$0xff] }
 0xed1   :  { %2357 = vmatpush.msra.mxu2 %v2256_v21 }
 0xed3   :  { %2531 = vrot.lane.b32.xlu0 %v2530_v63, %s2742_s26  ;;  %2358 = vmatpush.msra.mxu2 %v2255_v25  ;;  %v2253_v63 = vld [vmem:[%s3899_s11 + $0x30] sm:$0xff] }
 0xed5   :  { %2359 = vmatpush.msra.mxu2 %v2254_v10 }
 0xed7   :  { %2360 = vmatpush.msra.mxu2 %v2253_v63 }
 0xed9   :  { %2361 = vmatpush.msra.mxu2 %v2252_v42 }
 0xedb   :  { %2362 = vmatpush.msra.mxu2 %v2251_v49 }
 0xedd   :  { %2363 = vmatpush.msra.mxu2 %v2250_v56 }
 0xedf   :  { %2364 = vmatpush.msra.mxu2 %v2249_v50 }
 0xee1   :  { %2365 = vmatpush.msra.mxu2 %v2248_v1 }
 0xee3   :  { %2366 = vmatpush.msra.mxu2 %v2247_v62 }
 0xf1e   :  { %v2069_v60 = vpop.permute.xlu1 %2068 }
 0xf1f   :  { %v2071_v27 = vmul.f32 %v2069_v60, %v2066_v40  ;;  %v2141_v40 = vadd.f32 %v2138_v29, %v3135_v51 }
 0xf21   :  { %v2073_v43 = vadd.f32 %v2072_v13, %v2071_v27  ;;  %v2514_v60 = vmul.f32 -1.442695, %v2141_v40  ;;  %v2286_v27 = vld [vmem:[%s3900_s12 + $0x38] sm:$0xff] }
 0xf22   :  { %2319 = vmatpush.msrb.mxu0 %v2286_v27 }
 0xf23   :  { %v2535_v0 = vpack.i.bf16 %v2073_v43, %v3428_v46  ;;  %v2277_v46 = vld [vmem:[%s3899_s11 + $0xf0] sm:$0xff]  ;;  %v2302_v43 = vld [vmem:[%s3900_s12 + $0xb8] sm:$0xff] }
 0xf24   :  { %2372 = vmatpush.msra.mxu3 %v2277_v46  ;;  %2339 = vmatpush.msrb.mxu1 %v2302_v43  ;;  %v2263_v46 = vld [vmem:[%s3899_s11 + $0x80] sm:$0xff] }
 0xf25   :  { %2536 = vrot.lane.b32.xlu1 %v2535_v0, %s2742_s26  ;;  %2320 = vmatpush.msrb.mxu0 %v2285_v15 }
 0xf26   :  { %2373 = vmatpush.msra.mxu3 %v2276_v57  ;;  %2340 = vmatpush.msrb.mxu1 %v2301_v16  ;;  %v2300_v57 = vld [vmem:[%s3900_s12 + $0xa8] sm:$0xff] }
 0xf27   :  { %2321 = vmatpush.msrb.mxu0 %v2284_v23 }
 0xf28   :  { %2374 = vmatpush.msra.mxu3 %v2275_v22  ;;  %2341 = vmatpush.msrb.mxu1 %v2300_v57  ;;  %v2282_v22 = vld [vmem:[%s3900_s12 + $0x18] sm:$0xff] }
 0xf2a   :  { %2375 = vmatpush.msra.mxu3 %v2274_v33  ;;  %2342 = vmatpush.msrb.mxu1 %v2299_v39  ;;  %v2280_v33 = vld [vmem:[%s3900_s12 + $0x8] sm:$0xff] }
 0xf2c   :  { %2376 = vmatpush.msra.mxu3 %v2273_v31  ;;  %2343 = vmatpush.msrb.mxu1 %v2298_v28 }
 0xf2d   :  { %2541 = vrot.lane.b32.xlu1 %v2540_v20, %s2740_s2  ;;  %v2283_v20 = vld [vmem:[%s3900_s12 + $0x20] sm:$0xff] }
 0xf2e   :  { %2377 = vmatpush.msra.mxu3 %v2272_v32  ;;  %2322 = vmatpush.msrb.mxu0 %v2283_v20 }
 0xf2f   :  { %2344 = vmatpush.msrb.mxu1 %v2297_v52 }
 0xf30   :  { %2378 = vmatpush.msra.mxu3 %v2271_v35  ;;  %2323 = vmatpush.msrb.mxu0 %v2282_v22 }
 0xf31   :  { %2345 = vmatpush.msrb.mxu1 %v2296_v7 }
 0xf32   :  { %2379 = vmatpush.msra.mxu3 %v2270_v36  ;;  %2324 = vmatpush.msrb.mxu0 %v2281_v2  ;;  %v2220_v36 = vsel %vm204_vm1, %v3516_v6, %v3571_v26 }
 0xf33   :  { %2346 = vmatpush.msrb.mxu1 %v2295_v37 }
 0xf34   :  { %2380 = vmatpush.msra.mxu3 %v2269_v4  ;;  %2325 = vmatpush.msrb.mxu0 %v2280_v33 }
 0xf35   :  { %v2188_v61 = vpop.permute.xlu0 %2187 }
 0xf36   :  { %v2190_v19 = vadd.f32 %v2188_v61, %v3135_v51  ;;  %2381 = vmatpush.msra.mxu3 %v2268_v41  ;;  %v2264_v51 = vld [vmem:[%s3899_s11 + $0x88] sm:$0xff]  ;;  %2326 = vmatpush.msrb.mxu0 %v2279_v54 }
 0xf38   :  { %2702 = vtanh.f32 %v2190_v19  ;;  %2382 = vmatpush.msra.mxu3 %v2267_v9 }
 0xf39   :  { %2704 = vpow2.f32 %v2514_v60 }
 0xf3a   :  { %2383 = vmatpush.msra.mxu3 %v2266_v14 }
 0xf3c   :  { %2384 = vmatpush.msra.mxu3 %v2265_v45 }
 0xf3d   :  { %v2522_v21 = vpop.permute.xlu0 %2521 }
 0xf3e   :  { %v2703_v55 = vpop.eup %2702  ;;  %2385 = vmatpush.msra.mxu3 %v2264_v51  ;;  %v2524_v25 = vunpack.i.h.bf16 %v2522_v21  ;;  %v2523_v35 = vunpack.i.l.bf16 %v2522_v21 }
 0xf3f   :  { %2194 = vrot.lane.b32.xlu2 %v2703_v55, %s2740_s2  ;;  %v2705_v13 = vpop.eup %2704 }
 0xf40   :  { %v2145_v0 = vadd.f32 1.0, %v2705_v13  ;;  %2386 = vmatpush.msra.mxu3 %v2263_v46  ;;  %v2217_v4 = vsel %vm2216_vm8, %v2215_v34, %v2523_v35  ;;  %v2221_v24 = vsel %vm2216_vm8, %v2220_v36, %v2524_v25 }
 0xf42   :  { %2706 = vrcp.f32 %v2145_v0  ;;  %v2157_v48 = vand.u32 2147483648, %v2145_v0  ;;  %vm2151_vm6 = vweird.f32 %v2145_v0  ;;  %v2155_v12 = vand.u32 2147483647, %v2145_v0 }
 0xf44   :  { %v2158_v10 = vor.u32 1.1754944e-38, %v2157_v48  ;;  %vm2156_vm10 = vcmp.eq.f32.partialorder %v2155_v12, 8.507059e+37 }
 0xf45   :  { %v2532_v41 = vpop.permute.xlu0 %2531 }
 0xf46   :  { %v2534_v14 = vunpack.i.h.bf16 %v2532_v41  ;;  %v2533_v55 = vunpack.i.l.bf16 %v2532_v41 }
 0xf47   :  { %2526 = vrot.lane.b32.xlu2 %v2525_v44, %s2741_s25 }
 0xf48   :  { %v2707_v59 = vpop.eup %2706 }
 0xf49   :  { %v2147_v31 = vmul.f32 %v2707_v59, %v2145_v0  ;;  %vm2152_vm5 = vweird.f32 %v2707_v59 }
 0xf4a   :  { %vm2153_vm7 = vmor %vm2151_vm6, %vm2152_vm5 }
 0xf4b   :  { %v2148_v58 = vsub.f32 1.0, %v2147_v31 }
 0xf4d   :  { %v2149_v30 = vmul.f32 %v2707_v59, %v2148_v58 }
 0xf4f   :  { %v2150_v32 = vadd.f32 %v2707_v59, %v2149_v30 }
 0xf51   :  { %v2154_v47 = vsel %vm2153_vm7, %v2707_v59, %v2150_v32 }
 0xf52   :  { %v2159_v63 = vsel %vm2156_vm10, %v2158_v10, %v2154_v47 }
 0xf53   :  { %v2192_v17 = vsub.f32 1.0, %v2159_v63  ;;  %v2198_v6 = vmul.f32 %v2159_v63, %v3629_v8 }
 0xf97   :  { %v2537_v61 = vpop.permute.xlu1 %2536 }
 0xf98   :  { %v2539_v19 = vunpack.i.h.bf16 %v2537_v61  ;;  %v2538_v3 = vunpack.i.l.bf16 %v2537_v61 }
 0xf99   :  { %v2195_v53 = vpop.permute.xlu2 %2194 }
 0xf9a   :  { %v2219_v5 = vsel %vm2218_vm9, %v2217_v4, %v2538_v3  ;;  %v2222_v38 = vsel %vm2218_vm9, %v2221_v24, %v2539_v19  ;;  %v2197_v42 = vmul.f32 %v2195_v53, %v2192_v17 }
 0xf9b   :  { %2367 = vmatmul.f32.vlgmr.msra.gmra.mxu2 %v2219_v5  ;;  %2387 = vmatmul.f32.vlgmr.msra.gmra.mxu3 %v2222_v38 }
 0xf9c   :  { %v2199_v49 = vadd.f32 %v2198_v6, %v2197_v42 }
 0xf9f   :  { %v2542_v26 = vpop.permute.xlu1 %2541 }
 0xfa0   :  { %v2544_v50 = vunpack.i.h.bf16 %v2542_v26  ;;  %v2543_v45 = vunpack.i.l.bf16 %v2542_v26 }
 0xfa1   :  { %v2527_v18 = vpop.permute.xlu2 %2526 }
 0xfa2   :  { %v2529_v9 = vunpack.i.h.bf16 %v2527_v18  ;;  %v2528_v56 = vunpack.i.l.bf16 %v2527_v18 }
 0xfa4   :  { %v2244_v44 = vsel %vm204_vm1, %v3471_v11, %v2529_v9  ;;  %v2241_v29 = vsel %vm204_vm1, %v2199_v49, %v2528_v56  ;;  %v2547_v11 = vld [vmem:[%s3901_s13] ss:$0 sm:$0xff]  ;;  %vm2396_vm1 = vcmask 31744  }
 0xfa5   :  { %v2242_v40 = vsel %vm2216_vm8, %v2241_v29, %v2533_v55  ;;  %v2245_v60 = vsel %vm2216_vm8, %v2244_v44, %v2534_v14 }
 0xfa6   :  { %v2243_v8 = vsel %vm2218_vm9, %v2242_v40, %v2543_v45  ;;  %v2246_v13 = vsel %vm2218_vm9, %v2245_v60, %v2544_v50 }
 0xfa7   :  { %2327 = vmatmul.f32.vlgmr.msrb.gmra.mxu0 %v2243_v8  ;;  %2347 = vmatmul.f32.vlgmr.msrb.gmra.mxu1 %v2246_v13 }
0x101e   :  { %v2368_v0 = vpop.f32.mrf.mxu2  ;;  %v2388_v15 = vpop.f32.mrf.mxu3 }
0x1024   :  { %v2328_v27 = vpop.f32.mrf.mxu0  ;;  %v2348_v43 = vpop.f32.mrf.mxu1 }
0x1025   :  { %v2349_v1 = vadd.f32 %v2348_v43, %v2328_v27 }
0x1027   :  { %v2369_v51 = vadd.f32 %v2368_v0, %v2349_v1 }
0x1029   :  { %v2389_v16 = vadd.f32 %v2388_v15, %v2369_v51 }
0x102b   :  { %v2395_v62 = vadd.f32 %v2547_v11, %v2389_v16 }
0x102d   :  { %v2397_v46 = vsel %vm2396_vm1, %v2395_v62, -inf }
0x102e   :  { %2398 = vmax.xlane.f32.xlu2 %v2397_v46 }
0x10a1   :  { %v2399_v23 = vpop.xlane.xlu2 %2398 }
0x10a2   :  { %v2400_v57 = vsub.f32 %v2395_v62, %v2399_v23 }
0x10a4   :  { %v2401_v20 = vmul.f32 1.442695, %v2400_v57 }
0x10a6   :  { %2708 = vpow2.f32 %v2401_v20 }
0x10ac   :  { %v2709_v39 = vpop.eup %2708 }
0x10ad   :  { %v2403_v22 = vsel %vm2396_vm1, %v2709_v39, 0.0 }
0x10ae   :  { %2404 = vadd.xlane.f32.xlu0 %v2403_v22 }
0x1121   :  { %v2405_v28 = vpop.xlane.xlu0 %2404 }
0x1122   :  { %2710 = vrcp.f32 %v2405_v28  ;;  %v2417_v33 = vand.u32 2147483648, %v2405_v28  ;;  %v2415_v54 = vand.u32 2147483647, %v2405_v28  ;;  %vm2411_vm12 = vweird.f32 %v2405_v28 }
0x1124   :  { %v2418_v31 = vor.u32 1.1754944e-38, %v2417_v33  ;;  %vm2416_vm14 = vcmp.eq.f32.partialorder %v2415_v54, 8.507059e+37 }
0x1128   :  { %v2711_v2 = vpop.eup %2710 }
0x1129   :  { %v2407_v52 = vmul.f32 %v2711_v2, %v2405_v28  ;;  %vm2412_vm11 = vweird.f32 %v2711_v2 }
0x112a   :  { %vm2413_vm13 = vmor %vm2411_vm12, %vm2412_vm11 }
0x112b   :  { %v2408_v59 = vsub.f32 1.0, %v2407_v52 }
0x112d   :  { %v2409_v7 = vmul.f32 %v2711_v2, %v2408_v59 }
0x112f   :  { %v2410_v37 = vadd.f32 %v2711_v2, %v2409_v7 }
0x1131   :  { %v2414_v58 = vsel %vm2413_vm13, %v2711_v2, %v2410_v37 }
0x1132   :  { %v2419_v30 = vsel %vm2416_vm14, %v2418_v31, %v2414_v58 }
0x1133   :  { %v2420_v21 = vmul.f32 %v2709_v39, %v2419_v30 }
0x1135   :  { %2421 = vst.msk [vmem:[%s3902_s14] sm:$0xff] %vm2396_vm1, %v2420_v21 }

</bundles_post_ra>
